<compile_context>
chip_gen: v7x
topology: tpu7x:2x2x1
jax: 0.10.0
libtpu: 0.0.40
codegen_flags: <defaults>
</compile_context>

<pallas_src>
import numpy as np
import jax
import jax.numpy as jnp
from jax import lax
from jax.experimental import pallas as pl
from jax.experimental.pallas import tpu as pltpu

EPS = 1e-3


# ----------------------------- Pallas kernel ------------------------------ #
def _inception3a_kernel(x_ref,
                        w123_ref, b123_ref,
                        w23b_ref, b23b_ref,
                        w4_ref, b4_ref,
                        o_ref,
                        tpad_ref, ppad_ref):
    Bt, H, W, Cin = x_ref.shape
    M = Bt * H * W
    C1, C2, C3, C4 = 64, 128, 32, 32
    Ct = tpad_ref.shape[-1]                      # 112 = 96 (branch2) + 16 (branch3)

    x = x_ref[...]                               # (Bt, H, W, 192) f32
    x_flat = x.reshape(M, Cin)
    xb = x_flat.astype(jnp.bfloat16)

    # ---- fused 1x1 convs (branch1 + branch2a + branch3a): (M,192)@(192,176) ----
    a = jnp.dot(xb, w123_ref[...], preferred_element_type=jnp.float32)
    a = jnp.maximum(a + b123_ref[...], 0.0)
    y1 = a[:, :C1]                               # (M, 64)
    t23 = a[:, C1:C1 + Ct]                       # (M, 112) = [branch2 96 | branch3 16]

    # ---- zero-halo scratch for the fused 3x3 convs ----
    # Only the thin border is (re)written each step (cheap, and safe when the
    # batch axis is sharded across TensorCores); the interior is overwritten.
    zrow = jnp.zeros((Bt, 1, W + 2, Ct), jnp.float32)
    zcol = jnp.zeros((Bt, H + 2, 1, Ct), jnp.float32)
    tpad_ref[:, 0:1, :, :] = zrow
    tpad_ref[:, H + 1:H + 2, :, :] = zrow
    tpad_ref[:, :, 0:1, :] = zcol
    tpad_ref[:, :, W + 1:W + 2, :] = zcol
    tpad_ref[:, 1:H + 1, 1:W + 1, :] = t23.reshape(Bt, H, W, Ct)

    # im2col: 9 shifted windows -> (M, 1008), ONE matmul for both 3x3 branches.
    wins = []
    for dy in range(3):
        for dx in range(3):
            wins.append(tpad_ref[:, dy:dy + H, dx:dx + W, :].reshape(M, Ct))
    col = jnp.concatenate(wins, axis=-1).astype(jnp.bfloat16)    # (M, 9*112)
    a23 = jnp.dot(col, w23b_ref[...], preferred_element_type=jnp.float32)
    a23 = jnp.maximum(a23 + b23b_ref[...], 0.0)
    y2 = a23[:, :C2]                             # (M, 128)
    y3 = a23[:, C2:C2 + C3]                      # (M, 32)

    # ---- branch4: 3x3/1 maxpool (pad=1, -inf border) -> 1x1 conv 192->32 ----
    ninf = jnp.float32(-jnp.inf)
    prow = jnp.full((Bt, 1, W + 2, Cin), ninf, jnp.float32)
    pcol = jnp.full((Bt, H + 2, 1, Cin), ninf, jnp.float32)
    ppad_ref[:, 0:1, :, :] = prow
    ppad_ref[:, H + 1:H + 2, :, :] = prow
    ppad_ref[:, :, 0:1, :] = pcol
    ppad_ref[:, :, W + 1:W + 2, :] = pcol
    ppad_ref[:, 1:H + 1, 1:W + 1, :] = x

    xp = ppad_ref[...]                           # (Bt, H+2, W+2, 192)
    # separable 3x3 max: horizontal then vertical (4 maximum ops total)
    hmax = jnp.maximum(jnp.maximum(xp[:, :, 0:W, :], xp[:, :, 1:W + 1, :]),
                       xp[:, :, 2:W + 2, :])
    pool = jnp.maximum(jnp.maximum(hmax[:, 0:H], hmax[:, 1:H + 1]),
                       hmax[:, 2:H + 2])         # (Bt, H, W, 192)
    pb = pool.reshape(M, Cin).astype(jnp.bfloat16)
    y4 = jnp.maximum(
        jnp.dot(pb, w4_ref[...], preferred_element_type=jnp.float32) + b4_ref[...],
        0.0)                                     # (M, 32)

    out = jnp.concatenate([y1, y2, y3, y4], axis=-1)             # (M, 256)
    o_ref[...] = out.reshape(Bt, H, W, C1 + C2 + C3 + C4)


# ------------------------------- Wrapper ---------------------------------- #
def _choose_bt(N, H, W, target_rows=256, max_rows=8192):
    """Pick images-per-grid-step so the matmul M dimension fills the MXU."""
    divs = [d for d in range(1, N + 1) if N % d == 0]
    bt = divs[-1]
    for d in divs:
        if d * H * W >= target_rows:
            bt = d
            break
    while bt > 1 and bt * H * W > max_rows:
        smaller = [d for d in divs if d < bt]
        bt = smaller[-1] if smaller else 1
    return bt


def inception3a_forward(x_nchw, fp, block_n=None):
    N, C, H, W = x_nchw.shape
    assert C == 192, "inception3a expects 192 input channels"
    # TODO(synk): NCHW<->NHWC transposes stay wrapper-side XLA ops; in a full
    # NHWC pipeline they (and the final transpose) would be removed entirely.
    x = jnp.transpose(x_nchw, (0, 2, 3, 1)).astype(jnp.float32)   # NHWC

    Bt = block_n if block_n is not None else _choose_bt(N, H, W)
    assert N % Bt == 0

    weights = [fp['w123'], fp['b123'], fp['w23b'], fp['b23b'], fp['w4'], fp['b4']]

    def full_spec(a):
        nd = a.ndim
        return pl.BlockSpec(a.shape, lambda n, _nd=nd: (0,) * _nd)

    in_specs = [pl.BlockSpec((Bt, H, W, 192), lambda n: (n, 0, 0, 0))]
    in_specs += [full_spec(w) for w in weights]

    Cout = 256
    out_shape = jax.ShapeDtypeStruct((N, H, W, Cout), jnp.float32)
    out_specs = pl.BlockSpec((Bt, H, W, Cout), lambda n: (n, 0, 0, 0))

    grid_spec = pltpu.PrefetchScalarGridSpec(
        num_scalar_prefetch=0,
        grid=(N // Bt,),
        in_specs=in_specs,
        out_specs=out_specs,
        scratch_shapes=[pltpu.VMEM((Bt, H + 2, W + 2, 112), jnp.float32),
                        pltpu.VMEM((Bt, H + 2, W + 2, 192), jnp.float32)])

    y = pl.pallas_call(
        _inception3a_kernel,
        out_shape=out_shape,
        grid_spec=grid_spec,
        compiler_params=pltpu.CompilerParams(
            dimension_semantics=("parallel",)),      # shards batch across v7x TCs
    )(x, *weights)

    return jnp.transpose(y, (0, 3, 1, 2))            # back to NCHW


# ----------------------- Deterministic parameter init --------------------- #
def init_params(key):
    ks = jax.random.split(key, 12)

    def conv(k, cout, cin, kh, kw):
        fan_in = cin * kh * kw
        return jax.random.normal(k, (cout, cin, kh, kw), jnp.float32) / np.sqrt(fan_in)

    def bn(k, c):
        k1, k2, k3, k4 = jax.random.split(k, 4)
        gamma = 1.0 + 0.1 * jax.random.normal(k1, (c,), jnp.float32)
        beta = 0.1 * jax.random.normal(k2, (c,), jnp.float32)
        mean = 0.1 * jax.random.normal(k3, (c,), jnp.float32)
        var = 0.5 + jax.nn.softplus(jax.random.normal(k4, (c,), jnp.float32))
        return (gamma, beta, mean, var)

    return dict(
        w1=conv(ks[0], 64, 192, 1, 1),  bn1=bn(ks[1], 64),
        w2a=conv(ks[2], 96, 192, 1, 1), bn2a=bn(ks[3], 96),
        w2b=conv(ks[4], 128, 96, 3, 3), bn2b=bn(ks[5], 128),
        w3a=conv(ks[6], 16, 192, 1, 1), bn3a=bn(ks[7], 16),
        w3b=conv(ks[8], 32, 16, 3, 3),  bn3b=bn(ks[9], 32),
        w4=conv(ks[10], 32, 192, 1, 1), bn4=bn(ks[11], 32),
    )


def _fold_1x1(w, bn):
    gamma, beta, mean, var = bn
    s = gamma / jnp.sqrt(var + EPS)
    W = jnp.transpose(w[:, :, 0, 0], (1, 0)) * s[None, :]        # (Cin, Cout)
    b = (beta - mean * s)[None, :]                               # (1, Cout)
    return W, b


def _fold_3x3(w, bn):
    gamma, beta, mean, var = bn
    s = gamma / jnp.sqrt(var + EPS)
    Wt = jnp.transpose(w, (2, 3, 1, 0)) * s                      # (3,3,Cin,Cout)
    W = Wt.reshape(9, w.shape[1], w.shape[0])                    # (9,Cin,Cout)
    b = (beta - mean * s)[None, :]
    return W, b


def fold_params(p):
    """Fold BN into conv weights and build the fused/bf16 kernel parameters."""
    w1, b1 = _fold_1x1(p['w1'], p['bn1'])        # (192,64)
    w2a, b2a = _fold_1x1(p['w2a'], p['bn2a'])    # (192,96)
    w3a, b3a = _fold_1x1(p['w3a'], p['bn3a'])    # (192,16)
    w2b, b2b = _fold_3x3(p['w2b'], p['bn2b'])    # (9,96,128)
    w3b, b3b = _fold_3x3(p['w3b'], p['bn3b'])    # (9,16,32)
    w4, b4 = _fold_1x1(p['w4'], p['bn4'])        # (192,32)

    # fused 1x1 weights for branches 1-3
    w123 = jnp.concatenate([w1, w2a, w3a], axis=1)               # (192,176)
    b123 = jnp.concatenate([b1, b2a, b3a], axis=1)               # (1,176)

    # fused im2col weight for the two 3x3 convs: per tap a (112,160) block
    # [[w2b_k, 0], [0, w3b_k]] stacked over the 9 taps -> (1008,160)
    blocks = []
    for k in range(9):
        top = jnp.concatenate([w2b[k], jnp.zeros((96, 32), jnp.float32)], axis=1)
        bot = jnp.concatenate([jnp.zeros((16, 128), jnp.float32), w3b[k]], axis=1)
        blocks.append(jnp.concatenate([top, bot], axis=0))
    w23b = jnp.concatenate(blocks, axis=0)                       # (1008,160)
    b23b = jnp.concatenate([b2b, b3b], axis=1)                   # (1,160)

    return dict(w123=w123.astype(jnp.bfloat16), b123=b123,
                w23b=w23b.astype(jnp.bfloat16), b23b=b23b,
                w4=w4.astype(jnp.bfloat16), b4=b4)


# ---------------------- Pure-JAX reference (NCHW, f32) --------------------- #
def reference_forward(x, p):
    def conv(x, w, pad=0):
        return lax.conv_general_dilated(
            x, w, (1, 1), [(pad, pad), (pad, pad)],
            dimension_numbers=('NCHW', 'OIHW', 'NCHW'),
            precision=lax.Precision.HIGHEST)

    def bnorm(x, bn):
        g, b, m, v = bn
        return ((x - m[None, :, None, None]) /
                jnp.sqrt(v[None, :, None, None] + EPS) *
                g[None, :, None, None] + b[None, :, None, None])

    relu = lambda t: jnp.maximum(t, 0.0)
    b1 = relu(bnorm(conv(x, p['w1']), p['bn1']))
    t = relu(bnorm(conv(x, p['w2a']), p['bn2a']))
    b2 = relu(bnorm(conv(t, p['w2b'], pad=1), p['bn2b']))
    t = relu(bnorm(conv(x, p['w3a']), p['bn3a']))
    b3 = relu(bnorm(conv(t, p['w3b'], pad=1), p['bn3b']))
    pooled = lax.reduce_window(x, -jnp.inf, lax.max,
                               (1, 1, 3, 3), (1, 1, 1, 1),
                               [(0, 0), (0, 0), (1, 1), (1, 1)])
    b4 = relu(bnorm(conv(pooled, p['w4']), p['bn4']))
    return jnp.concatenate([b1, b2, b3, b4], axis=1)


if __name__ == "__main__":
    key = jax.random.PRNGKey(0)
    kx, kp = jax.random.split(key)

    N, C, H, W = 2, 192, 8, 8            # 192 in-channels fixed by the module
    x = jax.random.normal(kx, (N, C, H, W), jnp.float32)

    params = init_params(kp)             # TODO(synk): deterministic init stands in for the .pth checkpoints
    fp = fold_params(params)

    out = inception3a_forward(x, fp)
    out = jax.block_until_ready(out)
    assert out.shape == (N, 256, H, W)

    ref = reference_forward(x, params)
    # kernel runs native-bf16 MXU matmuls with f32 accumulation -> bf16-class tolerance
    np.testing.assert_allclose(np.asarray(out), np.asarray(ref),
                               atol=4e-2, rtol=4e-2)
    print("KERNEL_OK")
</pallas_src>

<mosaic_0001>
module attributes {stable_mosaic.version = 11 : i64} {
  func.func @_inception3a_kernel(%arg0: i32, %arg1: memref<2x8x8x192xf32, #tpu.memory_space<vmem>>, %arg2: memref<192x176xbf16, #tpu.memory_space<vmem>>, %arg3: memref<1x176xf32, #tpu.memory_space<vmem>>, %arg4: memref<1008x160xbf16, #tpu.memory_space<vmem>>, %arg5: memref<1x160xf32, #tpu.memory_space<vmem>>, %arg6: memref<192x32xbf16, #tpu.memory_space<vmem>>, %arg7: memref<1x32xf32, #tpu.memory_space<vmem>>, %arg8: memref<2x8x8x256xf32, #tpu.memory_space<vmem>>, %arg9: memref<2x10x10x112xf32, #tpu.memory_space<vmem>>, %arg10: memref<2x10x10x192xf32, #tpu.memory_space<vmem>>) attributes {dimension_semantics = [#tpu.dimension_semantics<parallel>], iteration_bounds = array<i64: 1>, scalar_prefetch = 0 : i64, scratch_operands = 2 : i64, tpu.core_type = #tpu.core_type<tc>, window_params = [{transform_indices = @transform_0, window_bounds = array<i64: 2, 8, 8, 192>}, {pipeline_mode = #tpu.pipeline_mode<synchronous>, transform_indices = @transform_1, window_bounds = array<i64: 192, 176>}, {pipeline_mode = #tpu.pipeline_mode<synchronous>, transform_indices = @transform_2, window_bounds = array<i64: 1, 176>}, {pipeline_mode = #tpu.pipeline_mode<synchronous>, transform_indices = @transform_3, window_bounds = array<i64: 1008, 160>}, {pipeline_mode = #tpu.pipeline_mode<synchronous>, transform_indices = @transform_4, window_bounds = array<i64: 1, 160>}, {pipeline_mode = #tpu.pipeline_mode<synchronous>, transform_indices = @transform_5, window_bounds = array<i64: 192, 32>}, {pipeline_mode = #tpu.pipeline_mode<synchronous>, transform_indices = @transform_6, window_bounds = array<i64: 1, 32>}, {transform_indices = @transform_7, window_bounds = array<i64: 2, 8, 8, 256>}]} {
    %c0 = arith.constant 0 : index
    %c0_0 = arith.constant 0 : index
    %c0_1 = arith.constant 0 : index
    %c0_2 = arith.constant 0 : index
    %0 = vector.load %arg1[%c0, %c0_0, %c0_1, %c0_2] : memref<2x8x8x192xf32, #tpu.memory_space<vmem>>, vector<2x8x8x192xf32>
    %1 = vector.shape_cast %0 : vector<2x8x8x192xf32> to vector<128x192xf32>
    %2 = arith.truncf %1 : vector<128x192xf32> to vector<128x192xbf16>
    %c0_3 = arith.constant 0 : index
    %c0_4 = arith.constant 0 : index
    %3 = vector.load %arg2[%c0_3, %c0_4] : memref<192x176xbf16, #tpu.memory_space<vmem>>, vector<192x176xbf16>
    %cst = arith.constant dense<0.000000e+00> : vector<128x176xf32>
    %4 = tpu.matmul %2, %3, %cst {dimension_numbers = #tpu.dot_dimension_numbers<[1], [0], [0], [1], [0, 0, 1, 1], [], []>} : vector<128x192xbf16>, vector<192x176xbf16>, vector<128x176xf32> -> vector<128x176xf32>
    %c0_5 = arith.constant 0 : index
    %c0_6 = arith.constant 0 : index
    %5 = vector.load %arg3[%c0_5, %c0_6] : memref<1x176xf32, #tpu.memory_space<vmem>>, vector<1x176xf32>
    %6 = vector.broadcast %5 : vector<1x176xf32> to vector<128x176xf32>
    %7 = arith.addf %4, %6 : vector<128x176xf32>
    %cst_7 = arith.constant 0.000000e+00 : f32
    %8 = vector.broadcast %cst_7 : f32 to vector<128x176xf32>
    %9 = arith.maximumf %7, %8 : vector<128x176xf32>
    %10 = vector.extract_strided_slice %9 {offsets = [0, 0], sizes = [128, 64], strides = [1, 1]} : vector<128x176xf32> to vector<128x64xf32>
    %11 = vector.extract_strided_slice %9 {offsets = [0, 64], sizes = [128, 112], strides = [1, 1]} : vector<128x176xf32> to vector<128x112xf32>
    %cst_8 = arith.constant 0.000000e+00 : f32
    %12 = vector.broadcast %cst_8 : f32 to vector<2x1x10x112xf32>
    %cst_9 = arith.constant 0.000000e+00 : f32
    %13 = vector.broadcast %cst_9 : f32 to vector<2x10x1x112xf32>
    %c0_10 = arith.constant 0 : index
    %c0_11 = arith.constant 0 : index
    %c0_12 = arith.constant 0 : index
    %c0_13 = arith.constant 0 : index
    %14 = vector.load %arg9[%c0_10, %c0_11, %c0_12, %c0_13] : memref<2x10x10x112xf32, #tpu.memory_space<vmem>>, vector<2x1x10x112xf32>
    tpu.vector_store %arg9[%c0_10, %c0_11, %c0_12, %c0_13], %12 {strides = array<i32>} : memref<2x10x10x112xf32, #tpu.memory_space<vmem>>, vector<2x1x10x112xf32>,
    %c0_14 = arith.constant 0 : index
    %c9 = arith.constant 9 : index
    %c0_15 = arith.constant 0 : index
    %c0_16 = arith.constant 0 : index
    %15 = vector.load %arg9[%c0_14, %c9, %c0_15, %c0_16] : memref<2x10x10x112xf32, #tpu.memory_space<vmem>>, vector<2x1x10x112xf32>
    tpu.vector_store %arg9[%c0_14, %c9, %c0_15, %c0_16], %12 {strides = array<i32>} : memref<2x10x10x112xf32, #tpu.memory_space<vmem>>, vector<2x1x10x112xf32>,
    %c0_17 = arith.constant 0 : index
    %c0_18 = arith.constant 0 : index
    %c0_19 = arith.constant 0 : index
    %c0_20 = arith.constant 0 : index
    %16 = vector.load %arg9[%c0_17, %c0_18, %c0_19, %c0_20] : memref<2x10x10x112xf32, #tpu.memory_space<vmem>>, vector<2x10x1x112xf32>
    tpu.vector_store %arg9[%c0_17, %c0_18, %c0_19, %c0_20], %13 {strides = array<i32>} : memref<2x10x10x112xf32, #tpu.memory_space<vmem>>, vector<2x10x1x112xf32>,
    %c0_21 = arith.constant 0 : index
    %c0_22 = arith.constant 0 : index
    %c9_23 = arith.constant 9 : index
    %c0_24 = arith.constant 0 : index
    %17 = vector.load %arg9[%c0_21, %c0_22, %c9_23, %c0_24] : memref<2x10x10x112xf32, #tpu.memory_space<vmem>>, vector<2x10x1x112xf32>
    tpu.vector_store %arg9[%c0_21, %c0_22, %c9_23, %c0_24], %13 {strides = array<i32>} : memref<2x10x10x112xf32, #tpu.memory_space<vmem>>, vector<2x10x1x112xf32>,
    %18 = vector.shape_cast %11 : vector<128x112xf32> to vector<2x8x8x112xf32>
    %c0_25 = arith.constant 0 : index
    %c1 = arith.constant 1 : index
    %c1_26 = arith.constant 1 : index
    %c0_27 = arith.constant 0 : index
    %19 = vector.load %arg9[%c0_25, %c1, %c1_26, %c0_27] : memref<2x10x10x112xf32, #tpu.memory_space<vmem>>, vector<2x8x8x112xf32>
    tpu.vector_store %arg9[%c0_25, %c1, %c1_26, %c0_27], %18 {strides = array<i32>} : memref<2x10x10x112xf32, #tpu.memory_space<vmem>>, vector<2x8x8x112xf32>,
    %c0_28 = arith.constant 0 : index
    %c0_29 = arith.constant 0 : index
    %c0_30 = arith.constant 0 : index
    %c0_31 = arith.constant 0 : index
    %20 = vector.load %arg9[%c0_28, %c0_29, %c0_30, %c0_31] : memref<2x10x10x112xf32, #tpu.memory_space<vmem>>, vector<2x8x8x112xf32>
    %21 = vector.shape_cast %20 : vector<2x8x8x112xf32> to vector<128x112xf32>
    %c0_32 = arith.constant 0 : index
    %c0_33 = arith.constant 0 : index
    %c1_34 = arith.constant 1 : index
    %c0_35 = arith.constant 0 : index
    %22 = vector.load %arg9[%c0_32, %c0_33, %c1_34, %c0_35] : memref<2x10x10x112xf32, #tpu.memory_space<vmem>>, vector<2x8x8x112xf32>
    %23 = vector.shape_cast %22 : vector<2x8x8x112xf32> to vector<128x112xf32>
    %c0_36 = arith.constant 0 : index
    %c0_37 = arith.constant 0 : index
    %c2 = arith.constant 2 : index
    %c0_38 = arith.constant 0 : index
    %24 = vector.load %arg9[%c0_36, %c0_37, %c2, %c0_38] : memref<2x10x10x112xf32, #tpu.memory_space<vmem>>, vector<2x8x8x112xf32>
    %25 = vector.shape_cast %24 : vector<2x8x8x112xf32> to vector<128x112xf32>
    %c0_39 = arith.constant 0 : index
    %c1_40 = arith.constant 1 : index
    %c0_41 = arith.constant 0 : index
    %c0_42 = arith.constant 0 : index
    %26 = vector.load %arg9[%c0_39, %c1_40, %c0_41, %c0_42] : memref<2x10x10x112xf32, #tpu.memory_space<vmem>>, vector<2x8x8x112xf32>
    %27 = vector.shape_cast %26 : vector<2x8x8x112xf32> to vector<128x112xf32>
    %c0_43 = arith.constant 0 : index
    %c1_44 = arith.constant 1 : index
    %c1_45 = arith.constant 1 : index
    %c0_46 = arith.constant 0 : index
    %28 = vector.load %arg9[%c0_43, %c1_44, %c1_45, %c0_46] : memref<2x10x10x112xf32, #tpu.memory_space<vmem>>, vector<2x8x8x112xf32>
    %29 = vector.shape_cast %28 : vector<2x8x8x112xf32> to vector<128x112xf32>
    %c0_47 = arith.constant 0 : index
    %c1_48 = arith.constant 1 : index
    %c2_49 = arith.constant 2 : index
    %c0_50 = arith.constant 0 : index
    %30 = vector.load %arg9[%c0_47, %c1_48, %c2_49, %c0_50] : memref<2x10x10x112xf32, #tpu.memory_space<vmem>>, vector<2x8x8x112xf32>
    %31 = vector.shape_cast %30 : vector<2x8x8x112xf32> to vector<128x112xf32>
    %c0_51 = arith.constant 0 : index
    %c2_52 = arith.constant 2 : index
    %c0_53 = arith.constant 0 : index
    %c0_54 = arith.constant 0 : index
    %32 = vector.load %arg9[%c0_51, %c2_52, %c0_53, %c0_54] : memref<2x10x10x112xf32, #tpu.memory_space<vmem>>, vector<2x8x8x112xf32>
    %33 = vector.shape_cast %32 : vector<2x8x8x112xf32> to vector<128x112xf32>
    %c0_55 = arith.constant 0 : index
    %c2_56 = arith.constant 2 : index
    %c1_57 = arith.constant 1 : index
    %c0_58 = arith.constant 0 : index
    %34 = vector.load %arg9[%c0_55, %c2_56, %c1_57, %c0_58] : memref<2x10x10x112xf32, #tpu.memory_space<vmem>>, vector<2x8x8x112xf32>
    %35 = vector.shape_cast %34 : vector<2x8x8x112xf32> to vector<128x112xf32>
    %c0_59 = arith.constant 0 : index
    %c2_60 = arith.constant 2 : index
    %c2_61 = arith.constant 2 : index
    %c0_62 = arith.constant 0 : index
    %36 = vector.load %arg9[%c0_59, %c2_60, %c2_61, %c0_62] : memref<2x10x10x112xf32, #tpu.memory_space<vmem>>, vector<2x8x8x112xf32>
    %37 = vector.shape_cast %36 : vector<2x8x8x112xf32> to vector<128x112xf32>
    %38 = tpu.concatenate %21, %23, %25, %27, %29, %31, %33, %35, %37 in 1 : vector<128x112xf32>, vector<128x112xf32>, vector<128x112xf32>, vector<128x112xf32>, vector<128x112xf32>, vector<128x112xf32>, vector<128x112xf32>, vector<128x112xf32>, vector<128x112xf32> -> vector<128x1008xf32>
    %39 = arith.truncf %38 : vector<128x1008xf32> to vector<128x1008xbf16>
    %c0_63 = arith.constant 0 : index
    %c0_64 = arith.constant 0 : index
    %40 = vector.load %arg4[%c0_63, %c0_64] : memref<1008x160xbf16, #tpu.memory_space<vmem>>, vector<1008x160xbf16>
    %cst_65 = arith.constant dense<0.000000e+00> : vector<128x160xf32>
    %41 = tpu.matmul %39, %40, %cst_65 {dimension_numbers = #tpu.dot_dimension_numbers<[1], [0], [0], [1], [0, 0, 1, 1], [], []>} : vector<128x1008xbf16>, vector<1008x160xbf16>, vector<128x160xf32> -> vector<128x160xf32>
    %c0_66 = arith.constant 0 : index
    %c0_67 = arith.constant 0 : index
    %42 = vector.load %arg5[%c0_66, %c0_67] : memref<1x160xf32, #tpu.memory_space<vmem>>, vector<1x160xf32>
    %43 = vector.broadcast %42 : vector<1x160xf32> to vector<128x160xf32>
    %44 = arith.addf %41, %43 : vector<128x160xf32>
    %cst_68 = arith.constant 0.000000e+00 : f32
    %45 = vector.broadcast %cst_68 : f32 to vector<128x160xf32>
    %46 = arith.maximumf %44, %45 : vector<128x160xf32>
    %47 = vector.extract_strided_slice %46 {offsets = [0, 0], sizes = [128, 128], strides = [1, 1]} : vector<128x160xf32> to vector<128x128xf32>
    %48 = vector.extract_strided_slice %46 {offsets = [0, 128], sizes = [128, 32], strides = [1, 1]} : vector<128x160xf32> to vector<128x32xf32>
    %cst_69 = arith.constant 0xFF800000 : f32
    %49 = vector.broadcast %cst_69 : f32 to vector<2x1x10x192xf32>
    %cst_70 = arith.constant 0xFF800000 : f32
    %50 = vector.broadcast %cst_70 : f32 to vector<2x10x1x192xf32>
    %c0_71 = arith.constant 0 : index
    %c0_72 = arith.constant 0 : index
    %c0_73 = arith.constant 0 : index
    %c0_74 = arith.constant 0 : index
    %51 = vector.load %arg10[%c0_71, %c0_72, %c0_73, %c0_74] : memref<2x10x10x192xf32, #tpu.memory_space<vmem>>, vector<2x1x10x192xf32>
    tpu.vector_store %arg10[%c0_71, %c0_72, %c0_73, %c0_74], %49 {strides = array<i32>} : memref<2x10x10x192xf32, #tpu.memory_space<vmem>>, vector<2x1x10x192xf32>,
    %c0_75 = arith.constant 0 : index
    %c9_76 = arith.constant 9 : index
    %c0_77 = arith.constant 0 : index
    %c0_78 = arith.constant 0 : index
    %52 = vector.load %arg10[%c0_75, %c9_76, %c0_77, %c0_78] : memref<2x10x10x192xf32, #tpu.memory_space<vmem>>, vector<2x1x10x192xf32>
    tpu.vector_store %arg10[%c0_75, %c9_76, %c0_77, %c0_78], %49 {strides = array<i32>} : memref<2x10x10x192xf32, #tpu.memory_space<vmem>>, vector<2x1x10x192xf32>,
    %c0_79 = arith.constant 0 : index
    %c0_80 = arith.constant 0 : index
    %c0_81 = arith.constant 0 : index
    %c0_82 = arith.constant 0 : index
    %53 = vector.load %arg10[%c0_79, %c0_80, %c0_81, %c0_82] : memref<2x10x10x192xf32, #tpu.memory_space<vmem>>, vector<2x10x1x192xf32>
    tpu.vector_store %arg10[%c0_79, %c0_80, %c0_81, %c0_82], %50 {strides = array<i32>} : memref<2x10x10x192xf32, #tpu.memory_space<vmem>>, vector<2x10x1x192xf32>,
    %c0_83 = arith.constant 0 : index
    %c0_84 = arith.constant 0 : index
    %c9_85 = arith.constant 9 : index
    %c0_86 = arith.constant 0 : index
    %54 = vector.load %arg10[%c0_83, %c0_84, %c9_85, %c0_86] : memref<2x10x10x192xf32, #tpu.memory_space<vmem>>, vector<2x10x1x192xf32>
    tpu.vector_store %arg10[%c0_83, %c0_84, %c9_85, %c0_86], %50 {strides = array<i32>} : memref<2x10x10x192xf32, #tpu.memory_space<vmem>>, vector<2x10x1x192xf32>,
    %c0_87 = arith.constant 0 : index
    %c1_88 = arith.constant 1 : index
    %c1_89 = arith.constant 1 : index
    %c0_90 = arith.constant 0 : index
    %55 = vector.load %arg10[%c0_87, %c1_88, %c1_89, %c0_90] : memref<2x10x10x192xf32, #tpu.memory_space<vmem>>, vector<2x8x8x192xf32>
    tpu.vector_store %arg10[%c0_87, %c1_88, %c1_89, %c0_90], %0 {strides = array<i32>} : memref<2x10x10x192xf32, #tpu.memory_space<vmem>>, vector<2x8x8x192xf32>,
    %c0_91 = arith.constant 0 : index
    %c0_92 = arith.constant 0 : index
    %c0_93 = arith.constant 0 : index
    %c0_94 = arith.constant 0 : index
    %56 = vector.load %arg10[%c0_91, %c0_92, %c0_93, %c0_94] : memref<2x10x10x192xf32, #tpu.memory_space<vmem>>, vector<2x10x10x192xf32>
    %57 = vector.extract_strided_slice %56 {offsets = [0, 0, 0, 0], sizes = [2, 10, 8, 192], strides = [1, 1, 1, 1]} : vector<2x10x10x192xf32> to vector<2x10x8x192xf32>
    %58 = vector.extract_strided_slice %56 {offsets = [0, 0, 1, 0], sizes = [2, 10, 8, 192], strides = [1, 1, 1, 1]} : vector<2x10x10x192xf32> to vector<2x10x8x192xf32>
    %59 = arith.maximumf %57, %58 : vector<2x10x8x192xf32>
    %60 = vector.extract_strided_slice %56 {offsets = [0, 0, 2, 0], sizes = [2, 10, 8, 192], strides = [1, 1, 1, 1]} : vector<2x10x10x192xf32> to vector<2x10x8x192xf32>
    %61 = arith.maximumf %59, %60 : vector<2x10x8x192xf32>
    %62 = vector.extract_strided_slice %61 {offsets = [0, 0, 0, 0], sizes = [2, 8, 8, 192], strides = [1, 1, 1, 1]} : vector<2x10x8x192xf32> to vector<2x8x8x192xf32>
    %63 = vector.extract_strided_slice %61 {offsets = [0, 1, 0, 0], sizes = [2, 8, 8, 192], strides = [1, 1, 1, 1]} : vector<2x10x8x192xf32> to vector<2x8x8x192xf32>
    %64 = arith.maximumf %62, %63 : vector<2x8x8x192xf32>
    %65 = vector.extract_strided_slice %61 {offsets = [0, 2, 0, 0], sizes = [2, 8, 8, 192], strides = [1, 1, 1, 1]} : vector<2x10x8x192xf32> to vector<2x8x8x192xf32>
    %66 = arith.maximumf %64, %65 : vector<2x8x8x192xf32>
    %67 = vector.shape_cast %66 : vector<2x8x8x192xf32> to vector<128x192xf32>
    %68 = arith.truncf %67 : vector<128x192xf32> to vector<128x192xbf16>
    %c0_95 = arith.constant 0 : index
    %c0_96 = arith.constant 0 : index
    %69 = vector.load %arg6[%c0_95, %c0_96] : memref<192x32xbf16, #tpu.memory_space<vmem>>, vector<192x32xbf16>
    %cst_97 = arith.constant dense<0.000000e+00> : vector<128x32xf32>
    %70 = tpu.matmul %68, %69, %cst_97 {dimension_numbers = #tpu.dot_dimension_numbers<[1], [0], [0], [1], [0, 0, 1, 1], [], []>} : vector<128x192xbf16>, vector<192x32xbf16>, vector<128x32xf32> -> vector<128x32xf32>
    %c0_98 = arith.constant 0 : index
    %c0_99 = arith.constant 0 : index
    %71 = vector.load %arg7[%c0_98, %c0_99] : memref<1x32xf32, #tpu.memory_space<vmem>>, vector<1x32xf32>
    %72 = vector.broadcast %71 : vector<1x32xf32> to vector<128x32xf32>
    %73 = arith.addf %70, %72 : vector<128x32xf32>
    %cst_100 = arith.constant 0.000000e+00 : f32
    %74 = vector.broadcast %cst_100 : f32 to vector<128x32xf32>
    %75 = arith.maximumf %73, %74 : vector<128x32xf32>
    %76 = tpu.concatenate %10, %47, %48, %75 in 1 : vector<128x64xf32>, vector<128x128xf32>, vector<128x32xf32>, vector<128x32xf32> -> vector<128x256xf32>
    %77 = vector.shape_cast %76 : vector<128x256xf32> to vector<2x8x8x256xf32>
    %c0_101 = arith.constant 0 : index
    %c0_102 = arith.constant 0 : index
    %c0_103 = arith.constant 0 : index
    %c0_104 = arith.constant 0 : index
    %78 = vector.load %arg8[%c0_101, %c0_102, %c0_103, %c0_104] : memref<2x8x8x256xf32, #tpu.memory_space<vmem>>, vector<2x8x8x256xf32>
    tpu.vector_store %arg8[%c0_101, %c0_102, %c0_103, %c0_104], %77 {strides = array<i32>} : memref<2x8x8x256xf32, #tpu.memory_space<vmem>>, vector<2x8x8x256xf32>,
    return
  }
  func.func @transform_0(%arg0: i32) -> (i32, i32, i32, i32) {
    %c0_i32 = arith.constant 0 : i32
    %c0_i32_0 = arith.constant 0 : i32
    %c0_i32_1 = arith.constant 0 : i32
    %c0_i32_2 = arith.constant 0 : i32
    return %arg0, %c0_i32, %c0_i32_0, %c0_i32_1 : i32, i32, i32, i32
  }
  func.func @transform_1(%arg0: i32) -> (i32, i32) {
    %c0_i32 = arith.constant 0 : i32
    %c0_i32_0 = arith.constant 0 : i32
    %c0_i32_1 = arith.constant 0 : i32
    return %c0_i32, %c0_i32_0 : i32, i32
  }
  func.func @transform_2(%arg0: i32) -> (i32, i32) {
    %c0_i32 = arith.constant 0 : i32
    %c0_i32_0 = arith.constant 0 : i32
    %c0_i32_1 = arith.constant 0 : i32
    return %c0_i32, %c0_i32_0 : i32, i32
  }
  func.func @transform_3(%arg0: i32) -> (i32, i32) {
    %c0_i32 = arith.constant 0 : i32
    %c0_i32_0 = arith.constant 0 : i32
    %c0_i32_1 = arith.constant 0 : i32
    return %c0_i32, %c0_i32_0 : i32, i32
  }
  func.func @transform_4(%arg0: i32) -> (i32, i32) {
    %c0_i32 = arith.constant 0 : i32
    %c0_i32_0 = arith.constant 0 : i32
    %c0_i32_1 = arith.constant 0 : i32
    return %c0_i32, %c0_i32_0 : i32, i32
  }
  func.func @transform_5(%arg0: i32) -> (i32, i32) {
    %c0_i32 = arith.constant 0 : i32
    %c0_i32_0 = arith.constant 0 : i32
    %c0_i32_1 = arith.constant 0 : i32
    return %c0_i32, %c0_i32_0 : i32, i32
  }
  func.func @transform_6(%arg0: i32) -> (i32, i32) {
    %c0_i32 = arith.constant 0 : i32
    %c0_i32_0 = arith.constant 0 : i32
    %c0_i32_1 = arith.constant 0 : i32
    return %c0_i32, %c0_i32_0 : i32, i32
  }
  func.func @transform_7(%arg0: i32) -> (i32, i32, i32, i32) {
    %c0_i32 = arith.constant 0 : i32
    %c0_i32_0 = arith.constant 0 : i32
    %c0_i32_1 = arith.constant 0 : i32
    %c0_i32_2 = arith.constant 0 : i32
    return %arg0, %c0_i32, %c0_i32_0, %c0_i32_1 : i32, i32, i32, i32
  }
}

</mosaic_0001>

<bundles_post_ra>
// kernel: tpu_custom_call.1
= control target key start
LH: loop header
LB: loop body
LE: loop exit
PB: predicated region body
PF: predicated region fallthrough
CT: control target
= control target key end

     0   :  { %vm232_vm0 = vcmask 523264   ;;  %vm2888_vm1 = vcmask 523265   ;;  %vm2891_vm2 = vcmask 516096   ;;  %s8118_s0 = inlined_call_operand.vmem [shape: f32[2,8,8,192], index: 0, kind: input, shape index: {}]   ;;  %s8119_s1 = inlined_call_operand.vmem [shape: bf16[192,176], index: 1, kind: input, shape index: {}]   ;;  %s8120_s2 = inlined_call_operand.vmem [shape: f32[1,176], index: 2, kind: input, shape index: {}]   ;;  %s8121_s3 = inlined_call_operand.vmem [shape: bf16[1008,160], index: 3, kind: input, shape index: {}]   ;;  %s8122_s4 = inlined_call_operand.vmem [shape: f32[1,160], index: 4, kind: input, shape index: {}]   ;;  %s8123_s5 = inlined_call_operand.vmem [shape: bf16[192,32], index: 5, kind: input, shape index: {}]   ;;  %s8124_s6 = inlined_call_operand.vmem [shape: f32[1,32], index: 6, kind: input, shape index: {}]   ;;  %s8125_s7 = inlined_call_operand.hbm [shape: f32[2,8,8,256], index: 7, kind: output, shape index: {}]  }
   0x1   :  { %v4730_v0 = vld [vmem:[%s8119_s1 + $0x4] ss:$8 sps:$4 sm:$0xff]   ;;  %v4732_v1 = vld [vmem:[%s8119_s1] ss:$8 sps:$4 sm:$0xff]   ;;  %v4733_v2 = vld [vmem:[%s8119_s1 + $0x14] ss:$8 sps:$4 sm:$0xff]  }
   0x2   :  { %257 = vmatprep.subr.bf16.mxu0 %v4730_v0  ;;  %v4735_v3 = vld [vmem:[%s8119_s1 + $0x10] ss:$8 sps:$4 sm:$0xff]   ;;  %v4736_v4 = vld [vmem:[%s8119_s1 + $0x24] ss:$8 sps:$4 sm:$0xff]   ;;  %v4738_v5 = vld [vmem:[%s8119_s1 + $0x20] ss:$8 sps:$4 sm:$0xff]  }
   0x3   :  { %258 = vmatpush1.bf16.msra.mxu0 %v4732_v1  ;;  %v4739_v6 = vld [vmem:[%s8119_s1 + $0x34] ss:$8 sps:$4 sm:$0xff]   ;;  %v4741_v7 = vld [vmem:[%s8119_s1 + $0x30] ss:$8 sps:$4 sm:$0xff]   ;;  %v4742_v8 = vld [vmem:[%s8119_s1 + $0x44] ss:$8 sps:$4 sm:$0xff]  }
   0x4   :  { %259 = vmatprep.subr.bf16.mxu0 %v4733_v2  ;;  %v4744_v9 = vld [vmem:[%s8119_s1 + $0x40] ss:$8 sps:$4 sm:$0xff]   ;;  %v4745_v10 = vld [vmem:[%s8119_s1 + $0x54] ss:$8 sps:$4 sm:$0xff]   ;;  %v4747_v14 = vld [vmem:[%s8119_s1 + $0x50] ss:$8 sps:$4 sm:$0xff]  }
   0x5   :  { %v29_v11 = vld [vmem:[%s8118_s0 + $0x8] sm:$0xff]  ;;  %v31_v12 = vld [vmem:[%s8118_s0 + $0x18] sm:$0xff]  ;;  %v5085_v13 = vld [vmem:[%s8118_s0] sm:$0xff] }
   0x6   :  { %v61_v15 = vpack.c.bf16 %v31_v12, %v29_v11  ;;  %v2823_v16 = vrot.slane %v29_v11, 7  ;;  %v2825_v17 = vrot.slane %v31_v12, 7  ;;  %v5093_v18 = vld [vmem:[%s8118_s0 + $0x10] sm:$0xff]  ;;  %v2822_v19 = vrot.slane %v5085_v13, 7  ;;  %v5099_v20 = vld [vmem:[%s8118_s0 + $0x28] sm:$0xff]  ;;  %v5104_v21 = vld [vmem:[%s8118_s0 + $0x38] sm:$0xff] }
   0x7   :  { %260 = vmatpush1.bf16.msra.mxu0 %v4735_v3  ;;  %v5109_v22 = vld [vmem:[%s8119_s1 + $0x64] ss:$8 sps:$4 sm:$0xff]   ;;  %v2824_v23 = vrot.slane %v5093_v18, 7  ;;  %v2827_v24 = vrot.slane %v5099_v20, 7  ;;  %v5121_v26 = vld [vmem:[%s8118_s0 + $0x30] sm:$0xff]  ;;  %v2829_v28 = vrot.slane %v5104_v21, 7 }
   0x8   :  { %261 = vmatprep.subr.bf16.mxu0 %v4736_v4  ;;  %v5116_v25 = vld [vmem:[%s8118_s0 + $0x20] sm:$0xff]  ;;  %v5126_v27 = vld [vmem:[%s8118_s0 + $0x48] sm:$0xff]  ;;  %4147 = vmatprep.mubr.msk.bf16.mxu0 %vm232_vm0, %v61_v15  ;;  %2889 = vst.msk [vmem:[#allocation3 + $0x28] sm:$0xfe] %vm2888_vm1, %v2823_v16  ;;  %2894 = vst.msk [vmem:[#allocation3 + $0x48] sm:$0xfe] %vm2888_vm1, %v2825_v17 }
   0x9   :  { %2892 = vst.msk [vmem:[#allocation3 + $0x38] sm:$0x1] %vm2891_vm2, %v2823_v16  ;;  %2896 = vst.msk [vmem:[#allocation3 + $0x58] sm:$0x1] %vm2891_vm2, %v2825_v17  ;;  %v2826_v29 = vrot.slane %v5116_v25, 7  ;;  %v2828_v30 = vrot.slane %v5121_v26, 7 }
   0xa   :  { %2887 = vst [vmem:[#allocation3 + $0x20] sm:$0xfe] %v2822_v19  ;;  %2890 = vst [vmem:[#allocation3 + $0x30] sm:$0x1] %v2822_v19  ;;  %v5139_v31 = vld [vmem:[%s8118_s0 + $0x58] sm:$0xff]  ;;  %v5144_v32 = vld [vmem:[%s8118_s0 + $0x40] sm:$0xff] }
   0xb   :  { %262 = vmatpush1.bf16.msra.mxu0 %v4738_v5  ;;  %v5149_v33 = vld [vmem:[%s8118_s0 + $0x50] sm:$0xff]  ;;  %2893 = vst [vmem:[#allocation3 + $0x40] sm:$0xfe] %v2824_v23  ;;  %2895 = vst [vmem:[#allocation3 + $0x50] sm:$0x1] %v2824_v23  ;;  %v2831_v34 = vrot.slane %v5126_v27, 7 }
   0xc   :  { %263 = vmatprep.subr.bf16.mxu0 %v4739_v6  ;;  %2898 = vst.msk [vmem:[#allocation3 + $0x68] sm:$0xfe] %vm2888_vm1, %v2827_v24  ;;  %v2833_v35 = vrot.slane %v5139_v31, 7  ;;  %v5158_v36 = vld [vmem:[%s8118_s0 + $0x68] sm:$0xff]  ;;  %v5163_v37 = vld [vmem:[%s8118_s0 + $0x78] sm:$0xff]  ;;  %v5168_v38 = vld [vmem:[%s8118_s0 + $0x60] sm:$0xff] }
   0xd   :  { %2900 = vst.msk [vmem:[#allocation3 + $0x78] sm:$0x1] %vm2891_vm2, %v2827_v24  ;;  %v5173_v39 = vld [vmem:[%s8119_s1 + $0x60] ss:$8 sps:$4 sm:$0xff]   ;;  %2904 = vst.msk [vmem:[#allocation3 + $0x98] sm:$0x1] %vm2891_vm2, %v2829_v28 }
   0xe   :  { %2902 = vst.msk [vmem:[#allocation3 + $0x88] sm:$0xfe] %vm2888_vm1, %v2829_v28  ;;  %2897 = vst [vmem:[#allocation3 + $0x60] sm:$0xfe] %v2826_v29  ;;  %v2830_v40 = vrot.slane %v5144_v32, 7  ;;  %v2832_v41 = vrot.slane %v5149_v33, 7 }
   0xf   :  { %264 = vmatpush1.bf16.msra.mxu0 %v4741_v7  ;;  %2899 = vst [vmem:[#allocation3 + $0x70] sm:$0x1] %v2826_v29  ;;  %2901 = vst [vmem:[#allocation3 + $0x80] sm:$0xfe] %v2828_v30  ;;  %v2835_v42 = vrot.slane %v5158_v36, 7  ;;  %v5183_v43 = vld [vmem:[%s8118_s0 + $0x70] sm:$0xff] }
  0x10   :  { %265 = vmatprep.subr.bf16.mxu0 %v4742_v8  ;;  %2903 = vst [vmem:[#allocation3 + $0x90] sm:$0x1] %v2828_v30  ;;  %v5188_v44 = vld [vmem:[%s8118_s0 + $0x88] sm:$0xff]  ;;  %v5193_v45 = vld [vmem:[%s8118_s0 + $0x98] sm:$0xff]  ;;  %2906 = vst.msk [vmem:[#allocation3 + $0xa8] sm:$0xfe] %vm2888_vm1, %v2831_v34 }
  0x11   :  { %v5198_v46 = vld [vmem:[%s8119_s1 + $0x74] ss:$8 sps:$4 sm:$0xff]   ;;  %2908 = vst.msk [vmem:[#allocation3 + $0xb8] sm:$0x1] %vm2891_vm2, %v2831_v34  ;;  %2912 = vst.msk [vmem:[#allocation3 + $0xd8] sm:$0x1] %vm2891_vm2, %v2833_v35 }
  0x12   :  { %2910 = vst.msk [vmem:[#allocation3 + $0xc8] sm:$0xfe] %vm2888_vm1, %v2833_v35  ;;  %v2837_v47 = vrot.slane %v5163_v37, 7  ;;  %v2834_v48 = vrot.slane %v5168_v38, 7  ;;  %v2836_v49 = vrot.slane %v5183_v43, 7  ;;  %v5210_v50 = vld [vmem:[%s8118_s0 + $0x80] sm:$0xff] }
  0x13   :  { %266 = vmatpush1.bf16.msra.mxu0 %v4744_v9  ;;  %v5215_v51 = vld [vmem:[%s8118_s0 + $0x90] sm:$0xff]  ;;  %v5220_v52 = vld [vmem:[%s8118_s0 + $0xa8] sm:$0xff]  ;;  %2905 = vst [vmem:[#allocation3 + $0xa0] sm:$0xfe] %v2830_v40  ;;  %2907 = vst [vmem:[#allocation3 + $0xb0] sm:$0x1] %v2830_v40 }
  0x14   :  { %267 = vmatprep.subr.bf16.mxu0 %v4745_v10  ;;  %2909 = vst [vmem:[#allocation3 + $0xc0] sm:$0xfe] %v2832_v41  ;;  %2911 = vst [vmem:[#allocation3 + $0xd0] sm:$0x1] %v2832_v41  ;;  %v2839_v53 = vrot.slane %v5188_v44, 7  ;;  %v2841_v54 = vrot.slane %v5193_v45, 7  ;;  %v60_v41 = vpack.c.bf16 %v5093_v18, %v5085_v13  ;;  %v67_v13 = vpack.c.bf16 %v5163_v37, %v5158_v36 }
  0x15   :  { %2914 = vst.msk [vmem:[#allocation3 + $0xe8] sm:$0xfe] %vm2888_vm1, %v2835_v42  ;;  %v5229_v55 = vld [vmem:[%s8118_s0 + $0xb8] sm:$0xff]  ;;  %v5234_v56 = vld [vmem:[%s8118_s0 + $0xa0] sm:$0xff]  ;;  %v5239_v57 = vld [vmem:[%s8118_s0 + $0xb0] sm:$0xff]  ;;  %v2838_v58 = vrot.slane %v5210_v50, 7  ;;  %v66_v18 = vpack.c.bf16 %v5183_v43, %v5168_v38 }
  0x16   :  { %2916 = vst.msk [vmem:[#allocation3 + $0xf8] sm:$0x1] %vm2891_vm2, %v2835_v42  ;;  %2920 = vst.msk [vmem:[#allocation3 + $0x118] sm:$0x1] %vm2891_vm2, %v2837_v47  ;;  %v2840_v59 = vrot.slane %v5215_v51, 7  ;;  %v2843_v60 = vrot.slane %v5220_v52, 7  ;;  %v63_v42 = vpack.c.bf16 %v5104_v21, %v5099_v20  ;;  %v69_v20 = vpack.c.bf16 %v5193_v45, %v5188_v44 }
  0x17   :  { %268 = vmatpush1.bf16.msra.mxu0 %v4747_v14  ;;  %2918 = vst.msk [vmem:[#allocation3 + $0x108] sm:$0xfe] %vm2888_vm1, %v2837_v47  ;;  %2913 = vst [vmem:[#allocation3 + $0xe0] sm:$0xfe] %v2834_v48  ;;  %v5250_v61 = vld [vmem:[%s8118_s0 + $0xc8] sm:$0xff]  ;;  %v5255_v62 = vld [vmem:[%s8118_s0 + $0xd8] sm:$0xff]  ;;  %v65_v47 = vpack.c.bf16 %v5139_v31, %v5126_v27 }
  0x18   :  { %269 = vmatprep.subr.bf16.mxu0 %v5109_v22  ;;  %2915 = vst [vmem:[#allocation3 + $0xf0] sm:$0x1] %v2834_v48  ;;  %2917 = vst [vmem:[#allocation3 + $0x100] sm:$0xfe] %v2836_v49  ;;  %v5260_v63 = vld [vmem:[%s8118_s0 + $0xc0] sm:$0xff]  ;;  %v2845_v1 = vrot.slane %v5229_v55, 7  ;;  %v64_v48 = vpack.c.bf16 %v5149_v33, %v5144_v32 }
  0x19   :  { %2919 = vst [vmem:[#allocation3 + $0x110] sm:$0x1] %v2836_v49  ;;  %v4753_v0 = vld [vmem:[%s8119_s1 + $0x70] ss:$8 sps:$4 sm:$0xff]   ;;  %2922 = vst.msk [vmem:[#allocation3 + $0x168] sm:$0xfe] %vm2888_vm1, %v2839_v53 }
  0x1a   :  { %2924 = vst.msk [vmem:[#allocation3 + $0x178] sm:$0x1] %vm2891_vm2, %v2839_v53  ;;  %2928 = vst.msk [vmem:[#allocation3 + $0x198] sm:$0x1] %vm2891_vm2, %v2841_v54  ;;  %v2842_v2 = vrot.slane %v5234_v56, 7  ;;  %v2844_v3 = vrot.slane %v5239_v57, 7 }
  0x1b   :  { %2926 = vst.msk [vmem:[#allocation3 + $0x188] sm:$0xfe] %vm2888_vm1, %v2841_v54  ;;  %v5275_v4 = vld [vmem:[%s8118_s0 + $0xd0] sm:$0xff]  ;;  %v5280_v5 = vld [vmem:[%s8118_s0 + $0xe8] sm:$0xff]  ;;  %v5285_v6 = vld [vmem:[%s8118_s0 + $0xf8] sm:$0xff]  ;;  %v2847_v8 = vrot.slane %v5250_v61, 7  ;;  %270 = vmatpush1.bf16.msra.mxu0 %v5173_v39 }
  0x1c   :  { %v4754_v7 = vld [vmem:[%s8119_s1 + $0x84] ss:$8 sps:$4 sm:$0xff]   ;;  %2921 = vst [vmem:[#allocation3 + $0x160] sm:$0xfe] %v2838_v58  ;;  %2923 = vst [vmem:[#allocation3 + $0x170] sm:$0x1] %v2838_v58  ;;  %v72_v10 = vpack.c.bf16 %v5275_v4, %v5260_v63  ;;  %v75_v16 = vpack.c.bf16 %v5285_v6, %v5280_v5  ;;  %271 = vmatprep.subr.bf16.mxu0 %v5198_v46  ;;  %v62_v46 = vpack.c.bf16 %v5121_v26, %v5116_v25 }
  0x1d   :  { %2925 = vst [vmem:[#allocation3 + $0x180] sm:$0xfe] %v2840_v59  ;;  %2927 = vst [vmem:[#allocation3 + $0x190] sm:$0x1] %v2840_v59  ;;  %v2849_v9 = vrot.slane %v5255_v62, 7  ;;  %v5299_v11 = vld [vmem:[%s8118_s0 + $0xe0] sm:$0xff] }
  0x1e   :  { %2930 = vst.msk [vmem:[#allocation3 + $0x1a8] sm:$0xfe] %vm2888_vm1, %v2843_v60  ;;  %v5304_v12 = vld [vmem:[%s8118_s0 + $0xf0] sm:$0xff]  ;;  %2934 = vst.msk [vmem:[#allocation3 + $0x1c8] sm:$0xfe] %vm2888_vm1, %v2845_v1  ;;  %v2846_v14 = vrot.slane %v5260_v63, 7 }
  0x1f   :  { %2932 = vst.msk [vmem:[#allocation3 + $0x1b8] sm:$0x1] %vm2891_vm2, %v2843_v60  ;;  %2936 = vst.msk [vmem:[#allocation3 + $0x1d8] sm:$0x1] %vm2891_vm2, %v2845_v1  ;;  %v2848_v15 = vrot.slane %v5275_v4, 7  ;;  %v2851_v17 = vrot.slane %v5280_v5, 7  ;;  %v74_v22 = vpack.c.bf16 %v5304_v12, %v5299_v11  ;;  %272 = vmatpush1.bf16.msra.mxu0 %v4753_v0 }
  0x20   :  { %2929 = vst [vmem:[#allocation3 + $0x1a0] sm:$0xfe] %v2842_v2  ;;  %2931 = vst [vmem:[#allocation3 + $0x1b0] sm:$0x1] %v2842_v2  ;;  %v2853_v19 = vrot.slane %v5285_v6, 7  ;;  %v2850_v23 = vrot.slane %v5299_v11, 7  ;;  %273 = vmatprep.subr.bf16.mxu0 %v4754_v7 }
  0x21   :  { %2933 = vst [vmem:[#allocation3 + $0x1c0] sm:$0xfe] %v2844_v3  ;;  %2935 = vst [vmem:[#allocation3 + $0x1d0] sm:$0x1] %v2844_v3  ;;  %v2852_v24 = vrot.slane %v5304_v12, 7 }
  0x22   :  { %2938 = vst.msk [vmem:[#allocation3 + $0x1e8] sm:$0xfe] %vm2888_vm1, %v2847_v8  ;;  %2942 = vst.msk [vmem:[#allocation3 + $0x208] sm:$0xfe] %vm2888_vm1, %v2849_v9  ;;  %v4756_v28 = vld [vmem:[%s8119_s1 + $0x80] ss:$8 sps:$4 sm:$0xff]  }
  0x23   :  { %2940 = vst.msk [vmem:[#allocation3 + $0x1f8] sm:$0x1] %vm2891_vm2, %v2847_v8  ;;  %2944 = vst.msk [vmem:[#allocation3 + $0x218] sm:$0x1] %vm2891_vm2, %v2849_v9  ;;  %v4757_v29 = vld [vmem:[%s8119_s1 + $0x94] ss:$8 sps:$4 sm:$0xff]   ;;  %274 = vmatpush1.bf16.msra.mxu0 %v4756_v28 }
  0x24   :  { %2937 = vst [vmem:[#allocation3 + $0x1e0] sm:$0xfe] %v2846_v14  ;;  %2939 = vst [vmem:[#allocation3 + $0x1f0] sm:$0x1] %v2846_v14  ;;  %v4759_v30 = vld [vmem:[%s8119_s1 + $0x90] ss:$8 sps:$4 sm:$0xff]   ;;  %275 = vmatprep.subr.bf16.mxu0 %v4757_v29 }
  0x25   :  { %2941 = vst [vmem:[#allocation3 + $0x200] sm:$0xfe] %v2848_v15  ;;  %2943 = vst [vmem:[#allocation3 + $0x210] sm:$0x1] %v2848_v15  ;;  %v4760_v34 = vld [vmem:[%s8119_s1 + $0xa4] ss:$8 sps:$4 sm:$0xff]  }
  0x26   :  { %2946 = vst.msk [vmem:[#allocation3 + $0x228] sm:$0xfe] %vm2888_vm1, %v2851_v17  ;;  %2950 = vst.msk [vmem:[#allocation3 + $0x248] sm:$0xfe] %vm2888_vm1, %v2853_v19  ;;  %v4762_v35 = vld [vmem:[%s8119_s1 + $0xa0] ss:$8 sps:$4 sm:$0xff]  }
  0x27   :  { %2948 = vst.msk [vmem:[#allocation3 + $0x238] sm:$0x1] %vm2891_vm2, %v2851_v17  ;;  %2952 = vst.msk [vmem:[#allocation3 + $0x258] sm:$0x1] %vm2891_vm2, %v2853_v19  ;;  %v4763_v39 = vld [vmem:[%s8119_s1 + $0xb4] ss:$8 sps:$4 sm:$0xff]   ;;  %276 = vmatpush1.bf16.msra.mxu0 %v4759_v30 }
  0x28   :  { %2945 = vst [vmem:[#allocation3 + $0x220] sm:$0xfe] %v2850_v23  ;;  %2947 = vst [vmem:[#allocation3 + $0x230] sm:$0x1] %v2850_v23  ;;  %277 = vmatprep.subr.bf16.mxu0 %v4760_v34  ;;  %v4765_v40 = vld [vmem:[%s8119_s1 + $0xb0] ss:$8 sps:$4 sm:$0xff]  }
  0x29   :  { %2949 = vst [vmem:[#allocation3 + $0x240] sm:$0xfe] %v2852_v24  ;;  %2951 = vst [vmem:[#allocation3 + $0x250] sm:$0x1] %v2852_v24 }
  0x2b   :  { %278 = vmatpush1.bf16.msra.mxu0 %v4762_v35 }
  0x2c   :  { %279 = vmatprep.subr.bf16.mxu0 %v4763_v39 }
  0x2f   :  { %280 = vmatpush1.bf16.msra.mxu0 %v4765_v40 }
  0x32   :  { %290 = vmatmul.mubr.bf16.vlgmr.msra.gmra.mrb[0].mxu0 %v60_v41 }
  0x33   :  { %4148 = vmatprep.mubr.msk.bf16.mxu0 %vm232_vm0, %v63_v42 }
  0x3a   :  { %300 = vmatmul.mubr.bf16.gmra.mrb[4].mxu0 %v62_v46 }
  0x3b   :  { %4149 = vmatprep.mubr.msk.bf16.mxu0 %vm232_vm0, %v65_v47 }
  0x42   :  { %310 = vmatmul.mubr.bf16.gmra.mrb[8].mxu0 %v64_v48 }
  0x43   :  { %4150 = vmatprep.mubr.msk.bf16.mxu0 %vm232_vm0, %v67_v13 }
  0x4a   :  { %320 = vmatmul.mubr.bf16.gmra.mrb[12].mxu0 %v66_v18 }
  0x4b   :  { %4151 = vmatprep.mubr.msk.bf16.mxu0 %vm232_vm0, %v69_v20 }
  0x4c   :  { %12 = vsyncpa [#allocation5], 0  ;;  %v68_v21 = vpack.c.bf16 %v5215_v51, %v5210_v50  ;;  %v71_v25 = vpack.c.bf16 %v5229_v55, %v5220_v52  ;;  %v70_v26 = vpack.c.bf16 %v5239_v57, %v5234_v56  ;;  %v73_v27 = vpack.c.bf16 %v5255_v62, %v5250_v61  ;;  %v100_v36 = vld [vmem:[%s8120_s2] sm:$0x3]  ;;  %s4992_s2 = smov 64   ;;  %s4993_s24 = smov 80  }
  0x4d   :  { %v8144_v31 = vlaneseq  ;;  %vm402_vm3 = vcmask 916480   ;;  %vm404_vm4 = vcmask 910336   ;;  %vm413_vm5 = vcmask 909312   ;;  %s4994_s29 = smov 96   ;;  %s4996_s8 = smov 48  }
  0x4e   :  { %v4991_v38 = vmov 0.0   ;;  %s4998_s9 = smov 32   ;;  %vm2652_vm7 = vcmask 517120   ;;  %s5000_s10 = smov 16   ;;  %vm3113_vm8 = vcmask 1046528   ;;  %vm1225_vm9 = vcmask 654336  }
  0x4f   :  { %v5387_v32 = vshrl.u32 %v8144_v31, 7  ;;  %403 = vst.msk [vmem:[#allocation2] sm:$0xff] %vm402_vm3, %v4991_v38  ;;  %406 = vst.msk [vmem:[#allocation2 + $0xa0] sm:$0xff] %vm402_vm3, %v4991_v38  ;;  %vm3314_vm10 = vcmask 1045504   ;;  %vm1258_vm11 = vcmask 392192   ;;  %vm1208_vm12 = vcmask 785408  }
  0x50   :  { %409 = vst.msk [vmem:[#allocation2 + $0x90] sm:$0xff] %vm402_vm3, %v4991_v38  ;;  %411 = vst.msk [vmem:[#allocation2 + $0x130] sm:$0xff] %vm402_vm3, %v4991_v38  ;;  %vm1275_vm13 = vcmask 261120   ;;  %vm1292_vm14 = vcmask 130048  }
  0x51   :  { %8225 = vst [vmem:[#allocation7_spill] sm:$0xff] %v5387_v32  ;;  %v8143_v33 = vsub.s32 0, %v5387_v32  ;;  %v8142_v37 = vsub.s32 1, %v5387_v32  ;;  %405 = vst.msk [vmem:[#allocation2 + $0x8] sm:$0x3] %vm404_vm4, %v4991_v38 }
  0x52   :  { %330 = vmatmul.mubr.bf16.gmra.mrb[16].mxu0 %v68_v21  ;;  %407 = vst.msk [vmem:[#allocation2 + $0xa8] sm:$0x3] %vm404_vm4, %v4991_v38  ;;  %410 = vst.msk [vmem:[#allocation2 + $0x98] sm:$0x3] %vm404_vm4, %v4991_v38 }
  0x53   :  { %4152 = vmatprep.mubr.msk.bf16.mxu0 %vm232_vm0, %v71_v25  ;;  %412 = vst.msk [vmem:[#allocation2 + $0x138] sm:$0x3] %vm404_vm4, %v4991_v38  ;;  %v5400_v43 = vrot.slane %v100_v36, %v8143_v33  ;;  %v5444_v44 = vrot.slane %v100_v36, %v8142_v37 }
  0x54   :  { %415 = vst.msk [vmem:[#allocation2 + $0x10] sm:$0x1] %vm413_vm5, %v4991_v38  ;;  %416 = vst.msk [vmem:[#allocation2 + $0x20] sm:$0x1] %vm413_vm5, %v4991_v38 }
  0x55   :  { %417 = vst.msk [vmem:[#allocation2 + $0x30] sm:$0x1] %vm413_vm5, %v4991_v38  ;;  %418 = vst.msk [vmem:[#allocation2 + $0x40] sm:$0x1] %vm413_vm5, %v4991_v38 }
  0x56   :  { %419 = vst.msk [vmem:[#allocation2 + $0x50] sm:$0x1] %vm413_vm5, %v4991_v38  ;;  %420 = vst.msk [vmem:[#allocation2 + $0x60] sm:$0x1] %vm413_vm5, %v4991_v38 }
  0x57   :  { %421 = vst.msk [vmem:[#allocation2 + $0x70] sm:$0x1] %vm413_vm5, %v4991_v38  ;;  %422 = vst.msk [vmem:[#allocation2 + $0x80] sm:$0x1] %vm413_vm5, %v4991_v38 }
  0x58   :  { %425 = vst.msk [vmem:[#allocation2 + $0xb0] sm:$0x1] %vm413_vm5, %v4991_v38  ;;  %426 = vst.msk [vmem:[#allocation2 + $0xc0] sm:$0x1] %vm413_vm5, %v4991_v38 }
  0x59   :  { %427 = vst.msk [vmem:[#allocation2 + $0xd0] sm:$0x1] %vm413_vm5, %v4991_v38  ;;  %428 = vst.msk [vmem:[#allocation2 + $0xe0] sm:$0x1] %vm413_vm5, %v4991_v38 }
  0x5a   :  { %340 = vmatmul.mubr.bf16.gmra.mrb[20].mxu0 %v70_v26  ;;  %429 = vst.msk [vmem:[#allocation2 + $0xf0] sm:$0x1] %vm413_vm5, %v4991_v38  ;;  %430 = vst.msk [vmem:[#allocation2 + $0x100] sm:$0x1] %vm413_vm5, %v4991_v38 }
  0x5b   :  { %4153 = vmatprep.mubr.msk.bf16.mxu0 %vm232_vm0, %v73_v27  ;;  %431 = vst.msk [vmem:[#allocation2 + $0x110] sm:$0x1] %vm413_vm5, %v4991_v38  ;;  %432 = vst.msk [vmem:[#allocation2 + $0x120] sm:$0x1] %vm413_vm5, %v4991_v38 }
  0x5c   :  { %435 = vst.msk [vmem:[#allocation2 + $0x19] sm:$0x1] %vm413_vm5, %v4991_v38  ;;  %436 = vst.msk [vmem:[#allocation2 + $0x29] sm:$0x1] %vm413_vm5, %v4991_v38 }
  0x5d   :  { %437 = vst.msk [vmem:[#allocation2 + $0x39] sm:$0x1] %vm413_vm5, %v4991_v38  ;;  %438 = vst.msk [vmem:[#allocation2 + $0x49] sm:$0x1] %vm413_vm5, %v4991_v38 }
  0x5e   :  { %439 = vst.msk [vmem:[#allocation2 + $0x59] sm:$0x1] %vm413_vm5, %v4991_v38  ;;  %440 = vst.msk [vmem:[#allocation2 + $0x69] sm:$0x1] %vm413_vm5, %v4991_v38 }
  0x5f   :  { %441 = vst.msk [vmem:[#allocation2 + $0x79] sm:$0x1] %vm413_vm5, %v4991_v38  ;;  %442 = vst.msk [vmem:[#allocation2 + $0x89] sm:$0x1] %vm413_vm5, %v4991_v38 }
  0x60   :  { %445 = vst.msk [vmem:[#allocation2 + $0xb9] sm:$0x1] %vm413_vm5, %v4991_v38  ;;  %446 = vst.msk [vmem:[#allocation2 + $0xc9] sm:$0x1] %vm413_vm5, %v4991_v38 }
  0x61   :  { %447 = vst.msk [vmem:[#allocation2 + $0xd9] sm:$0x1] %vm413_vm5, %v4991_v38  ;;  %448 = vst.msk [vmem:[#allocation2 + $0xe9] sm:$0x1] %vm413_vm5, %v4991_v38 }
  0x62   :  { %350 = vmatmul.mubr.bf16.gmra.mrb[24].mxu0 %v72_v10  ;;  %449 = vst.msk [vmem:[#allocation2 + $0xf9] sm:$0x1] %vm413_vm5, %v4991_v38  ;;  %450 = vst.msk [vmem:[#allocation2 + $0x109] sm:$0x1] %vm413_vm5, %v4991_v38 }
  0x63   :  { %4154 = vmatprep.mubr.msk.bf16.mxu0 %vm232_vm0, %v75_v16  ;;  %451 = vst.msk [vmem:[#allocation2 + $0x119] sm:$0x1] %vm413_vm5, %v4991_v38  ;;  %452 = vst.msk [vmem:[#allocation2 + $0x129] sm:$0x1] %vm413_vm5, %v4991_v38 }
  0x64   :  { %414 = vst.msk [vmem:[#allocation2] sm:$0x1] %vm413_vm5, %v4991_v38  ;;  %423 = vst.msk [vmem:[#allocation2 + $0x90] sm:$0x1] %vm413_vm5, %v4991_v38 }
  0x65   :  { %424 = vst.msk [vmem:[#allocation2 + $0xa0] sm:$0x1] %vm413_vm5, %v4991_v38  ;;  %433 = vst.msk [vmem:[#allocation2 + $0x130] sm:$0x1] %vm413_vm5, %v4991_v38 }
  0x66   :  { %434 = vst.msk [vmem:[#allocation2 + $0x9] sm:$0x1] %vm413_vm5, %v4991_v38  ;;  %443 = vst.msk [vmem:[#allocation2 + $0x99] sm:$0x1] %vm413_vm5, %v4991_v38 }
  0x67   :  { %444 = vst.msk [vmem:[#allocation2 + $0xa9] sm:$0x1] %vm413_vm5, %v4991_v38  ;;  %453 = vst.msk [vmem:[#allocation2 + $0x139] sm:$0x1] %vm413_vm5, %v4991_v38 }
  0x6a   :  { %360 = vmatmul.mubr.bf16.gmra.mrb[28].mxu0 %v74_v22 }
 0x105   :  { %v291_v45 = vpop.f32.mrb[0].mxu0 }
 0x106   :  { %v5447_v49 = vadd.f32 %v291_v45, %v5400_v43  ;;  %v293_v50 = vpop.f32.mrb[1].mxu0 }
 0x107   :  { %v295_v51 = vpop.f32.mrb[2].mxu0  ;;  %v294_v53 = vadd.f32 %v293_v50, %v5444_v44 }
 0x108   :  { %8226 = vst [vmem:[#allocation8_spill] sm:$0xff] %v5447_v49  ;;  %v8141_v52 = vmax.f32 %v5447_v49, 0.0  ;;  %v5452_v54 = vadd.f32 %v295_v51, %v5400_v43  ;;  %v297_v55 = vpop.f32.mrb[3].mxu0 }
 0x109   :  { %v298_v57 = vadd.f32 %v297_v55, %v5444_v44  ;;  %v371_v58 = vmax.f32 %v294_v53, 0.0 }
 0x10a   :  { %8227 = vst [vmem:[#allocation9_spill] sm:$0xff] %v5452_v54  ;;  %v8140_v56 = vmax.f32 %v5452_v54, 0.0  ;;  %486 = vrot.lane.b32.xlu0 %v8141_v52, %s4992_s2 }
 0x10b   :  { %v373_v60 = vmax.f32 %v298_v57, 0.0 }
 0x10c   :  { %490 = vrot.lane.b32.xlu1 %v8140_v56, %s4992_s2 }
 0x10d   :  { %v301_v59 = vpop.f32.mrb[4].mxu0 }
 0x10e   :  { %v5463_v61 = vadd.f32 %v301_v59, %v5400_v43  ;;  %v303_v62 = vpop.f32.mrb[5].mxu0  ;;  %488 = vrot.lane.b32.xlu0 %v371_v58, %s4992_s2 }
 0x10f   :  { %v304_v63 = vadd.f32 %v303_v62, %v5444_v44  ;;  %v305_v0 = vpop.f32.mrb[6].mxu0 }
 0x110   :  { %8228 = vst [vmem:[#allocation10_spill] sm:$0xff] %v5463_v61  ;;  %v8139_v1 = vmax.f32 %v5463_v61, 0.0  ;;  %v5469_v2 = vadd.f32 %v305_v0, %v5400_v43  ;;  %v307_v3 = vpop.f32.mrb[7].mxu0  ;;  %492 = vrot.lane.b32.xlu1 %v373_v60, %s4992_s2 }
 0x111   :  { %v375_v4 = vmax.f32 %v304_v63, 0.0  ;;  %v308_v5 = vadd.f32 %v307_v3, %v5444_v44 }
 0x112   :  { %8229 = vst [vmem:[#allocation11_spill] sm:$0xff] %v5469_v2  ;;  %494 = vrot.lane.b32.xlu0 %v8139_v1, %s4992_s2  ;;  %v8138_v6 = vmax.f32 %v5469_v2, 0.0 }
 0x113   :  { %v377_v8 = vmax.f32 %v308_v5, 0.0 }
 0x114   :  { %496 = vrot.lane.b32.xlu1 %v375_v4, %s4992_s2 }
 0x115   :  { %v311_v7 = vpop.f32.mrb[8].mxu0 }
 0x116   :  { %v5479_v9 = vadd.f32 %v311_v7, %v5400_v43  ;;  %v313_v10 = vpop.f32.mrb[9].mxu0  ;;  %498 = vrot.lane.b32.xlu0 %v8138_v6, %s4992_s2 }
 0x117   :  { %v314_v11 = vadd.f32 %v313_v10, %v5444_v44  ;;  %v315_v12 = vpop.f32.mrb[10].mxu0 }
 0x118   :  { %8230 = vst [vmem:[#allocation12_spill] sm:$0xff] %v5479_v9  ;;  %v8137_v14 = vmax.f32 %v5479_v9, 0.0  ;;  %v5487_v15 = vadd.f32 %v315_v12, %v5400_v43  ;;  %v317_v16 = vpop.f32.mrb[11].mxu0  ;;  %500 = vrot.lane.b32.xlu1 %v377_v8, %s4992_s2 }
 0x119   :  { %v379_v17 = vmax.f32 %v314_v11, 0.0  ;;  %v318_v19 = vadd.f32 %v317_v16, %v5444_v44 }
 0x11a   :  { %8231 = vst [vmem:[#allocation13_spill] sm:$0xff] %v5487_v15  ;;  %502 = vrot.lane.b32.xlu0 %v8137_v14, %s4992_s2  ;;  %v8136_v22 = vmax.f32 %v5487_v15, 0.0  ;;  %v4889_v14 = vld [vmem:[%s8121_s3 + $0xd0] ss:$8 sps:$4 sm:$0xff]  }
 0x11b   :  { %v381_v24 = vmax.f32 %v318_v19, 0.0 }
 0x11c   :  { %504 = vrot.lane.b32.xlu1 %v379_v17, %s4992_s2 }
 0x11d   :  { %v321_v23 = vpop.f32.mrb[12].mxu0 }
 0x11e   :  { %v5497_v28 = vadd.f32 %v321_v23, %v5400_v43  ;;  %v323_v29 = vpop.f32.mrb[13].mxu0  ;;  %506 = vrot.lane.b32.xlu0 %v8136_v22, %s4992_s2 }
 0x11f   :  { %v324_v30 = vadd.f32 %v323_v29, %v5444_v44  ;;  %v325_v34 = vpop.f32.mrb[14].mxu0 }
 0x120   :  { %8232 = vst [vmem:[#allocation14_spill] sm:$0xff] %v5497_v28  ;;  %v8135_v35 = vmax.f32 %v5497_v28, 0.0  ;;  %v5505_v39 = vadd.f32 %v325_v34, %v5400_v43  ;;  %v327_v40 = vpop.f32.mrb[15].mxu0  ;;  %508 = vrot.lane.b32.xlu1 %v381_v24, %s4992_s2 }
 0x121   :  { %v383_v41 = vmax.f32 %v324_v30, 0.0  ;;  %v328_v42 = vadd.f32 %v327_v40, %v5444_v44 }
 0x122   :  { %8233 = vst [vmem:[#allocation15_spill] sm:$0xff] %v5505_v39  ;;  %510 = vrot.lane.b32.xlu0 %v8135_v35, %s4992_s2  ;;  %v8134_v46 = vmax.f32 %v5505_v39, 0.0 }
 0x123   :  { %v385_v48 = vmax.f32 %v328_v42, 0.0 }
 0x124   :  { %512 = vrot.lane.b32.xlu1 %v383_v41, %s4992_s2 }
 0x125   :  { %v331_v47 = vpop.f32.mrb[16].mxu0 }
 0x126   :  { %v5515_v13 = vadd.f32 %v331_v47, %v5400_v43  ;;  %v333_v18 = vpop.f32.mrb[17].mxu0  ;;  %514 = vrot.lane.b32.xlu0 %v8134_v46, %s4992_s2  ;;  %v4879_v46 = vld [vmem:[%s8121_s3 + $0xb4] ss:$8 sps:$4 sm:$0xff]  }
 0x127   :  { %v334_v20 = vadd.f32 %v333_v18, %v5444_v44  ;;  %v335_v21 = vpop.f32.mrb[18].mxu0 }
 0x128   :  { %8234 = vst [vmem:[#allocation16_spill] sm:$0xff] %v5515_v13  ;;  %v8133_v25 = vmax.f32 %v5515_v13, 0.0  ;;  %v5523_v26 = vadd.f32 %v335_v21, %v5400_v43  ;;  %v337_v27 = vpop.f32.mrb[19].mxu0  ;;  %516 = vrot.lane.b32.xlu1 %v385_v48, %s4992_s2 }
 0x129   :  { %v387_v36 = vmax.f32 %v334_v20, 0.0  ;;  %v338_v38 = vadd.f32 %v337_v27, %v5444_v44 }
 0x12a   :  { %8235 = vst [vmem:[#allocation17_spill] sm:$0xff] %v5523_v26  ;;  %518 = vrot.lane.b32.xlu0 %v8133_v25, %s4992_s2  ;;  %v8132_v45 = vmax.f32 %v5523_v26, 0.0  ;;  %v4877_v25 = vld [vmem:[%s8121_s3 + $0xb0] ss:$8 sps:$4 sm:$0xff]  }
 0x12b   :  { %v389_v51 = vmax.f32 %v338_v38, 0.0  ;;  %v4769_v38 = vld [vmem:[%s8121_s3 + $0x114] ss:$8 sps:$4 sm:$0xff]  }
 0x12c   :  { %520 = vrot.lane.b32.xlu1 %v387_v36, %s4992_s2 }
 0x12d   :  { %v341_v50 = vpop.f32.mrb[20].mxu0 }
 0x12e   :  { %v5533_v53 = vadd.f32 %v341_v50, %v5400_v43  ;;  %v343_v55 = vpop.f32.mrb[21].mxu0  ;;  %522 = vrot.lane.b32.xlu0 %v8132_v45, %s4992_s2  ;;  %v4771_v50 = vld [vmem:[%s8121_s3 + $0x110] ss:$8 sps:$4 sm:$0xff]   ;;  %v639_v45 = vld [vmem:[#allocation2 + $0xa2] sm:$0xff] }
 0x12f   :  { %v344_v57 = vadd.f32 %v343_v55, %v5444_v44  ;;  %v345_v58 = vpop.f32.mrb[22].mxu0  ;;  %v4774_v55 = vld [vmem:[%s8121_s3 + $0x120] ss:$8 sps:$4 sm:$0xff]  }
 0x130   :  { %8236 = vst [vmem:[#allocation18_spill] sm:$0xff] %v5533_v53  ;;  %v8131_v59 = vmax.f32 %v5533_v53, 0.0  ;;  %v5541_v60 = vadd.f32 %v345_v58, %v5400_v43  ;;  %v347_v62 = vpop.f32.mrb[23].mxu0  ;;  %524 = vrot.lane.b32.xlu1 %v389_v51, %s4992_s2  ;;  %v4772_v51 = vld [vmem:[%s8121_s3 + $0x124] ss:$8 sps:$4 sm:$0xff]  }
 0x131   :  { %v391_v63 = vmax.f32 %v344_v57, 0.0  ;;  %v348_v0 = vadd.f32 %v347_v62, %v5444_v44  ;;  %v4775_v57 = vld [vmem:[%s8121_s3 + $0x134] ss:$8 sps:$4 sm:$0xff]   ;;  %v4777_v58 = vld [vmem:[%s8121_s3 + $0x130] ss:$8 sps:$4 sm:$0xff]  }
 0x132   :  { %8237 = vst [vmem:[#allocation19_spill] sm:$0xff] %v5541_v60  ;;  %526 = vrot.lane.b32.xlu0 %v8131_v59, %s4992_s2  ;;  %v8130_v3 = vmax.f32 %v5541_v60, 0.0  ;;  %v4778_v62 = vld [vmem:[%s8121_s3 + $0x144] ss:$8 sps:$4 sm:$0xff]  }
 0x133   :  { %v393_v5 = vmax.f32 %v348_v0, 0.0  ;;  %v4781_v0 = vld [vmem:[%s8121_s3 + $0x154] ss:$8 sps:$4 sm:$0xff]  }
 0x134   :  { %528 = vrot.lane.b32.xlu1 %v391_v63, %s4992_s2  ;;  %v4780_v63 = vld [vmem:[%s8121_s3 + $0x140] ss:$8 sps:$4 sm:$0xff]  }
 0x135   :  { %v351_v4 = vpop.f32.mrb[24].mxu0 }
 0x136   :  { %v5551_v7 = vadd.f32 %v351_v4, %v5400_v43  ;;  %v353_v8 = vpop.f32.mrb[25].mxu0  ;;  %530 = vrot.lane.b32.xlu0 %v8130_v3, %s4992_s2  ;;  %v4783_v4 = vld [vmem:[%s8121_s3 + $0x150] ss:$8 sps:$4 sm:$0xff]  }
 0x137   :  { %v354_v10 = vadd.f32 %v353_v8, %v5444_v44  ;;  %v355_v11 = vpop.f32.mrb[26].mxu0  ;;  %v4786_v8 = vld [vmem:[%s8121_s3 + $0x160] ss:$8 sps:$4 sm:$0xff]  }
 0x138   :  { %8238 = vst [vmem:[#allocation20_spill] sm:$0xff] %v5551_v7  ;;  %v8129_v12 = vmax.f32 %v5551_v7, 0.0  ;;  %v5559_v16 = vadd.f32 %v355_v11, %v5400_v43  ;;  %v357_v17 = vpop.f32.mrb[27].mxu0  ;;  %532 = vrot.lane.b32.xlu1 %v393_v5, %s4992_s2  ;;  %v4784_v5 = vld [vmem:[%s8121_s3 + $0x164] ss:$8 sps:$4 sm:$0xff]   ;;  %v8151_v7 = vmov 0  }
 0x139   :  { %v395_v19 = vmax.f32 %v354_v10, 0.0  ;;  %v358_v23 = vadd.f32 %v357_v17, %v5444_v44  ;;  %v4787_v10 = vld [vmem:[%s8121_s3 + $0x174] ss:$8 sps:$4 sm:$0xff]   ;;  %v4789_v11 = vld [vmem:[%s8121_s3 + $0x170] ss:$8 sps:$4 sm:$0xff]  }
 0x13a   :  { %8239 = vst [vmem:[#allocation21_spill] sm:$0xff] %v5559_v16  ;;  %534 = vrot.lane.b32.xlu0 %v8129_v12, %s4992_s2  ;;  %v8128_v24 = vmax.f32 %v5559_v16, 0.0  ;;  %v4790_v17 = vld [vmem:[%s8121_s3 + $0x184] ss:$8 sps:$4 sm:$0xff]  }
 0x13b   :  { %v397_v30 = vmax.f32 %v358_v23, 0.0  ;;  %v4793_v23 = vld [vmem:[%s8121_s3 + $0x194] ss:$8 sps:$4 sm:$0xff]   ;;  %v615_v16 = vld [vmem:[#allocation2 + $0x1] sm:$0xff] }
 0x13c   :  { %536 = vrot.lane.b32.xlu1 %v395_v19, %s4992_s2  ;;  %v4792_v19 = vld [vmem:[%s8121_s3 + $0x180] ss:$8 sps:$4 sm:$0xff]  }
 0x13d   :  { %v361_v29 = vpop.f32.mrb[28].mxu0 }
 0x13e   :  { %v5569_v34 = vadd.f32 %v361_v29, %v5400_v43  ;;  %v363_v40 = vpop.f32.mrb[29].mxu0  ;;  %538 = vrot.lane.b32.xlu0 %v8128_v24, %s4992_s2  ;;  %v4795_v29 = vld [vmem:[%s8121_s3 + $0x190] ss:$8 sps:$4 sm:$0xff]  }
 0x13f   :  { %v364_v41 = vadd.f32 %v363_v40, %v5444_v44  ;;  %v365_v42 = vpop.f32.mrb[30].mxu0  ;;  %v4798_v40 = vld [vmem:[%s8121_s3 + $0x1a0] ss:$8 sps:$4 sm:$0xff]   ;;  %v4865_v24 = vld [vmem:[%s8121_s3 + $0x90] ss:$8 sps:$4 sm:$0xff]  }
 0x140   :  { %8240 = vst [vmem:[#allocation22_spill] sm:$0xff] %v5569_v34  ;;  %v8127_v47 = vmax.f32 %v5569_v34, 0.0  ;;  %v5577_v48 = vadd.f32 %v365_v42, %v5400_v43  ;;  %v367_v18 = vpop.f32.mrb[31].mxu0  ;;  %540 = vrot.lane.b32.xlu1 %v397_v30, %s4992_s2  ;;  %v4766_v43 = vld [vmem:[%s8121_s3 + $0x104] ss:$8 sps:$4 sm:$0xff]  }
 0x141   :  { %v399_v20 = vmax.f32 %v364_v41, 0.0  ;;  %v368_v21 = vadd.f32 %v367_v18, %v5444_v44  ;;  %2278 = vmatprep.subr.bf16.mxu1 %v4766_v43  ;;  %v4768_v44 = vld [vmem:[%s8121_s3 + $0x100] ss:$8 sps:$4 sm:$0xff]   ;;  %v4796_v30 = vld [vmem:[%s8121_s3 + $0x1a4] ss:$8 sps:$4 sm:$0xff]  }
 0x142   :  { %8241 = vst [vmem:[#allocation23_spill] sm:$0xff] %v5577_v48  ;;  %542 = vrot.lane.b32.xlu0 %v8127_v47, %s4992_s2  ;;  %v8126_v27 = vmax.f32 %v5577_v48, 0.0  ;;  %2279 = vmatpush1.bf16.msra.mxu1 %v4768_v44  ;;  %v4799_v41 = vld [vmem:[%s8121_s3 + $0x1b4] ss:$8 sps:$4 sm:$0xff]   ;;  %v4801_v42 = vld [vmem:[%s8121_s3 + $0x1b0] ss:$8 sps:$4 sm:$0xff]  }
 0x143   :  { %v401_v36 = vmax.f32 %v368_v21, 0.0  ;;  %2280 = vmatprep.subr.bf16.mxu1 %v4769_v38  ;;  %v4802_v18 = vld [vmem:[%s8121_s3 + $0x1c4] ss:$8 sps:$4 sm:$0xff]   ;;  %v4805_v21 = vld [vmem:[%s8121_s3 + $0x1d4] ss:$8 sps:$4 sm:$0xff]  }
 0x144   :  { %544 = vrot.lane.b32.xlu1 %v399_v20, %s4992_s2  ;;  %v4804_v20 = vld [vmem:[%s8121_s3 + $0x1c0] ss:$8 sps:$4 sm:$0xff]   ;;  %v4807_v43 = vld [vmem:[%s8121_s3 + $0x1d0] ss:$8 sps:$4 sm:$0xff]  }
 0x146   :  { %546 = vrot.lane.b32.xlu0 %v8126_v27, %s4992_s2  ;;  %2281 = vmatpush1.bf16.msra.mxu1 %v4771_v50  ;;  %v4808_v50 = vld [vmem:[%s8121_s3 + $0x1e4] ss:$8 sps:$4 sm:$0xff]  }
 0x147   :  { %2282 = vmatprep.subr.bf16.mxu1 %v4772_v51 }
 0x148   :  { %548 = vrot.lane.b32.xlu1 %v401_v36, %s4992_s2 }
 0x14a   :  { %2283 = vmatpush1.bf16.msra.mxu1 %v4774_v55 }
 0x14b   :  { %2284 = vmatprep.subr.bf16.mxu1 %v4775_v57  ;;  %v4810_v57 = vld [vmem:[%s8121_s3 + $0x1e0] ss:$8 sps:$4 sm:$0xff]  }
 0x14e   :  { %2285 = vmatpush1.bf16.msra.mxu1 %v4777_v58 }
 0x14f   :  { %2286 = vmatprep.subr.bf16.mxu1 %v4778_v62 }
 0x152   :  { %2287 = vmatpush1.bf16.msra.mxu1 %v4780_v63  ;;  %v4811_v63 = vld [vmem:[%s8121_s3] ss:$8 sps:$4 sm:$0xff]  }
 0x153   :  { %2288 = vmatprep.subr.bf16.mxu1 %v4781_v0  ;;  %v4813_v0 = vld [vmem:[%s8121_s3 + $0x4] ss:$8 sps:$4 sm:$0xff]  }
 0x154   :  { %2165 = vmatprep.subr.bf16.mxu0 %v4813_v0  ;;  %v4829_v0 = vld [vmem:[%s8121_s3 + $0x30] ss:$8 sps:$4 sm:$0xff]  }
 0x155   :  { %2166 = vmatpush1.bf16.msra.mxu0 %v4811_v63 }
 0x156   :  { %2289 = vmatpush1.bf16.msra.mxu1 %v4783_v4  ;;  %v4814_v4 = vld [vmem:[%s8121_s3 + $0x1f4] ss:$8 sps:$4 sm:$0xff]  }
 0x157   :  { %2290 = vmatprep.subr.bf16.mxu1 %v4784_v5 }
 0x15a   :  { %2291 = vmatpush1.bf16.msra.mxu1 %v4786_v8  ;;  %v4816_v8 = vld [vmem:[%s8121_s3 + $0x1f0] ss:$8 sps:$4 sm:$0xff]  }
 0x15b   :  { %2292 = vmatprep.subr.bf16.mxu1 %v4787_v10 }
 0x15e   :  { %2293 = vmatpush1.bf16.msra.mxu1 %v4789_v11 }
 0x15f   :  { %2294 = vmatprep.subr.bf16.mxu1 %v4790_v17 }
 0x162   :  { %2295 = vmatpush1.bf16.msra.mxu1 %v4792_v19 }
 0x163   :  { %2296 = vmatprep.subr.bf16.mxu1 %v4793_v23  ;;  %v4817_v23 = vld [vmem:[%s8121_s3 + $0x10] ss:$8 sps:$4 sm:$0xff]  }
 0x166   :  { %2297 = vmatpush1.bf16.msra.mxu1 %v4795_v29  ;;  %v4819_v29 = vld [vmem:[%s8121_s3 + $0x14] ss:$8 sps:$4 sm:$0xff]  }
 0x167   :  { %2298 = vmatprep.subr.bf16.mxu1 %v4796_v30  ;;  %2167 = vmatprep.subr.bf16.mxu0 %v4819_v29 }
 0x168   :  { %2168 = vmatpush1.bf16.msra.mxu0 %v4817_v23 }
 0x16a   :  { %2299 = vmatpush1.bf16.msra.mxu1 %v4798_v40 }
 0x16b   :  { %2300 = vmatprep.subr.bf16.mxu1 %v4799_v41 }
 0x16e   :  { %2301 = vmatpush1.bf16.msra.mxu1 %v4801_v42 }
 0x16f   :  { %2302 = vmatprep.subr.bf16.mxu1 %v4802_v18 }
 0x172   :  { %2303 = vmatpush1.bf16.msra.mxu1 %v4804_v20 }
 0x173   :  { %2304 = vmatprep.subr.bf16.mxu1 %v4805_v21 }
 0x176   :  { %2305 = vmatpush1.bf16.msra.mxu1 %v4807_v43  ;;  %v4822_v43 = vld [vmem:[%s8121_s3 + $0x204] ss:$8 sps:$4 sm:$0xff]  }
 0x177   :  { %2306 = vmatprep.subr.bf16.mxu1 %v4808_v50  ;;  %v4825_v50 = vld [vmem:[%s8121_s3 + $0x24] ss:$8 sps:$4 sm:$0xff]  }
 0x178   :  { %2169 = vmatprep.subr.bf16.mxu0 %v4825_v50  ;;  %v4841_v50 = vld [vmem:[%s8121_s3 + $0x50] ss:$8 sps:$4 sm:$0xff]  }
 0x17a   :  { %2307 = vmatpush1.bf16.msra.mxu1 %v4810_v57 }
 0x17b   :  { %2308 = vmatprep.subr.bf16.mxu1 %v4814_v4  ;;  %v4831_v4 = vld [vmem:[%s8121_s3 + $0x34] ss:$8 sps:$4 sm:$0xff]  }
 0x17c   :  { %v487_v36 = vpop.permute.xlu0 %486 }
 0x17e   :  { %v491_v44 = vpop.permute.xlu1 %490  ;;  %2309 = vmatpush1.bf16.msra.mxu1 %v4816_v8 }
 0x17f   :  { %2391 = vmatprep.subr.bf16.mxu1 %v4822_v43 }
 0x180   :  { %v489_v38 = vpop.permute.xlu0 %488 }
 0x181   :  { %v550_v51 = vsel %vm232_vm0, %v487_v36, %v489_v38  ;;  %v631_v36 = vld [vmem:[#allocation2 + $0x2] sm:$0xff] }
 0x182   :  { %583 = vst.msk [vmem:[#allocation2 + $0x11] sm:$0xff] %vm402_vm3, %v550_v51  ;;  %v493_v55 = vpop.permute.xlu1 %492  ;;  %v4823_v38 = vld [vmem:[%s8121_s3 + $0x20] ss:$8 sps:$4 sm:$0xff]  }
 0x183   :  { %v551_v58 = vsel %vm232_vm0, %v491_v44, %v493_v55  ;;  %2170 = vmatpush1.bf16.msra.mxu0 %v4823_v38 }
 0x184   :  { %584 = vst.msk [vmem:[#allocation2 + $0x21] sm:$0xff] %vm402_vm3, %v551_v58  ;;  %v495_v62 = vpop.permute.xlu0 %494  ;;  %2171 = vmatprep.subr.bf16.mxu0 %v4831_v4 }
 0x186   :  { %v497_v5 = vpop.permute.xlu1 %496 }
 0x187   :  { %v552_v10 = vsel %vm232_vm0, %v495_v62, %v497_v5  ;;  %2172 = vmatpush1.bf16.msra.mxu0 %v4829_v0 }
 0x188   :  { %585 = vst.msk [vmem:[#allocation2 + $0x31] sm:$0xff] %vm402_vm3, %v552_v10  ;;  %v499_v11 = vpop.permute.xlu0 %498 }
 0x189   :  { %v5698_v19 = vld [vmem:[#allocation2 + $0x11] sm:$0xff] }
 0x18a   :  { %v501_v17 = vpop.permute.xlu1 %500  ;;  %v647_v41 = vld [vmem:[#allocation2 + $0x10] sm:$0xff] }
 0x18b   :  { %v553_v30 = vsel %vm232_vm0, %v499_v11, %v501_v17  ;;  %v664_v40 = vld [vmem:[#allocation2 + $0x21] sm:$0xff]  ;;  %v5715_v44 = vld [vmem:[#allocation2 + $0x12] sm:$0xff] }
 0x18c   :  { %v5707_v42 = vld [vmem:[#allocation2 + $0x20] sm:$0xff]  ;;  %586 = vst.msk [vmem:[#allocation2 + $0x41] sm:$0xff] %vm402_vm3, %v553_v30  ;;  %v503_v18 = vpop.permute.xlu0 %502  ;;  %v4455_v20 = vpack.i.bf16 %v664_v40, %v5698_v19  ;;  %v4460_v62 = vpack.i.bf16 %v5715_v44, %v631_v36 }
 0x18d   :  { %v4450_v21 = vpack.i.bf16 %v5707_v42, %v647_v41  ;;  %v4835_v41 = vld [vmem:[%s8121_s3 + $0x40] ss:$8 sps:$4 sm:$0xff]  }
 0x18e   :  { %v505_v51 = vpop.permute.xlu1 %504  ;;  %4456 = vrot.lane.b32.xlu1 %v4455_v20, %s4992_s2  ;;  %v5759_v36 = vld [vmem:[#allocation2 + $0x22] sm:$0xff] }
 0x18f   :  { %4451 = vrot.lane.b32.xlu0 %v4450_v21, %s4993_s24  ;;  %v554_v55 = vsel %vm232_vm0, %v503_v18, %v505_v51  ;;  %v665_v57 = vld [vmem:[#allocation2 + $0x31] sm:$0xff]  ;;  %v4837_v18 = vld [vmem:[%s8121_s3 + $0x44] ss:$8 sps:$4 sm:$0xff]   ;;  %v4570_v48 = vpack.i.bf16 %v5759_v36, %v5715_v44 }
 0x190   :  { %587 = vst.msk [vmem:[#allocation2 + $0x51] sm:$0xff] %vm402_vm3, %v554_v55  ;;  %v507_v58 = vpop.permute.xlu0 %506  ;;  %v5728_v63 = vpack.i.bf16 %v665_v57, %v664_v40  ;;  %v5740_v11 = vld [vmem:[#allocation2 + $0x30] sm:$0xff]  ;;  %2173 = vmatprep.subr.bf16.mxu0 %v4837_v18 }
 0x191   :  { %v5748_v40 = vld [vmem:[#allocation2 + $0x32] sm:$0xff]  ;;  %2174 = vmatpush1.bf16.msra.mxu0 %v4835_v41  ;;  %v4849_v41 = vld [vmem:[%s8121_s3 + $0x64] ss:$8 sps:$4 sm:$0xff]  }
 0x192   :  { %v509_v5 = vpop.permute.xlu1 %508  ;;  %v4475_v38 = vpack.i.bf16 %v5748_v40, %v5759_v36  ;;  %v4843_v51 = vld [vmem:[%s8121_s3 + $0x54] ss:$8 sps:$4 sm:$0xff]  }
 0x193   :  { %4461 = vrot.lane.b32.xlu0 %v4460_v62, %s4994_s29  ;;  %v555_v8 = vsel %vm232_vm0, %v507_v58, %v509_v5  ;;  %v5738_v10 = vld [vmem:[#allocation2 + $0x41] sm:$0xff]  ;;  %2175 = vmatprep.subr.bf16.mxu0 %v4843_v51  ;;  %v4855_v51 = vld [vmem:[%s8121_s3 + $0x74] ss:$8 sps:$4 sm:$0xff]  }
 0x194   :  { %v5742_v17 = vld [vmem:[#allocation2 + $0x40] sm:$0xff]  ;;  %588 = vst.msk [vmem:[#allocation2 + $0x61] sm:$0xff] %vm402_vm3, %v555_v8  ;;  %v511_v23 = vpop.permute.xlu0 %510  ;;  %v4470_v29 = vpack.i.bf16 %v5738_v10, %v665_v57 }
 0x195   :  { %v4465_v30 = vpack.i.bf16 %v5742_v17, %v5740_v11  ;;  %2176 = vmatpush1.bf16.msra.mxu0 %v4841_v50  ;;  %v4853_v50 = vld [vmem:[%s8121_s3 + $0x70] ss:$8 sps:$4 sm:$0xff]  }
 0x196   :  { %v513_v20 = vpop.permute.xlu1 %512  ;;  %2177 = vmatprep.subr.bf16.mxu0 %v4849_v41 }
 0x197   :  { %4471 = vrot.lane.b32.xlu0 %v4470_v29, %s4992_s2  ;;  %4466 = vrot.lane.b32.xlu1 %v4465_v30, %s4993_s24  ;;  %v556_v21 = vsel %vm232_vm0, %v511_v23, %v513_v20  ;;  %v5771_v57 = vld [vmem:[#allocation2 + $0x51] sm:$0xff]  ;;  %v4847_v30 = vld [vmem:[%s8121_s3 + $0x60] ss:$8 sps:$4 sm:$0xff]  }
 0x198   :  { %589 = vst.msk [vmem:[#allocation2 + $0x71] sm:$0xff] %vm402_vm3, %v556_v21  ;;  %v515_v43 = vpop.permute.xlu0 %514  ;;  %v5776_v0 = vld [vmem:[#allocation2 + $0x50] sm:$0xff]  ;;  %v5796_v21 = vld [vmem:[#allocation2 + $0x42] sm:$0xff] }
 0x199   :  { %v5785_v29 = vld [vmem:[#allocation2 + $0x52] sm:$0xff]  ;;  %2178 = vmatpush1.bf16.msra.mxu0 %v4847_v30  ;;  %v4590_v44 = vpack.i.bf16 %v5776_v0, %v5742_v17  ;;  %v4585_v36 = vpack.i.bf16 %v5796_v21, %v5748_v40  ;;  %v623_v40 = vld [vmem:[#allocation2 + $0xa1] sm:$0xff] }
 0x19a   :  { %v517_v55 = vpop.permute.xlu1 %516  ;;  %2179 = vmatprep.subr.bf16.mxu0 %v4855_v51  ;;  %v4861_v51 = vld [vmem:[%s8121_s3 + $0x84] ss:$8 sps:$4 sm:$0xff]  }
 0x19b   :  { %4476 = vrot.lane.b32.xlu1 %v4475_v38, %s4994_s29  ;;  %v557_v58 = vsel %vm232_vm0, %v515_v43, %v517_v55  ;;  %v5774_v62 = vld [vmem:[#allocation2 + $0x61] sm:$0xff]  ;;  %v4490_v38 = vpack.i.bf16 %v5785_v29, %v5796_v21  ;;  %v711_v21 = vld [vmem:[#allocation2 + $0x130] sm:$0xff] }
 0x19c   :  { %v5778_v4 = vld [vmem:[#allocation2 + $0x60] sm:$0xff]  ;;  %590 = vst.msk [vmem:[#allocation2 + $0x81] sm:$0xff] %vm402_vm3, %v557_v58  ;;  %v519_v5 = vpop.permute.xlu0 %518  ;;  %v4485_v8 = vpack.i.bf16 %v5774_v62, %v5771_v57 }
 0x19d   :  { %v4480_v23 = vpack.i.bf16 %v5778_v4, %v5776_v0  ;;  %2180 = vmatpush1.bf16.msra.mxu0 %v4853_v50  ;;  %v5833_v27 = vld [vmem:[#allocation2 + $0x62] sm:$0xff] }
 0x19e   :  { %v521_v18 = vpop.permute.xlu1 %520  ;;  %2181 = vmatprep.subr.bf16.mxu0 %v4861_v51 }
 0x19f   :  { %4486 = vrot.lane.b32.xlu1 %v4485_v8, %s4992_s2  ;;  %4481 = vrot.lane.b32.xlu0 %v4480_v23, %s4993_s24  ;;  %v558_v20 = vsel %vm232_vm0, %v519_v5, %v521_v18  ;;  %v5808_v58 = vld [vmem:[#allocation2 + $0x71] sm:$0xff] }
 0x1a0   :  { %591 = vst.msk [vmem:[#allocation2 + $0xb1] sm:$0xff] %vm402_vm3, %v558_v20  ;;  %v523_v43 = vpop.permute.xlu0 %522  ;;  %v5813_v23 = vld [vmem:[#allocation2 + $0x70] sm:$0xff]  ;;  %v6003_v17 = vpack.i.bf16 %v5808_v58, %v5774_v62 }
 0x1a2   :  { %v525_v55 = vpop.permute.xlu1 %524 }
 0x1a3   :  { %4491 = vrot.lane.b32.xlu0 %v4490_v38, %s4994_s29  ;;  %v559_v5 = vsel %vm232_vm0, %v523_v43, %v525_v55  ;;  %v5811_v8 = vld [vmem:[#allocation2 + $0x81] sm:$0xff]  ;;  %v5822_v38 = vld [vmem:[#allocation2 + $0x72] sm:$0xff] }
 0x1a4   :  { %v5815_v30 = vld [vmem:[#allocation2 + $0x80] sm:$0xff]  ;;  %592 = vst.msk [vmem:[#allocation2 + $0xc1] sm:$0xff] %vm402_vm3, %v559_v5  ;;  %v527_v41 = vpop.permute.xlu0 %526  ;;  %v4500_v18 = vpack.i.bf16 %v5811_v8, %v5808_v58  ;;  %v4505_v47 = vpack.i.bf16 %v5822_v38, %v5833_v27 }
 0x1a5   :  { %v4495_v20 = vpack.i.bf16 %v5815_v30, %v5813_v23  ;;  %v4859_v43 = vld [vmem:[%s8121_s3 + $0x80] ss:$8 sps:$4 sm:$0xff]  }
 0x1a6   :  { %v529_v55 = vpop.permute.xlu1 %528  ;;  %2182 = vmatpush1.bf16.msra.mxu0 %v4859_v43 }
 0x1a7   :  { %4501 = vrot.lane.b32.xlu0 %v4500_v18, %s4992_s2  ;;  %4496 = vrot.lane.b32.xlu1 %v4495_v20, %s4993_s24  ;;  %v560_v5 = vsel %vm232_vm0, %v527_v41, %v529_v55  ;;  %v4867_v18 = vld [vmem:[%s8121_s3 + $0x94] ss:$8 sps:$4 sm:$0xff]  }
 0x1a8   :  { %593 = vst.msk [vmem:[#allocation2 + $0xd1] sm:$0xff] %vm402_vm3, %v560_v5  ;;  %v531_v50 = vpop.permute.xlu0 %530  ;;  %v5845_v41 = vld [vmem:[#allocation2 + $0xb1] sm:$0xff]  ;;  %2183 = vmatprep.subr.bf16.mxu0 %v4867_v18  ;;  %v4873_v18 = vld [vmem:[%s8121_s3 + $0xa4] ss:$8 sps:$4 sm:$0xff]  }
 0x1a9   :  { %v655_v5 = vld [vmem:[#allocation2 + $0xb0] sm:$0xff] }
 0x1aa   :  { %v533_v20 = vpop.permute.xlu1 %532  ;;  %2184 = vmatpush1.bf16.msra.mxu0 %v4865_v24 }
 0x1ab   :  { %4506 = vrot.lane.b32.xlu1 %v4505_v47, %s4994_s29  ;;  %v561_v51 = vsel %vm232_vm0, %v531_v50, %v533_v20  ;;  %v5848_v55 = vld [vmem:[#allocation2 + $0xc1] sm:$0xff]  ;;  %v5856_v47 = vld [vmem:[#allocation2 + $0xb2] sm:$0xff]  ;;  %2185 = vmatprep.subr.bf16.mxu0 %v4873_v18 }
 0x1ac   :  { %v5850_v12 = vld [vmem:[#allocation2 + $0xc0] sm:$0xff]  ;;  %594 = vst.msk [vmem:[#allocation2 + $0xe1] sm:$0xff] %vm402_vm3, %v561_v51  ;;  %v535_v43 = vpop.permute.xlu0 %534  ;;  %v4515_v3 = vpack.i.bf16 %v5848_v55, %v5845_v41  ;;  %v4520_v24 = vpack.i.bf16 %v5856_v47, %v639_v45 }
 0x1ad   :  { %v4510_v59 = vpack.i.bf16 %v5850_v12, %v655_v5  ;;  %v4871_v50 = vld [vmem:[%s8121_s3 + $0xa0] ss:$8 sps:$4 sm:$0xff]  }
 0x1ae   :  { %v537_v20 = vpop.permute.xlu1 %536  ;;  %2186 = vmatpush1.bf16.msra.mxu0 %v4871_v50  ;;  %v5901_v22 = vld [vmem:[#allocation2 + $0xc2] sm:$0xff] }
 0x1af   :  { %4516 = vrot.lane.b32.xlu1 %v4515_v3, %s4992_s2  ;;  %4511 = vrot.lane.b32.xlu0 %v4510_v59, %s4993_s24  ;;  %v562_v51 = vsel %vm232_vm0, %v535_v43, %v537_v20  ;;  %v5876_v59 = vld [vmem:[#allocation2 + $0xd1] sm:$0xff] }
 0x1b0   :  { %595 = vst.msk [vmem:[#allocation2 + $0xf1] sm:$0xff] %vm402_vm3, %v562_v51  ;;  %v539_v5 = vpop.permute.xlu0 %538  ;;  %v5881_v20 = vld [vmem:[#allocation2 + $0xd0] sm:$0xff]  ;;  %2187 = vmatprep.subr.bf16.mxu0 %v4879_v46  ;;  %v4885_v46 = vld [vmem:[%s8121_s3 + $0xc4] ss:$8 sps:$4 sm:$0xff]  }
 0x1b1   :  { %v5890_v35 = vld [vmem:[#allocation2 + $0xd2] sm:$0xff]  ;;  %v4635_v0 = vpack.i.bf16 %v5881_v20, %v5850_v12 }
 0x1b2   :  { %v541_v3 = vpop.permute.xlu1 %540  ;;  %2188 = vmatpush1.bf16.msra.mxu0 %v4877_v25  ;;  %v4535_v25 = vpack.i.bf16 %v5890_v35, %v5901_v22 }
 0x1b3   :  { %4521 = vrot.lane.b32.xlu0 %v4520_v24, %s4994_s29  ;;  %v563_v43 = vsel %vm232_vm0, %v539_v5, %v541_v3  ;;  %v5879_v18 = vld [vmem:[#allocation2 + $0xe1] sm:$0xff]  ;;  %2189 = vmatprep.subr.bf16.mxu0 %v4885_v46 }
 0x1b4   :  { %v5883_v45 = vld [vmem:[#allocation2 + $0xe0] sm:$0xff]  ;;  %596 = vst.msk [vmem:[#allocation2 + $0x101] sm:$0xff] %vm402_vm3, %v563_v43  ;;  %v543_v50 = vpop.permute.xlu0 %542  ;;  %v4530_v51 = vpack.i.bf16 %v5879_v18, %v5876_v59 }
 0x1b5   :  { %v4525_v24 = vpack.i.bf16 %v5883_v45, %v5881_v20  ;;  %v4883_v5 = vld [vmem:[%s8121_s3 + $0xc0] ss:$8 sps:$4 sm:$0xff]  }
 0x1b6   :  { %v545_v3 = vpop.permute.xlu1 %544  ;;  %2190 = vmatpush1.bf16.msra.mxu0 %v4883_v5 }
 0x1b7   :  { %4531 = vrot.lane.b32.xlu0 %v4530_v51, %s4992_s2  ;;  %4526 = vrot.lane.b32.xlu1 %v4525_v24, %s4993_s24  ;;  %v564_v43 = vsel %vm232_vm0, %v543_v50, %v545_v3  ;;  %v4891_v51 = vld [vmem:[%s8121_s3 + $0xd4] ss:$8 sps:$4 sm:$0xff]  }
 0x1b8   :  { %597 = vst.msk [vmem:[#allocation2 + $0x111] sm:$0xff] %vm402_vm3, %v564_v43  ;;  %v547_v24 = vpop.permute.xlu0 %546  ;;  %v5913_v50 = vld [vmem:[#allocation2 + $0xf1] sm:$0xff]  ;;  %2191 = vmatprep.subr.bf16.mxu0 %v4891_v51  ;;  %v5934_v51 = vld [vmem:[#allocation2 + $0xe2] sm:$0xff] }
 0x1b9   :  { %v5918_v43 = vld [vmem:[#allocation2 + $0xf0] sm:$0xff]  ;;  %v4645_v62 = vpack.i.bf16 %v5934_v51, %v5890_v35  ;;  %v6029_v12 = vpack.i.bf16 %v5913_v50, %v5879_v18 }
 0x1ba   :  { %v549_v6 = vpop.permute.xlu1 %548  ;;  %2192 = vmatpush1.bf16.msra.mxu0 %v4889_v14 }
 0x1bb   :  { %4536 = vrot.lane.b32.xlu1 %v4535_v25, %s4994_s29  ;;  %v565_v46 = vsel %vm232_vm0, %v547_v24, %v549_v6  ;;  %v5916_v3 = vld [vmem:[#allocation2 + $0x101] sm:$0xff]  ;;  %v5927_v25 = vld [vmem:[#allocation2 + $0xf2] sm:$0xff] }
 0x1bc   :  { %v5920_v5 = vld [vmem:[#allocation2 + $0x100] sm:$0xff]  ;;  %598 = vst.msk [vmem:[#allocation2 + $0x121] sm:$0xff] %vm402_vm3, %v565_v46  ;;  %v4545_v1 = vpack.i.bf16 %v5916_v3, %v5913_v50  ;;  %v4550_v24 = vpack.i.bf16 %v5927_v25, %v5934_v51 }
 0x1bd   :  { %v4540_v56 = vpack.i.bf16 %v5920_v5, %v5918_v43  ;;  %v4897_v6 = vld [vmem:[%s8121_s3 + $0xe4] ss:$8 sps:$4 sm:$0xff]   ;;  %v4895_v46 = vld [vmem:[%s8121_s3 + $0xe0] ss:$8 sps:$4 sm:$0xff]  }
 0x1be   :  { %2193 = vmatprep.subr.bf16.mxu0 %v4897_v6  ;;  %v4901_v6 = vld [vmem:[%s8121_s3 + $0xf0] ss:$8 sps:$4 sm:$0xff]   ;;  %v645_v31 = vld [vmem:[#allocation2 + $0x102] sm:$0xff] }
 0x1bf   :  { %4546 = vrot.lane.b32.xlu1 %v4545_v1, %s4992_s2  ;;  %4541 = vrot.lane.b32.xlu0 %v4540_v56, %s4993_s24  ;;  %v5942_v14 = vld [vmem:[#allocation2 + $0x111] sm:$0xff] }
 0x1c0   :  { %2194 = vmatpush1.bf16.msra.mxu0 %v4895_v46  ;;  %v5946_v1 = vld [vmem:[#allocation2 + $0x110] sm:$0xff] }
 0x1c1   :  { %v5960_v46 = vld [vmem:[#allocation2 + $0x112] sm:$0xff]  ;;  %v4665_v35 = vpack.i.bf16 %v5946_v1, %v5920_v5 }
 0x1c2   :  { %v4565_v34 = vpack.i.bf16 %v5960_v46, %v645_v31 }
 0x1c3   :  { %4551 = vrot.lane.b32.xlu0 %v4550_v24, %s4994_s29  ;;  %v5944_v56 = vld [vmem:[#allocation2 + $0x121] sm:$0xff]  ;;  %v4903_v24 = vld [vmem:[%s8121_s3 + $0xf4] ss:$8 sps:$4 sm:$0xff]  }
 0x1c4   :  { %v5948_v52 = vld [vmem:[#allocation2 + $0x120] sm:$0xff]  ;;  %v4560_v37 = vpack.i.bf16 %v5944_v56, %v5942_v14  ;;  %2195 = vmatprep.subr.bf16.mxu0 %v4903_v24 }
 0x1c5   :  { %v4555_v33 = vpack.i.bf16 %v5948_v52, %v5946_v1  ;;  %2196 = vmatpush1.bf16.msra.mxu0 %v4901_v6  ;;  %v694_v58 = vld [vmem:[#allocation2 + $0x122] sm:$0xff]  ;;  %v727_v1 = vld [vmem:[#allocation2 + $0x131] sm:$0xff] }
 0x1c6   :  { %3722 = vmatprep.subr.bf16.mxu0 %v8151_v7 }
 0x1c7   :  { %4561 = vrot.lane.b32.xlu0 %v4560_v37, %s4992_s2  ;;  %4556 = vrot.lane.b32.xlu1 %v4555_v33, %s4993_s24  ;;  %v4580_v37 = vpack.i.bf16 %v5698_v19, %v615_v16  ;;  %v4575_v33 = vpack.i.bf16 %v5740_v11, %v5707_v42  ;;  %s4997_s24 = smov 112   ;;  %v4600_v16 = vpack.i.bf16 %v5833_v27, %v5785_v29  ;;  %v703_v19 = vld [vmem:[#allocation2 + $0x90] sm:$0xff]  ;;  %v686_v42 = vld [vmem:[#allocation2 + $0x82] sm:$0xff] }
 0x1c8   :  { %v4620_v27 = vpack.i.bf16 %v703_v19, %v5815_v30  ;;  %v4615_v11 = vpack.i.bf16 %v686_v42, %v5822_v38  ;;  %v6022_v29 = vpack.i.bf16 %v5876_v59, %v5848_v55  ;;  %v4680_v30 = vpack.i.bf16 %v711_v21, %v5948_v52  ;;  %v719_v55 = vld [vmem:[#allocation2 + $0x91] sm:$0xff] }
 0x1c9   :  { %v4675_v38 = vpack.i.bf16 %v694_v58, %v5960_v46  ;;  %v4685_v52 = vpack.i.bf16 %v5942_v14, %v5916_v3  ;;  %v4705_v50 = vpack.i.bf16 %v719_v55, %v5811_v8  ;;  %v4828_v21 = vld [vmem:[%s8121_s3 + $0x214] ss:$8 sps:$4 sm:$0xff]   ;;  %v6216_v55 = vld [vmem:[#allocation2 + $0x22] sm:$0xff] }
 0x1cb   :  { %4571 = vrot.lane.b32.xlu0 %v4570_v48, %s4996_s8  ;;  %4566 = vrot.lane.b32.xlu1 %v4565_v34, %s4994_s29  ;;  %v5988_v34 = vpack.i.bf16 %v5771_v57, %v5738_v10  ;;  %v4605_v48 = vpack.i.bf16 %v5813_v23, %v5778_v4  ;;  %v4630_v10 = vpack.i.bf16 %v5901_v22, %v5856_v47 }
 0x1cc   :  { %v4640_v57 = vpack.i.bf16 %v5845_v41, %v623_v40  ;;  %v4650_v22 = vpack.i.bf16 %v5918_v43, %v5883_v45  ;;  %v4660_v4 = vpack.i.bf16 %v645_v31, %v5927_v25  ;;  %v8242_v31 = vlaneseq }
 0x1cd   :  { %v4999_v41 = vmov -inf  }
 0x1ce   :  { %vm6037_vm6 = vcmp.lt.s32.totalorder %v8242_v31, 192  ;;  %2649 = vst [vmem:[#allocation3] sm:$0xff] %v4999_v41  ;;  %2650 = vst.msk [vmem:[#allocation3 + $0x8] sm:$0xff] %vm232_vm0, %v4999_v41 }
 0x1cf   :  { %4581 = vrot.lane.b32.xlu0 %v4580_v37, %s4997_s24  ;;  %4576 = vrot.lane.b32.xlu1 %v4575_v33, %s4998_s9  ;;  %2651 = vst [vmem:[#allocation3 + $0x10] sm:$0x3] %v4999_v41  ;;  %2653 = vst.msk [vmem:[#allocation3 + $0x18] sm:$0x3] %vm2652_vm7, %v4999_v41 }
 0x1d0   :  { %2674 = vst.msk [vmem:[#allocation3 + $0x20] ss:$8 sm:$0x3] %vm6037_vm6, %v4999_v41  ;;  %2677 = vst.msk [vmem:[#allocation3 + $0x40] ss:$8 sm:$0x3] %vm6037_vm6, %v4999_v41 }
 0x1d1   :  { %2680 = vst.msk [vmem:[#allocation3 + $0x60] ss:$8 sm:$0x3] %vm6037_vm6, %v4999_v41  ;;  %2734 = vst.msk [vmem:[#allocation3 + $0x31] ss:$8 sm:$0x3] %vm6037_vm6, %v4999_v41 }
 0x1d2   :  { %2737 = vst.msk [vmem:[#allocation3 + $0x51] ss:$8 sm:$0x3] %vm6037_vm6, %v4999_v41  ;;  %2740 = vst.msk [vmem:[#allocation3 + $0x71] ss:$8 sm:$0x3] %vm6037_vm6, %v4999_v41 }
 0x1d3   :  { %4591 = vrot.lane.b32.xlu0 %v4590_v44, %s4998_s9  ;;  %4586 = vrot.lane.b32.xlu1 %v4585_v36, %s4996_s8  ;;  %2654 = vst [vmem:[#allocation3 + $0x140] sm:$0xff] %v4999_v41  ;;  %2655 = vst.msk [vmem:[#allocation3 + $0x148] sm:$0xff] %vm232_vm0, %v4999_v41 }
 0x1d4   :  { %2656 = vst [vmem:[#allocation3 + $0x150] sm:$0x3] %v4999_v41  ;;  %2657 = vst.msk [vmem:[#allocation3 + $0x158] sm:$0x3] %vm2652_vm7, %v4999_v41 }
 0x1d5   :  { %2659 = vst [vmem:[#allocation3 + $0x120] sm:$0xff] %v4999_v41  ;;  %2660 = vst.msk [vmem:[#allocation3 + $0x128] sm:$0xff] %vm232_vm0, %v4999_v41 }
 0x1d6   :  { %2661 = vst [vmem:[#allocation3 + $0x130] sm:$0x3] %v4999_v41  ;;  %2662 = vst.msk [vmem:[#allocation3 + $0x138] sm:$0x3] %vm2652_vm7, %v4999_v41 }
 0x1d7   :  { %4601 = vrot.lane.b32.xlu0 %v4600_v16, %s4996_s8  ;;  %4596 = vrot.lane.b32.xlu1 %v5728_v63, %s4997_s24  ;;  %2663 = vst [vmem:[#allocation3 + $0x260] sm:$0xff] %v4999_v41  ;;  %2664 = vst.msk [vmem:[#allocation3 + $0x268] sm:$0xff] %vm232_vm0, %v4999_v41  ;;  %v6146_v18 = vld [vmem:[#allocation3 + $0x28] sm:$0xff] }
 0x1d8   :  { %2665 = vst [vmem:[#allocation3 + $0x270] sm:$0x3] %v4999_v41  ;;  %2666 = vst.msk [vmem:[#allocation3 + $0x278] sm:$0x3] %vm2652_vm7, %v4999_v41  ;;  %v6148_v20 = vld [vmem:[#allocation3 + $0x38] sm:$0x3] }
 0x1d9   :  { %2683 = vst.msk [vmem:[#allocation3 + $0x80] ss:$8 sm:$0x3] %vm6037_vm6, %v4999_v41  ;;  %2686 = vst.msk [vmem:[#allocation3 + $0xa0] ss:$8 sm:$0x3] %vm6037_vm6, %v4999_v41 }
 0x1da   :  { %2689 = vst.msk [vmem:[#allocation3 + $0xc0] ss:$8 sm:$0x3] %vm6037_vm6, %v4999_v41  ;;  %2692 = vst.msk [vmem:[#allocation3 + $0xe0] ss:$8 sm:$0x3] %vm6037_vm6, %v4999_v41 }
 0x1db   :  { %4611 = vrot.lane.b32.xlu0 %v5988_v34, %s4997_s24  ;;  %4606 = vrot.lane.b32.xlu1 %v4605_v48, %s4998_s9  ;;  %2695 = vst.msk [vmem:[#allocation3 + $0x100] ss:$8 sm:$0x3] %vm6037_vm6, %v4999_v41  ;;  %2704 = vst.msk [vmem:[#allocation3 + $0x160] ss:$8 sm:$0x3] %vm6037_vm6, %v4999_v41  ;;  %v4725_v48 = vpack.i.bf16 %v727_v1, %v5944_v56 }
 0x1dc   :  { %2707 = vst.msk [vmem:[#allocation3 + $0x180] ss:$8 sm:$0x3] %vm6037_vm6, %v4999_v41  ;;  %2710 = vst.msk [vmem:[#allocation3 + $0x1a0] ss:$8 sm:$0x3] %vm6037_vm6, %v4999_v41 }
 0x1dd   :  { %2713 = vst.msk [vmem:[#allocation3 + $0x1c0] ss:$8 sm:$0x3] %vm6037_vm6, %v4999_v41  ;;  %2716 = vst.msk [vmem:[#allocation3 + $0x1e0] ss:$8 sm:$0x3] %vm6037_vm6, %v4999_v41 }
 0x1de   :  { %2719 = vst.msk [vmem:[#allocation3 + $0x200] ss:$8 sm:$0x3] %vm6037_vm6, %v4999_v41  ;;  %2722 = vst.msk [vmem:[#allocation3 + $0x220] ss:$8 sm:$0x3] %vm6037_vm6, %v4999_v41 }
 0x1df   :  { %4621 = vrot.lane.b32.xlu0 %v4620_v27, %s4998_s9  ;;  %4616 = vrot.lane.b32.xlu1 %v4615_v11, %s4996_s8  ;;  %2725 = vst.msk [vmem:[#allocation3 + $0x240] ss:$8 sm:$0x3] %vm6037_vm6, %v4999_v41  ;;  %2743 = vst.msk [vmem:[#allocation3 + $0x91] ss:$8 sm:$0x3] %vm6037_vm6, %v4999_v41 }
 0x1e0   :  { %2746 = vst.msk [vmem:[#allocation3 + $0xb1] ss:$8 sm:$0x3] %vm6037_vm6, %v4999_v41  ;;  %2749 = vst.msk [vmem:[#allocation3 + $0xd1] ss:$8 sm:$0x3] %vm6037_vm6, %v4999_v41 }
 0x1e1   :  { %2752 = vst.msk [vmem:[#allocation3 + $0xf1] ss:$8 sm:$0x3] %vm6037_vm6, %v4999_v41  ;;  %2755 = vst.msk [vmem:[#allocation3 + $0x111] ss:$8 sm:$0x3] %vm6037_vm6, %v4999_v41 }
 0x1e2   :  { %2764 = vst.msk [vmem:[#allocation3 + $0x171] ss:$8 sm:$0x3] %vm6037_vm6, %v4999_v41  ;;  %2767 = vst.msk [vmem:[#allocation3 + $0x191] ss:$8 sm:$0x3] %vm6037_vm6, %v4999_v41 }
 0x1e3   :  { %4631 = vrot.lane.b32.xlu0 %v4630_v10, %s4996_s8  ;;  %4626 = vrot.lane.b32.xlu1 %v6003_v17, %s4997_s24  ;;  %2770 = vst.msk [vmem:[#allocation3 + $0x1b1] ss:$8 sm:$0x3] %vm6037_vm6, %v4999_v41  ;;  %2773 = vst.msk [vmem:[#allocation3 + $0x1d1] ss:$8 sm:$0x3] %vm6037_vm6, %v4999_v41 }
 0x1e4   :  { %2776 = vst.msk [vmem:[#allocation3 + $0x1f1] ss:$8 sm:$0x3] %vm6037_vm6, %v4999_v41  ;;  %2779 = vst.msk [vmem:[#allocation3 + $0x211] ss:$8 sm:$0x3] %vm6037_vm6, %v4999_v41 }
 0x1e5   :  { %2782 = vst.msk [vmem:[#allocation3 + $0x231] ss:$8 sm:$0x3] %vm6037_vm6, %v4999_v41  ;;  %2785 = vst.msk [vmem:[#allocation3 + $0x251] ss:$8 sm:$0x3] %vm6037_vm6, %v4999_v41 }
 0x1e6   :  { %2671 = vst.msk [vmem:[#allocation3] ss:$8 sm:$0x3] %vm6037_vm6, %v4999_v41  ;;  %2731 = vst.msk [vmem:[#allocation3 + $0x11] ss:$8 sm:$0x3] %vm6037_vm6, %v4999_v41 }
 0x1e7   :  { %4641 = vrot.lane.b32.xlu0 %v4640_v57, %s4997_s24  ;;  %4636 = vrot.lane.b32.xlu1 %v4635_v0, %s4998_s9  ;;  %2698 = vst.msk [vmem:[#allocation3 + $0x120] ss:$8 sm:$0x3] %vm6037_vm6, %v4999_v41  ;;  %2701 = vst.msk [vmem:[#allocation3 + $0x140] ss:$8 sm:$0x3] %vm6037_vm6, %v4999_v41 }
 0x1e8   :  { %2728 = vst.msk [vmem:[#allocation3 + $0x260] ss:$8 sm:$0x3] %vm6037_vm6, %v4999_v41  ;;  %2758 = vst.msk [vmem:[#allocation3 + $0x131] ss:$8 sm:$0x3] %vm6037_vm6, %v4999_v41 }
 0x1e9   :  { %2761 = vst.msk [vmem:[#allocation3 + $0x151] ss:$8 sm:$0x3] %vm6037_vm6, %v4999_v41  ;;  %2788 = vst.msk [vmem:[#allocation3 + $0x271] ss:$8 sm:$0x3] %vm6037_vm6, %v4999_v41 }
 0x1ea   :  { %v6160_v6 = vld [vmem:[#allocation3 + $0x48] sm:$0xff]  ;;  %v3123_v8 = vrot.slane %v6146_v18, 1  ;;  %v3124_v24 = vrot.slane %v6148_v20, 1  ;;  %v6170_v33 = vld [vmem:[#allocation3 + $0x58] sm:$0x3]  ;;  %v3324_v31 = vrot.slane %v6146_v18, 2 }
 0x1eb   :  { %4651 = vrot.lane.b32.xlu0 %v4650_v22, %s4998_s9  ;;  %4646 = vrot.lane.b32.xlu1 %v4645_v62, %s4996_s8  ;;  %v6172_v44 = vld [vmem:[#allocation3 + $0x68] sm:$0xff]  ;;  %v6174_v36 = vld [vmem:[#allocation3 + $0x78] sm:$0x3]  ;;  %v3129_v11 = vrot.slane %v6160_v6, 1  ;;  %v3130_v56 = vrot.slane %v6170_v33, 1  ;;  %v3325_v23 = vrot.slane %v6148_v20, 2 }
 0x1ec   :  { %v6189_v10 = vsel %vm3113_vm8, %v3123_v8, %v3124_v24  ;;  %v3136_v40 = vrot.slane %v6174_v36, 1  ;;  %v4820_v57 = vld [vmem:[%s8121_s3 + $0x200] ss:$8 sps:$4 sm:$0xff]   ;;  %v6203_v62 = vld [vmem:[#allocation2 + $0x32] sm:$0xff] }
 0x1ed   :  { %v6142_v47 = vld [vmem:[#allocation3 + $0x8] sm:$0xff]  ;;  %v6144_v59 = vld [vmem:[#allocation3 + $0x18] sm:$0x3]  ;;  %v6464_v53 = vld [vmem:[#allocation3 + $0x80] sm:$0xff] }
 0x1ee   :  { %v3117_v3 = vrot.slane %v6142_v47, 1  ;;  %v3118_v43 = vrot.slane %v6144_v59, 1  ;;  %v3319_v58 = vrot.slane %v6144_v59, 2  ;;  %v6222_v59 = vsel %vm3113_vm8, %v3129_v11, %v3130_v56  ;;  %v6242_v1 = vld [vmem:[#allocation2 + $0x72] sm:$0xff]  ;;  %v6257_v56 = vld [vmem:[#allocation3] sm:$0xff]  ;;  %v6543_v28 = vld [vmem:[#allocation3 + $0xe8] sm:$0xff] }
 0x1ef   :  { %4661 = vrot.lane.b32.xlu0 %v4660_v4, %s4996_s8  ;;  %4656 = vrot.lane.b32.xlu1 %v6022_v29, %s4997_s24  ;;  %v3318_v4 = vrot.slane %v6142_v47, 2  ;;  %8246 = vst [vmem:[#allocation25_spill] sm:$0xff] %v6242_v1  ;;  %v6417_v60 = vld [vmem:[#allocation3 + $0xb8] sm:$0x3] }
 0x1f0   :  { %v6182_v27 = vsel %vm3113_vm8, %v3117_v3, %v3118_v43 }
 0x1f1   :  { %v3275_v20 = vmax.f32 %v6142_v47, %v6182_v27  ;;  %v3277_v47 = vmax.f32 %v6146_v18, %v6189_v10  ;;  %v6252_v27 = vld [vmem:[#allocation2 + $0x42] sm:$0xff]  ;;  %v3326_v10 = vsel %vm3314_vm10, %v3324_v31, %v3325_v23  ;;  %v6286_v31 = vld [vmem:[#allocation3 + $0x30] sm:$0x3] }
 0x1f2   :  { %8247 = vst [vmem:[#allocation26_spill] sm:$0xff] %v6252_v27 }
 0x1f3   :  { %4671 = vrot.lane.b32.xlu0 %v6029_v12, %s4997_s24  ;;  %4666 = vrot.lane.b32.xlu1 %v4665_v35, %s4998_s9 }
 0x1f7   :  { %4681 = vrot.lane.b32.xlu0 %v4680_v30, %s4998_s9  ;;  %4676 = vrot.lane.b32.xlu1 %v4675_v38, %s4996_s8 }
 0x1fb   :  { %4691 = vrot.lane.b32.xlu0 %v5728_v63, %s5000_s10  ;;  %4686 = vrot.lane.b32.xlu1 %v4685_v52, %s4997_s24 }
 0x1ff   :  { %4701 = vrot.lane.b32.xlu0 %v6003_v17, %s5000_s10  ;;  %4696 = vrot.lane.b32.xlu1 %v5988_v34, %s5000_s10  ;;  %v3135_v17 = vrot.slane %v6172_v44, 1 }
 0x200   :  { %v6150_v45 = vpop.permute.xlu1 %4456 }
 0x201   :  { %v4452_v63 = vpop.permute.xlu0 %4451  ;;  %v8162_v5 = vunpack.i.h.bf16 %v6150_v45  ;;  %v8159_v25 = vunpack.i.l.bf16 %v6150_v45  ;;  %v8258_v49 = vunpack.i.h.bf16 %v6150_v45 }
 0x202   :  { %v4454_v51 = vunpack.i.h.bf16 %v4452_v63  ;;  %v4453_v14 = vunpack.i.l.bf16 %v4452_v63  ;;  %v6322_v63 = vld [vmem:[#allocation3 + $0x60] sm:$0xff] }
 0x203   :  { %4711 = vrot.lane.b32.xlu0 %v6022_v29, %s5000_s10  ;;  %4706 = vrot.lane.b32.xlu1 %v4705_v50, %s5000_s10  ;;  %v6226_v50 = vld [vmem:[#allocation2 + $0x52] sm:$0xff] }
 0x204   :  { %v1242_v46 = vsel %vm232_vm0, %v4453_v14, %v8159_v25  ;;  %v1243_v37 = vsel %vm232_vm0, %v4454_v51, %v8162_v5  ;;  %8245 = vst [vmem:[#allocation24_spill] sm:$0xff] %v6226_v50  ;;  %v6398_v5 = vld [vmem:[#allocation3 + $0x98] sm:$0x3] }
 0x205   :  { %v6176_v16 = vpop.permute.xlu0 %4461  ;;  %v1312_v34 = vpack.c.bf16 %v1243_v37, %v1242_v46  ;;  %v4834_v46 = vld [vmem:[%s8121_s3 + $0x224] ss:$8 sps:$4 sm:$0xff]   ;;  %v3320_v37 = vsel %vm3314_vm10, %v3318_v4, %v3319_v58  ;;  %v6282_v58 = vld [vmem:[#allocation3 + $0x10] sm:$0x3]  ;;  %v6307_v4 = vld [vmem:[#allocation2 + $0xd2] sm:$0xff] }
 0x206   :  { %v8157_v19 = vunpack.i.h.bf16 %v6176_v16  ;;  %v8158_v42 = vunpack.i.l.bf16 %v6176_v16  ;;  %8251 = vst [vmem:[#allocation30_spill] sm:$0xff] %v6307_v4 }
 0x207   :  { %4721 = vrot.lane.b32.xlu0 %v4685_v52, %s5000_s10  ;;  %4716 = vrot.lane.b32.xlu1 %v6029_v12, %s5000_s10 }
 0x208   :  { %2310 = vmatprep.mubr.bf16.mxu1 %v1312_v34  ;;  %v1226_v0 = vsel %vm1225_vm9, %v8158_v42, %v4453_v14  ;;  %v1227_v22 = vsel %vm1225_vm9, %v8157_v19, %v4454_v51  ;;  %v4826_v51 = vld [vmem:[%s8121_s3 + $0x210] ss:$8 sps:$4 sm:$0xff]   ;;  %v6238_v14 = vsel %vm3113_vm8, %v3135_v17, %v3136_v40  ;;  %v3330_v34 = vrot.slane %v6160_v6, 2  ;;  %v6261_v40 = vld [vmem:[#allocation2 + $0x62] sm:$0xff] }
 0x209   :  { %v4467_v29 = vpop.permute.xlu1 %4466  ;;  %v6206_v12 = vpop.permute.xlu0 %4471  ;;  %v1311_v35 = vpack.c.bf16 %v1227_v22, %v1226_v0  ;;  %8248 = vst [vmem:[#allocation27_spill] sm:$0xff] %v6261_v40  ;;  %v3336_v0 = vrot.slane %v6172_v44, 2  ;;  %v3337_v22 = vrot.slane %v6174_v36, 2  ;;  %v6284_v36 = vld [vmem:[#allocation3 + $0x20] sm:$0xff]  ;;  %v3121_v17 = vrot.slane %v6286_v31, 1 }
 0x20a   :  { %v4469_v30 = vunpack.i.h.bf16 %v4467_v29  ;;  %v4468_v38 = vunpack.i.l.bf16 %v4467_v29  ;;  %v8154_v41 = vunpack.i.h.bf16 %v6206_v12  ;;  %v8156_v52 = vunpack.i.l.bf16 %v6206_v12 }
 0x20b   :  { %4726 = vrot.lane.b32.xlu1 %v4725_v48, %s5000_s10  ;;  %2311 = vmatmul.mubr.bf16.vlgmr.msra.gmra.mrb[0].mxu1 %v1311_v35  ;;  %v3331_v48 = vrot.slane %v6170_v33, 2  ;;  %v4832_v33 = vld [vmem:[%s8121_s3 + $0x220] ss:$8 sps:$4 sm:$0xff]  }
 0x20c   :  { %2392 = vmatpush1.bf16.msra.mxu1 %v4820_v57  ;;  %v1244_v3 = vsel %vm232_vm0, %v4468_v38, %v8156_v52  ;;  %v1245_v43 = vsel %vm232_vm0, %v4469_v30, %v8154_v41  ;;  %v3279_v57 = vmax.f32 %v6160_v6, %v6222_v59  ;;  %v6280_v6 = vmax.f32 %v3275_v20, %v3320_v37  ;;  %v6296_v20 = vld [vmem:[#allocation3 + $0x40] sm:$0xff] }
 0x20d   :  { %v6244_v8 = vpop.permute.xlu1 %4476  ;;  %v1320_v24 = vpack.c.bf16 %v1245_v43, %v1244_v3  ;;  %2393 = vmatprep.subr.bf16.mxu1 %v4828_v21  ;;  %v3281_v21 = vmax.f32 %v6172_v44, %v6238_v14  ;;  %v6294_v44 = vmax.f32 %v3277_v47, %v3326_v10  ;;  %v6298_v43 = vld [vmem:[#allocation3 + $0x50] sm:$0x3]  ;;  %v3120_v10 = vrot.slane %v6284_v36, 1 }
 0x20e   :  { %v8149_v18 = vunpack.i.h.bf16 %v6244_v8  ;;  %v8150_v11 = vunpack.i.l.bf16 %v6244_v8  ;;  %v4838_v47 = vld [vmem:[%s8121_s3 + $0x230] ss:$8 sps:$4 sm:$0xff]  }
 0x20f   :  { %2320 = vmatprep.mubr.bf16.mxu1 %v1320_v24 }
 0x210   :  { %2394 = vmatpush1.bf16.msra.mxu1 %v4826_v51  ;;  %v1228_v29 = vsel %vm1225_vm9, %v8150_v11, %v4468_v38  ;;  %v1229_v35 = vsel %vm1225_vm9, %v8149_v18, %v4469_v30  ;;  %v4840_v30 = vld [vmem:[%s8121_s3 + $0x234] ss:$8 sps:$4 sm:$0xff]   ;;  %v3332_v38 = vsel %vm3314_vm10, %v3330_v34, %v3331_v48  ;;  %v3114_v51 = vrot.slane %v6257_v56, 1  ;;  %v6324_v18 = vld [vmem:[#allocation3 + $0x70] sm:$0x3]  ;;  %v6328_v11 = vld [vmem:[#allocation2 + $0xc2] sm:$0xff] }
 0x211   :  { %v6288_v23 = vpop.permute.xlu1 %4486  ;;  %v4482_v59 = vpop.permute.xlu0 %4481  ;;  %v1319_v3 = vpack.c.bf16 %v1229_v35, %v1228_v29  ;;  %2395 = vmatprep.subr.bf16.mxu1 %v4834_v46  ;;  %v6303_v29 = vld [vmem:[#allocation2 + $0x82] sm:$0xff]  ;;  %v6305_v35 = vld [vmem:[#allocation2 + $0x92] sm:$0xff]  ;;  %v3338_v34 = vsel %vm3314_vm10, %v3336_v0, %v3337_v22  ;;  %v3115_v48 = vrot.slane %v6282_v58, 1  ;;  %v3126_v0 = vrot.slane %v6296_v20, 1  ;;  %8252 = vst [vmem:[#allocation31_spill] sm:$0xff] %v6328_v11 }
 0x212   :  { %v8155_v14 = vunpack.i.h.bf16 %v6288_v23  ;;  %v8153_v24 = vunpack.i.l.bf16 %v6288_v23  ;;  %v4484_v37 = vunpack.i.h.bf16 %v4482_v59  ;;  %v4483_v46 = vunpack.i.l.bf16 %v4482_v59  ;;  %8249 = vst [vmem:[#allocation28_spill] sm:$0xff] %v6303_v29  ;;  %8250 = vst [vmem:[#allocation29_spill] sm:$0xff] %v6305_v35  ;;  %v600_v29 = vld [vmem:[#allocation2 + $0x10] sm:$0xff] }
 0x213   :  { %2321 = vmatmul.mubr.bf16.gmra.mrb[4].mxu1 %v1319_v3  ;;  %v3127_v22 = vrot.slane %v6298_v43, 1  ;;  %v6335_v41 = vmax.f32 %v3279_v57, %v3332_v38  ;;  %v6343_v25 = vmax.f32 %v3281_v21, %v3338_v34  ;;  %v6349_v57 = vsel %vm3113_vm8, %v3120_v10, %v3121_v17 }
 0x214   :  { %2396 = vmatpush1.bf16.msra.mxu1 %v4832_v33  ;;  %v1246_v59 = vsel %vm232_vm0, %v4483_v46, %v8153_v24  ;;  %v1247_v3 = vsel %vm232_vm0, %v4484_v37, %v8155_v14  ;;  %v4846_v24 = vld [vmem:[%s8121_s3 + $0x244] ss:$8 sps:$4 sm:$0xff]   ;;  %v3132_v38 = vrot.slane %v6322_v63, 1  ;;  %v3321_v10 = vrot.slane %v6284_v36, 2 }
 0x215   :  { %v6330_v7 = vpop.permute.xlu0 %4491  ;;  %v1328_v33 = vpack.c.bf16 %v1247_v3, %v1246_v59  ;;  %2397 = vmatprep.subr.bf16.mxu1 %v4840_v30  ;;  %v3516_v30 = vmax.f32 %v6280_v6, %v6294_v44  ;;  %v3116_v59 = vsel %vm3113_vm8, %v3114_v51, %v3115_v48  ;;  %v3133_v3 = vrot.slane %v6324_v18, 1  ;;  %v4844_v6 = vld [vmem:[%s8121_s3 + $0x240] ss:$8 sps:$4 sm:$0xff]  }
 0x216   :  { %v8160_v19 = vunpack.i.h.bf16 %v6330_v7  ;;  %v8161_v42 = vunpack.i.l.bf16 %v6330_v7  ;;  %v6363_v17 = vsel %vm3113_vm8, %v3126_v0, %v3127_v22  ;;  %v3315_v51 = vrot.slane %v6257_v56, 2 }
 0x217   :  { %2330 = vmatprep.mubr.bf16.mxu1 %v1328_v33  ;;  %v3322_v33 = vrot.slane %v6286_v31, 2  ;;  %v3274_v31 = vmax.f32 %v6257_v56, %v3116_v59  ;;  %v4858_v59 = vld [vmem:[%s8121_s3 + $0x264] ss:$8 sps:$4 sm:$0xff]  }
 0x218   :  { %2398 = vmatpush1.bf16.msra.mxu1 %v4838_v47  ;;  %v1230_v52 = vsel %vm1225_vm9, %v8161_v42, %v4483_v46  ;;  %v1231_v21 = vsel %vm1225_vm9, %v8160_v19, %v4484_v37  ;;  %v4852_v46 = vld [vmem:[%s8121_s3 + $0x254] ss:$8 sps:$4 sm:$0xff]   ;;  %v3316_v37 = vrot.slane %v6282_v58, 2  ;;  %v6382_v58 = vmax.f32 %v3516_v30, %v6335_v41  ;;  %v6396_v30 = vld [vmem:[#allocation3 + $0x88] sm:$0xff] }
 0x219   :  { %v4497_v34 = vpop.permute.xlu1 %4496  ;;  %v6366_v48 = vpop.permute.xlu0 %4501  ;;  %v1327_v47 = vpack.c.bf16 %v1231_v21, %v1230_v52  ;;  %2399 = vmatprep.subr.bf16.mxu1 %v4846_v24  ;;  %v4850_v52 = vld [vmem:[%s8121_s3 + $0x250] ss:$8 sps:$4 sm:$0xff]   ;;  %v3518_v24 = vmax.f32 %v6294_v44, %v6335_v41  ;;  %v6385_v21 = vsel %vm3113_vm8, %v3132_v38, %v3133_v3  ;;  %v3327_v42 = vrot.slane %v6296_v20, 2 }
 0x21a   :  { %v4499_v14 = vunpack.i.h.bf16 %v4497_v34  ;;  %v4498_v0 = vunpack.i.l.bf16 %v4497_v34  ;;  %v8163_v22 = vunpack.i.h.bf16 %v6366_v48  ;;  %v8164_v19 = vunpack.i.l.bf16 %v6366_v48 }
 0x21b   :  { %2331 = vmatmul.mubr.bf16.gmra.mrb[8].mxu1 %v1327_v47  ;;  %v3328_v44 = vrot.slane %v6298_v43, 2  ;;  %v3276_v3 = vmax.f32 %v6284_v36, %v6349_v57  ;;  %v3317_v43 = vsel %vm3314_vm10, %v3315_v51, %v3316_v37  ;;  %v3333_v36 = vrot.slane %v6322_v63, 2 }
 0x21c   :  { %2400 = vmatpush1.bf16.msra.mxu1 %v4844_v6  ;;  %v1248_v34 = vsel %vm232_vm0, %v4498_v0, %v8164_v19  ;;  %v1249_v47 = vsel %vm232_vm0, %v4499_v14, %v8163_v22  ;;  %v3278_v6 = vmax.f32 %v6296_v20, %v6363_v17  ;;  %v3334_v20 = vrot.slane %v6324_v18, 2 }
 0x21d   :  { %v6400_v38 = vpop.permute.xlu1 %4506  ;;  %v1336_v56 = vpack.c.bf16 %v1249_v47, %v1248_v34  ;;  %2401 = vmatprep.subr.bf16.mxu1 %v4852_v46  ;;  %v3280_v34 = vmax.f32 %v6322_v63, %v6385_v21  ;;  %v3323_v46 = vsel %vm3314_vm10, %v3321_v10, %v3322_v33  ;;  %v6415_v47 = vld [vmem:[#allocation3 + $0xa8] sm:$0xff]  ;;  %v3141_v57 = vrot.slane %v6396_v30, 1 }
 0x21e   :  { %v8166_v22 = vunpack.i.h.bf16 %v6400_v38  ;;  %v8167_v19 = vunpack.i.l.bf16 %v6400_v38  ;;  %v3142_v17 = vrot.slane %v6398_v5, 1  ;;  %v4856_v10 = vld [vmem:[%s8121_s3 + $0x260] ss:$8 sps:$4 sm:$0xff]   ;;  %v3329_v63 = vsel %vm3314_vm10, %v3327_v42, %v3328_v44 }
 0x21f   :  { %2340 = vmatprep.mubr.bf16.mxu1 %v1336_v56  ;;  %v6433_v18 = vmax.f32 %v3274_v31, %v3317_v43  ;;  %v6440_v56 = vmax.f32 %v3276_v3, %v3323_v46  ;;  %v6450_v43 = vmax.f32 %v3518_v24, %v6343_v25  ;;  %v3335_v3 = vsel %vm3314_vm10, %v3333_v36, %v3334_v20  ;;  %v6466_v36 = vld [vmem:[#allocation3 + $0x90] sm:$0x3] }
 0x220   :  { %2402 = vmatpush1.bf16.msra.mxu1 %v4850_v52  ;;  %v1232_v51 = vsel %vm1225_vm9, %v8167_v19, %v4498_v0  ;;  %v1233_v37 = vsel %vm1225_vm9, %v8166_v22, %v4499_v14  ;;  %v4864_v0 = vld [vmem:[%s8121_s3 + $0x274] ss:$8 sps:$4 sm:$0xff]   ;;  %v3147_v14 = vrot.slane %v6415_v47, 1  ;;  %v3148_v22 = vrot.slane %v6417_v60, 1 }
 0x221   :  { %v6435_v33 = vpop.permute.xlu1 %4516  ;;  %v4512_v21 = vpop.permute.xlu0 %4511  ;;  %v1335_v52 = vpack.c.bf16 %v1233_v37, %v1232_v51  ;;  %2403 = vmatprep.subr.bf16.mxu1 %v4858_v59  ;;  %v4862_v59 = vld [vmem:[%s8121_s3 + $0x270] ss:$8 sps:$4 sm:$0xff]   ;;  %v6453_v46 = vmax.f32 %v3278_v6, %v3329_v63  ;;  %v3143_v51 = vsel %vm3113_vm8, %v3141_v57, %v3142_v17  ;;  %v3343_v24 = vrot.slane %v6398_v5, 2  ;;  %v4870_v57 = vld [vmem:[%s8121_s3 + $0x284] ss:$8 sps:$4 sm:$0xff]  }
 0x222   :  { %v8169_v19 = vunpack.i.h.bf16 %v6435_v33  ;;  %v8170_v42 = vunpack.i.l.bf16 %v6435_v33  ;;  %v4514_v31 = vunpack.i.h.bf16 %v4512_v21  ;;  %v4513_v44 = vunpack.i.l.bf16 %v4512_v21 }
 0x223   :  { %2341 = vmatmul.mubr.bf16.gmra.mrb[12].mxu1 %v1335_v52  ;;  %v3342_v52 = vrot.slane %v6396_v30, 2  ;;  %v3149_v17 = vsel %vm3113_vm8, %v3147_v14, %v3148_v22  ;;  %v3349_v63 = vrot.slane %v6417_v60, 2  ;;  %v3517_v22 = vmax.f32 %v6440_v56, %v6453_v46 }
 0x224   :  { %2404 = vmatpush1.bf16.msra.mxu1 %v4856_v10  ;;  %v1250_v37 = vsel %vm232_vm0, %v4513_v44, %v8170_v42  ;;  %v1251_v21 = vsel %vm232_vm0, %v4514_v31, %v8169_v19  ;;  %v3348_v10 = vrot.slane %v6415_v47, 2  ;;  %v6478_v42 = vmax.f32 %v3280_v34, %v3335_v3 }
 0x225   :  { %v6468_v6 = vpop.permute.xlu0 %4521  ;;  %v1344_v20 = vpack.c.bf16 %v1251_v21, %v1250_v37  ;;  %2405 = vmatprep.subr.bf16.mxu1 %v4864_v0  ;;  %v3515_v37 = vmax.f32 %v6433_v18, %v6440_v56  ;;  %v6482_v0 = vld [vmem:[#allocation3 + $0xa0] sm:$0xff]  ;;  %v6484_v21 = vld [vmem:[#allocation3 + $0xb0] sm:$0x3]  ;;  %v3283_v14 = vmax.f32 %v6396_v30, %v3143_v51  ;;  %v3138_v60 = vrot.slane %v6464_v53, 1 }
 0x226   :  { %v8172_v19 = vunpack.i.l.bf16 %v6468_v6  ;;  %v3139_v5 = vrot.slane %v6466_v36, 1  ;;  %v8253_v18 = vunpack.i.h.bf16 %v6468_v6  ;;  %v3285_v56 = vmax.f32 %v6415_v47, %v3149_v17 }
 0x227   :  { %2350 = vmatprep.mubr.bf16.mxu1 %v1344_v20  ;;  %v4868_v20 = vld [vmem:[%s8121_s3 + $0x280] ss:$8 sps:$4 sm:$0xff]   ;;  %v3344_v30 = vsel %vm3314_vm10, %v3342_v52, %v3343_v24 }
 0x228   :  { %2406 = vmatpush1.bf16.msra.mxu1 %v4862_v59  ;;  %v1234_v34 = vsel %vm1225_vm9, %v8172_v19, %v4513_v44  ;;  %v1235_v3 = vsel %vm1225_vm9, %v8253_v18, %v4514_v31  ;;  %v4876_v44 = vld [vmem:[%s8121_s3 + $0x294] ss:$8 sps:$4 sm:$0xff]   ;;  %v3350_v19 = vsel %vm3314_vm10, %v3348_v10, %v3349_v63  ;;  %v3144_v31 = vrot.slane %v6482_v0, 1  ;;  %v6512_v24 = vld [vmem:[#allocation3 + $0xc8] sm:$0xff] }
 0x229   :  { %v4527_v51 = vpop.permute.xlu1 %4526  ;;  %v6502_v26 = vpop.permute.xlu0 %4531  ;;  %v1343_v59 = vpack.c.bf16 %v1235_v3, %v1234_v34  ;;  %2407 = vmatprep.subr.bf16.mxu1 %v4870_v57  ;;  %v3145_v18 = vrot.slane %v6484_v21, 1  ;;  %v6515_v57 = vmax.f32 %v3515_v37, %v6453_v46  ;;  %v3140_v17 = vsel %vm3113_vm8, %v3138_v60, %v3139_v5  ;;  %v4874_v37 = vld [vmem:[%s8121_s3 + $0x290] ss:$8 sps:$4 sm:$0xff]  }
 0x22a   :  { %v4529_v13 = vunpack.i.h.bf16 %v4527_v51  ;;  %v4528_v39 = vunpack.i.l.bf16 %v4527_v51  ;;  %v8175_v47 = vunpack.i.h.bf16 %v6502_v26  ;;  %v8176_v52 = vunpack.i.l.bf16 %v6502_v26 }
 0x22b   :  { %2351 = vmatmul.mubr.bf16.gmra.mrb[16].mxu1 %v1343_v59  ;;  %v3339_v10 = vrot.slane %v6464_v53, 2  ;;  %v3340_v63 = vrot.slane %v6466_v36, 2  ;;  %v6530_v51 = vmax.f32 %v3517_v22, %v6478_v42  ;;  %v2980_v36 = vld [vmem:[#allocation3 + $0xd8] sm:$0x3]  ;;  %v4882_v59 = vld [vmem:[%s8121_s3 + $0x2a4] ss:$8 sps:$4 sm:$0xff]  }
 0x22c   :  { %2408 = vmatpush1.bf16.msra.mxu1 %v4868_v20  ;;  %v1252_v34 = vsel %vm232_vm0, %v4528_v39, %v8176_v52  ;;  %v1253_v3 = vsel %vm232_vm0, %v4529_v13, %v8175_v47  ;;  %v6539_v47 = vmax.f32 %v3283_v14, %v3344_v30  ;;  %v6541_v52 = vmax.f32 %v3285_v56, %v3350_v19  ;;  %v6545_v22 = vld [vmem:[#allocation3 + $0xf8] sm:$0x3] }
 0x22d   :  { %v6534_v60 = vpop.permute.xlu1 %4536  ;;  %v1352_v20 = vpack.c.bf16 %v1253_v3, %v1252_v34  ;;  %2409 = vmatprep.subr.bf16.mxu1 %v4876_v44  ;;  %v3153_v15 = vrot.slane %v6512_v24, 1  ;;  %v3146_v44 = vsel %vm3113_vm8, %v3144_v31, %v3145_v18  ;;  %v3282_v34 = vmax.f32 %v6464_v53, %v3140_v17  ;;  %v4880_v53 = vld [vmem:[%s8121_s3 + $0x2a0] ss:$8 sps:$4 sm:$0xff]  }
 0x22e   :  { %v8181_v5 = vunpack.i.h.bf16 %v6534_v60  ;;  %v8182_v9 = vunpack.i.l.bf16 %v6534_v60  ;;  %v3341_v14 = vsel %vm3314_vm10, %v3339_v10, %v3340_v63  ;;  %v3345_v19 = vrot.slane %v6482_v0, 2 }
 0x22f   :  { %2360 = vmatprep.mubr.bf16.mxu1 %v1352_v20  ;;  %v3346_v56 = vrot.slane %v6484_v21, 2  ;;  %v3154_v30 = vrot.slane %v2980_v36, 1  ;;  %v3159_v31 = vrot.slane %v6543_v28, 1  ;;  %v3160_v18 = vrot.slane %v6545_v22, 1 }
 0x230   :  { %2410 = vmatpush1.bf16.msra.mxu1 %v4874_v37  ;;  %v1236_v3 = vsel %vm1225_vm9, %v8182_v9, %v4528_v39  ;;  %v1237_v2 = vsel %vm1225_vm9, %v8181_v5, %v4529_v13  ;;  %v4888_v39 = vld [vmem:[%s8121_s3 + $0x2b4] ss:$8 sps:$4 sm:$0xff]   ;;  %v3522_v13 = vmax.f32 %v6343_v25, %v6539_v47  ;;  %v3354_v37 = vrot.slane %v6512_v24, 2 }
 0x231   :  { %v6566_v17 = vpop.permute.xlu1 %4546  ;;  %v4542_v21 = vpop.permute.xlu0 %4541  ;;  %v1351_v10 = vpack.c.bf16 %v1237_v2, %v1236_v3  ;;  %2411 = vmatprep.subr.bf16.mxu1 %v4882_v59  ;;  %v3155_v63 = vsel %vm3113_vm8, %v3153_v15, %v3154_v30  ;;  %v3284_v2 = vmax.f32 %v6482_v0, %v3146_v44  ;;  %v6578_v59 = vmax.f32 %v3282_v34, %v3341_v14 }
 0x232   :  { %v8185_v20 = vunpack.i.h.bf16 %v6566_v17  ;;  %v8190_v5 = vunpack.i.l.bf16 %v6566_v17  ;;  %v4544_v9 = vunpack.i.h.bf16 %v4542_v21  ;;  %v4543_v61 = vunpack.i.l.bf16 %v4542_v21  ;;  %v4886_v21 = vld [vmem:[%s8121_s3 + $0x2b0] ss:$8 sps:$4 sm:$0xff]  }
 0x233   :  { %2361 = vmatmul.mubr.bf16.gmra.mrb[20].mxu1 %v1351_v10  ;;  %v3519_v3 = vmax.f32 %v6453_v46, %v6478_v42  ;;  %v3355_v54 = vrot.slane %v2980_v36, 2  ;;  %v3347_v0 = vsel %vm3314_vm10, %v3345_v19, %v3346_v56  ;;  %v3161_v44 = vsel %vm3113_vm8, %v3159_v31, %v3160_v18  ;;  %v4894_v36 = vld [vmem:[%s8121_s3 + $0x2c4] ss:$8 sps:$4 sm:$0xff]  }
 0x234   :  { %2412 = vmatpush1.bf16.msra.mxu1 %v4880_v53  ;;  %v1254_v15 = vsel %vm232_vm0, %v4543_v61, %v8190_v5  ;;  %v1255_v30 = vsel %vm232_vm0, %v4544_v9, %v8185_v20  ;;  %v3287_v14 = vmax.f32 %v6512_v24, %v3155_v63  ;;  %v3360_v53 = vrot.slane %v6543_v28, 2 }
 0x235   :  { %v6593_v34 = vpop.permute.xlu0 %4551  ;;  %v1360_v46 = vpack.c.bf16 %v1255_v30, %v1254_v15  ;;  %2413 = vmatprep.subr.bf16.mxu1 %v4888_v39  ;;  %v3361_v10 = vrot.slane %v6545_v22, 2  ;;  %v3356_v31 = vsel %vm3314_vm10, %v3354_v37, %v3355_v54  ;;  %v8254_v24 = vmax.f32 %v6335_v41, %v6343_v25  ;;  %v4892_v25 = vld [vmem:[%s8121_s3 + $0x2c0] ss:$8 sps:$4 sm:$0xff]  }
 0x236   :  { %v8188_v20 = vunpack.i.h.bf16 %v6593_v34  ;;  %v8189_v19 = vunpack.i.l.bf16 %v6593_v34  ;;  %v6614_v22 = vmax.f32 %v3284_v2, %v3347_v0  ;;  %v3521_v63 = vmax.f32 %v6478_v42, %v6578_v59  ;;  %v6631_v15 = vld [vmem:[#allocation3 + $0xc0] sm:$0xff]  ;;  %v6633_v42 = vld [vmem:[#allocation3 + $0xd0] sm:$0x3] }
 0x237   :  { %2370 = vmatprep.mubr.bf16.mxu1 %v1360_v46  ;;  %v6612_v39 = vmax.f32 %v8254_v24, %v6539_v47  ;;  %v6628_v41 = vmax.f32 %v3522_v13, %v6541_v52  ;;  %v3289_v2 = vmax.f32 %v6543_v28, %v3161_v44  ;;  %v6641_v0 = vmax.f32 %v3519_v3, %v6578_v59 }
 0x238   :  { %2414 = vmatpush1.bf16.msra.mxu1 %v4886_v21  ;;  %v1238_v54 = vsel %vm1225_vm9, %v8189_v19, %v4543_v61  ;;  %v1239_v37 = vsel %vm1225_vm9, %v8188_v20, %v4544_v9  ;;  %v4900_v9 = vld [vmem:[%s8121_s3 + $0x2d4] ss:$8 sps:$4 sm:$0xff]   ;;  %v3362_v13 = vsel %vm3314_vm10, %v3360_v53, %v3361_v10  ;;  %v6644_v28 = vmax.f32 %v3287_v14, %v3356_v31 }
 0x239   :  { %v4557_v30 = vpop.permute.xlu1 %4556  ;;  %v6635_v21 = vpop.permute.xlu0 %4561  ;;  %v1359_v61 = vpack.c.bf16 %v1239_v37, %v1238_v54  ;;  %2415 = vmatprep.subr.bf16.mxu1 %v4894_v36  ;;  %8255 = vst [vmem:[#allocation32_spill] sm:$0xff] %v6641_v0  ;;  %v6648_v36 = vld [vmem:[#allocation3 + $0xe0] sm:$0xff]  ;;  %v6650_v54 = vld [vmem:[#allocation3 + $0xf0] sm:$0x3]  ;;  %v6653_v37 = vmax.f32 %v3521_v63, %v6614_v22  ;;  %v3524_v3 = vmax.f32 %v6539_v47, %v6541_v52  ;;  %v3150_v14 = vrot.slane %v6631_v15, 1 }
 0x23a   :  { %v4559_v44 = vunpack.i.h.bf16 %v4557_v30  ;;  %v4558_v46 = vunpack.i.l.bf16 %v4557_v30  ;;  %v8187_v24 = vunpack.i.h.bf16 %v6635_v21  ;;  %v8186_v18 = vunpack.i.l.bf16 %v6635_v21  ;;  %v4898_v63 = vld [vmem:[%s8121_s3 + $0x2d0] ss:$8 sps:$4 sm:$0xff]  }
 0x23b   :  { %2371 = vmatmul.mubr.bf16.gmra.mrb[24].mxu1 %v1359_v61  ;;  %8256 = vst [vmem:[#allocation33_spill] sm:$0xff] %v6653_v37  ;;  %v3151_v53 = vrot.slane %v6633_v42, 1  ;;  %v6670_v30 = vmax.f32 %v3289_v2, %v3362_v13  ;;  %v3156_v20 = vrot.slane %v6648_v36, 1  ;;  %v3157_v19 = vrot.slane %v6650_v54, 1 }
 0x23c   :  { %2416 = vmatpush1.bf16.msra.mxu1 %v4892_v25  ;;  %v1256_v10 = vsel %vm232_vm0, %v4558_v46, %v8186_v18  ;;  %v1257_v31 = vsel %vm232_vm0, %v4559_v44, %v8187_v24  ;;  %v4906_v18 = vld [vmem:[%s8121_s3 + $0x2e4] ss:$8 sps:$4 sm:$0xff]   ;;  %v3526_v24 = vmax.f32 %v6541_v52, %v6644_v28  ;;  %v3351_v52 = vrot.slane %v6631_v15, 2 }
 0x23d   :  { %v6672_v61 = vpop.permute.xlu1 %4566  ;;  %v4572_v25 = vpop.permute.xlu0 %4571  ;;  %v1368_v56 = vpack.c.bf16 %v1257_v31, %v1256_v10  ;;  %2417 = vmatprep.subr.bf16.mxu1 %v4900_v9  ;;  %v6686_v10 = vmax.f32 %v3524_v3, %v6644_v28  ;;  %v6689_v31 = vsel %vm3113_vm8, %v3150_v14, %v3151_v53  ;;  %v8259_v2 = vunpack.i.l.bf16 %v6150_v45  ;;  %v4904_v9 = vld [vmem:[%s8121_s3 + $0x2e0] ss:$8 sps:$4 sm:$0xff]  }
 0x23e   :  { %v4574_v13 = vunpack.i.h.bf16 %v4572_v25  ;;  %v4573_v5 = vunpack.i.l.bf16 %v4572_v25  ;;  %v8260_v25 = vunpack.i.l.bf16 %v6672_v61  ;;  %v8261_v14 = vunpack.i.h.bf16 %v6672_v61 }
 0x23f   :  { %2380 = vmatprep.mubr.bf16.mxu1 %v1368_v56  ;;  %8257 = vst [vmem:[#allocation34_spill] sm:$0xff] %v6686_v10 }
 0x240   :  { %v6695_v47 = vsel %vm1258_vm11, %v8258_v49, %v4574_v13  ;;  %v6700_v56 = vsel %vm1258_vm11, %v8259_v2, %v4573_v5  ;;  %2418 = vmatpush1.bf16.msra.mxu1 %v4898_v63  ;;  %v1240_v3 = vsel %vm1225_vm9, %v8260_v25, %v4558_v46  ;;  %v1241_v53 = vsel %vm1225_vm9, %v8261_v14, %v4559_v44  ;;  %v599_v2 = vld [vmem:[#allocation2] sm:$0xff]  ;;  %v4909_v46 = vld [vmem:[%s8121_s3 + $0x2f4] ss:$8 sps:$4 sm:$0xff]  }
 0x241   :  { %v6713_v45 = vpop.permute.xlu1 %4576  ;;  %v4582_v32 = vpop.permute.xlu0 %4581  ;;  %v1367_v63 = vpack.c.bf16 %v1241_v53, %v1240_v3  ;;  %2419 = vmatprep.subr.bf16.mxu1 %v4906_v18  ;;  %v6719_v25 = vmax.f32 %v3526_v24, %v6670_v30  ;;  %v6722_v44 = vsel %vm3113_vm8, %v3156_v20, %v3157_v19  ;;  %v3286_v18 = vmax.f32 %v6631_v15, %v6689_v31  ;;  %v4907_v15 = vld [vmem:[%s8121_s3 + $0x2f0] ss:$8 sps:$4 sm:$0xff]  }
 0x242   :  { %v4584_v11 = vunpack.i.h.bf16 %v4582_v32  ;;  %v4583_v4 = vunpack.i.l.bf16 %v4582_v32  ;;  %v3352_v3 = vrot.slane %v6633_v42, 2  ;;  %v3357_v53 = vrot.slane %v6648_v36, 2 }
 0x243   :  { %8262 = vst [vmem:[#allocation35_spill] sm:$0xff] %v6719_v25  ;;  %2381 = vmatmul.mubr.bf16.gmra.mrb[28].mxu1 %v1367_v63  ;;  %v3358_v24 = vrot.slane %v6650_v54, 2  ;;  %v8263_v14 = vunpack.i.l.bf16 %v6176_v16  ;;  %v8264_v63 = vunpack.i.h.bf16 %v6176_v16 }
 0x244   :  { %v1193_v20 = vsel %vm402_vm3, %v600_v29, %v4584_v11  ;;  %v1192_v19 = vsel %vm402_vm3, %v599_v2, %v4583_v4  ;;  %2420 = vmatpush1.bf16.msra.mxu1 %v4904_v9  ;;  %v8265_v9 = vunpack.i.l.bf16 %v6713_v45 }
 0x245   :  { %v1209_v32 = vsel %vm1208_vm12, %v4583_v4, %v8263_v14  ;;  %v1210_v49 = vsel %vm1208_vm12, %v4584_v11, %v8264_v63  ;;  %v1309_v42 = vpack.c.bf16 %v1193_v20, %v1192_v19  ;;  %v4587_v31 = vpop.permute.xlu1 %4586  ;;  %v6742_v54 = vpop.permute.xlu0 %4591  ;;  %2421 = vmatprep.subr.bf16.mxu1 %v4909_v46  ;;  %v8266_v4 = vunpack.i.h.bf16 %v6713_v45  ;;  %v4910_v11 = vld [vmem:[%s8123_s5] sm:$0xff]  }
 0x246   :  { %v1310_v29 = vpack.c.bf16 %v1210_v49, %v1209_v32  ;;  %v1276_v2 = vsel %vm1275_vm13, %v4573_v5, %v8265_v9  ;;  %v4589_v14 = vunpack.i.h.bf16 %v4587_v31  ;;  %v4588_v63 = vunpack.i.l.bf16 %v4587_v31  ;;  %v4914_v49 = vld [vmem:[%s8121_s3 + $0x304] ss:$8 sps:$4 sm:$0xff]   ;;  %v4912_v46 = vld [vmem:[%s8121_s3 + $0x300] ss:$8 sps:$4 sm:$0xff]  }
 0x247   :  { %v1277_v16 = vsel %vm1275_vm13, %v4574_v13, %v8266_v4  ;;  %v8197_v20 = vunpack.i.h.bf16 %v6742_v54  ;;  %v8198_v19 = vunpack.i.l.bf16 %v6742_v54  ;;  %v3353_v32 = vsel %vm3314_vm10, %v3351_v52, %v3352_v3  ;;  %v6763_v9 = vld [vmem:[#allocation3 + $0x108] sm:$0xff] }
 0x248   :  { %2197 = vmatprep.mubr.bf16.mxu0 %v1310_v29  ;;  %v1314_v5 = vpack.c.bf16 %v1277_v16, %v1276_v2  ;;  %2422 = vmatpush1.bf16.msra.mxu1 %v4907_v15  ;;  %v8267_v2 = vunpack.i.l.bf16 %v6206_v12  ;;  %v6776_v16 = vld [vmem:[#allocation3 + $0x118] sm:$0x3]  ;;  %v3165_v13 = vrot.slane %v6763_v9, 1 }
 0x249   :  { %2198 = vmatmul.mubr.bf16.vlgmr.msra.gmra.mrb[32].mxu0 %v1309_v42  ;;  %v1278_v31 = vsel %vm1275_vm13, %v4588_v63, %v8198_v19  ;;  %v1279_v29 = vsel %vm1275_vm13, %v4589_v14, %v8197_v20  ;;  %v4597_v52 = vpop.permute.xlu1 %4596  ;;  %v4602_v3 = vpop.permute.xlu0 %4601  ;;  %v4911_v42 = vld [vmem:[%s8123_s5 + $0x8] sm:$0xff]   ;;  %v8268_v20 = vunpack.i.h.bf16 %v6206_v12  ;;  %v8269_v19 = vmov 0   ;;  %2504 = vmatprep.subr.bf16.mxu1 %v4914_v49 }
 0x24a   :  { %v6774_v4 = vsel %vm1258_vm11, %v8267_v2, %v4588_v63  ;;  %2423 = vmatprep.mubr.bf16.mxu1 %v1314_v5  ;;  %3723 = vmatpush1.bf16.msra.mxu0 %v4910_v11  ;;  %v1322_v15 = vpack.c.bf16 %v1279_v29, %v1278_v31  ;;  %v6790_v2 = vsel %vm3314_vm10, %v3357_v53, %v3358_v24  ;;  %v4599_v11 = vunpack.i.h.bf16 %v4597_v52  ;;  %v4917_v31 = vld [vmem:[%s8121_s3 + $0x314] ss:$8 sps:$4 sm:$0xff]   ;;  %v601_v53 = vld [vmem:[#allocation2 + $0x20] sm:$0xff] }
 0x24b   :  { %v6787_v63 = vsel %vm1258_vm11, %v8268_v20, %v4589_v14  ;;  %v4598_v5 = vunpack.i.l.bf16 %v4597_v52  ;;  %3724 = vmatprep.subr.bf16.mxu0 %v8269_v19  ;;  %v6796_v29 = vmax.f32 %v3286_v18, %v3353_v32  ;;  %v4604_v12 = vunpack.i.h.bf16 %v4602_v3  ;;  %v602_v24 = vld [vmem:[#allocation2 + $0x30] sm:$0xff] }
 0x24c   :  { %v4603_v35 = vunpack.i.l.bf16 %v4602_v3  ;;  %v8270_v14 = vpack.c.bf16 %v6695_v47, %v6700_v56  ;;  %v1321_v20 = vpack.c.bf16 %v6787_v63, %v6774_v4  ;;  %v3166_v49 = vrot.slane %v6776_v16, 1  ;;  %v6813_v56 = vld [vmem:[#allocation3 + $0x128] sm:$0xff] }
 0x24d   :  { %v8271_v52 = vunpack.i.l.bf16 %v6244_v8  ;;  %v8272_v32 = vunpack.i.h.bf16 %v6244_v8  ;;  %v1194_v40 = vsel %vm402_vm3, %v601_v53, %v4598_v5  ;;  %v1195_v47 = vsel %vm402_vm3, %v602_v24, %v4599_v11  ;;  %v4612_v4 = vpop.permute.xlu0 %4611  ;;  %v4918_v8 = vld [vmem:[%s8123_s5 + $0x10] sm:$0xff]  }
 0x24e   :  { %2424 = vmatmul.mubr.bf16.vlgmr.msra.gmra.mrb[0].mxu1 %v8270_v14  ;;  %v6815_v14 = vpop.permute.xlu1 %4606  ;;  %3725 = vmatpush1.bf16.msra.mxu0 %v4911_v42  ;;  %v4614_v24 = vunpack.i.h.bf16 %v4612_v4  ;;  %v4613_v42 = vunpack.i.l.bf16 %v4612_v4  ;;  %v6844_v4 = vsel %vm3113_vm8, %v3165_v13, %v3166_v49 }
 0x24f   :  { %2433 = vmatprep.mubr.bf16.mxu1 %v1322_v15  ;;  %v1211_v18 = vsel %vm1208_vm12, %v4598_v5, %v8271_v52  ;;  %v1212_v3 = vsel %vm1208_vm12, %v4599_v11, %v8272_v32  ;;  %v1317_v15 = vpack.c.bf16 %v1195_v47, %v1194_v40  ;;  %2505 = vmatpush1.bf16.msra.mxu1 %v4912_v46  ;;  %v4915_v52 = vld [vmem:[%s8121_s3 + $0x310] ss:$8 sps:$4 sm:$0xff]   ;;  %v8203_v53 = vunpack.i.l.bf16 %v6815_v14  ;;  %v4921_v40 = vld [vmem:[%s8121_s3 + $0x324] ss:$8 sps:$4 sm:$0xff]  }
 0x250   :  { %v1318_v63 = vpack.c.bf16 %v1212_v3, %v1211_v18  ;;  %3726 = vmatprep.subr.bf16.mxu0 %v8269_v19  ;;  %2506 = vmatprep.subr.bf16.mxu1 %v4917_v31  ;;  %v6831_v46 = vld [vmem:[#allocation3 + $0x138] sm:$0x3]  ;;  %v8273_v18 = vunpack.i.l.bf16 %v6288_v23  ;;  %v8274_v3 = vunpack.i.h.bf16 %v6288_v23  ;;  %v3171_v31 = vrot.slane %v6813_v56, 1 }
 0x251   :  { %v8275_v11 = vunpack.i.l.bf16 %v6330_v7  ;;  %v8276_v5 = vunpack.i.h.bf16 %v6330_v7  ;;  %v1280_v23 = vsel %vm1275_vm13, %v4603_v35, %v8203_v53  ;;  %v6859_v1 = vpop.permute.xlu0 %4621  ;;  %v4919_v7 = vld [vmem:[%s8121_s3 + $0x320] ss:$8 sps:$4 sm:$0xff]   ;;  %v3367_v53 = vrot.slane %v6776_v16, 2 }
 0x252   :  { %2207 = vmatprep.mubr.bf16.mxu0 %v1318_v63  ;;  %v6836_v32 = vsel %vm1258_vm11, %v8273_v18, %v4603_v35  ;;  %v6841_v47 = vsel %vm1258_vm11, %v8274_v3, %v4604_v12  ;;  %v8277_v3 = vunpack.i.h.bf16 %v6815_v14  ;;  %v4617_v49 = vpop.permute.xlu1 %4616  ;;  %3727 = vmatpush1.bf16.msra.mxu0 %v4918_v8  ;;  %v3172_v35 = vrot.slane %v6831_v46, 1 }
 0x253   :  { %2208 = vmatmul.mubr.bf16.gmra.mrb[36].mxu0 %v1317_v15  ;;  %v1213_v63 = vsel %vm1208_vm12, %v4613_v42, %v8275_v11  ;;  %v1214_v18 = vsel %vm1208_vm12, %v4614_v24, %v8276_v5  ;;  %2507 = vmatpush1.bf16.msra.mxu1 %v4915_v52  ;;  %v4922_v11 = vld [vmem:[%s8123_s5 + $0x18] sm:$0xff]   ;;  %v3366_v5 = vrot.slane %v6763_v9, 2  ;;  %v8208_v8 = vunpack.i.l.bf16 %v6859_v1  ;;  %v603_v52 = vld [vmem:[#allocation2 + $0x40] sm:$0xff] }
 0x254   :  { %v1281_v13 = vsel %vm1275_vm13, %v4604_v12, %v8277_v3  ;;  %v1326_v15 = vpack.c.bf16 %v1214_v18, %v1213_v63  ;;  %v4619_v12 = vunpack.i.h.bf16 %v4617_v49  ;;  %v4618_v3 = vunpack.i.l.bf16 %v4617_v49  ;;  %2508 = vmatprep.subr.bf16.mxu1 %v4921_v40  ;;  %3728 = vmatprep.subr.bf16.mxu0 %v8269_v19  ;;  %v604_v63 = vld [vmem:[#allocation2 + $0x50] sm:$0xff] }
 0x255   :  { %v1330_v10 = vpack.c.bf16 %v1281_v13, %v1280_v23  ;;  %v4925_v18 = vld [vmem:[%s8121_s3 + $0x334] ss:$8 sps:$4 sm:$0xff]   ;;  %v1196_v23 = vsel %vm402_vm3, %v603_v52, %v4613_v42  ;;  %v1197_v13 = vsel %vm402_vm3, %v604_v63, %v4614_v24  ;;  %v1329_v49 = vpack.c.bf16 %v6841_v47, %v6836_v32  ;;  %v6897_v16 = vpop.permute.xlu0 %4631  ;;  %v4926_v47 = vld [vmem:[%s8123_s5 + $0x20] sm:$0xff]  }
 0x256   :  { %2217 = vmatprep.mubr.bf16.mxu0 %v1326_v15  ;;  %2434 = vmatmul.mubr.bf16.gmra.mrb[4].mxu1 %v1321_v20  ;;  %v1282_v40 = vsel %vm1275_vm13, %v4618_v3, %v8208_v8  ;;  %v8278_v25 = vunpack.i.h.bf16 %v6859_v1  ;;  %v8279_v20 = vunpack.i.l.bf16 %v6366_v48  ;;  %v8280_v24 = vmax.f32 %v6648_v36, %v6722_v44  ;;  %v4929_v52 = vld [vmem:[%s8121_s3 + $0x344] ss:$8 sps:$4 sm:$0xff]  }
 0x257   :  { %2443 = vmatprep.mubr.bf16.mxu1 %v1330_v10  ;;  %v4627_v10 = vpop.permute.xlu1 %4626  ;;  %2509 = vmatpush1.bf16.msra.mxu1 %v4919_v7  ;;  %v8281_v15 = vunpack.i.h.bf16 %v6366_v48  ;;  %v3525_v36 = vmax.f32 %v6614_v22, %v6796_v29  ;;  %v6913_v44 = vsel %vm3113_vm8, %v3171_v31, %v3172_v35  ;;  %v3291_v48 = vmax.f32 %v6763_v9, %v6844_v4  ;;  %v605_v9 = vld [vmem:[#allocation2 + $0x60] sm:$0xff]  ;;  %v606_v4 = vld [vmem:[#allocation2 + $0x70] sm:$0xff] }
 0x258   :  { %v1283_v0 = vsel %vm1275_vm13, %v4619_v12, %v8278_v25  ;;  %v6889_v42 = vsel %vm1258_vm11, %v8279_v20, %v4618_v3  ;;  %v6895_v32 = vmax.f32 %v8280_v24, %v6790_v2  ;;  %3729 = vmatpush1.bf16.msra.mxu0 %v4922_v11  ;;  %v4923_v25 = vld [vmem:[%s8121_s3 + $0x330] ss:$8 sps:$4 sm:$0xff]   ;;  %v4629_v2 = vunpack.i.h.bf16 %v4627_v10  ;;  %2510 = vmatprep.subr.bf16.mxu1 %v4925_v18 }
 0x259   :  { %v6908_v3 = vsel %vm1258_vm11, %v8281_v15, %v4619_v12  ;;  %v4628_v7 = vunpack.i.l.bf16 %v4627_v10  ;;  %v1325_v11 = vpack.c.bf16 %v1197_v13, %v1196_v23  ;;  %3730 = vmatprep.subr.bf16.mxu0 %v8269_v19  ;;  %v1338_v12 = vpack.c.bf16 %v1283_v0, %v1282_v40  ;;  %v4927_v10 = vld [vmem:[%s8121_s3 + $0x340] ss:$8 sps:$4 sm:$0xff]  }
 0x25a   :  { %v1337_v63 = vpack.c.bf16 %v6908_v3, %v6889_v42  ;;  %v3368_v31 = vsel %vm3314_vm10, %v3366_v5, %v3367_v53  ;;  %v3372_v35 = vrot.slane %v6813_v56, 2  ;;  %v4634_v23 = vunpack.i.h.bf16 %v6897_v16  ;;  %v6935_v53 = vpop.permute.xlu0 %4641 }
 0x25b   :  { %v4633_v18 = vunpack.i.l.bf16 %v6897_v16  ;;  %2218 = vmatmul.mubr.bf16.gmra.mrb[40].mxu0 %v1325_v11  ;;  %v8282_v13 = vunpack.i.l.bf16 %v6400_v38  ;;  %v8283_v24 = vunpack.i.h.bf16 %v6400_v38  ;;  %v6933_v40 = vpop.permute.xlu1 %4636  ;;  %2511 = vmatpush1.bf16.msra.mxu1 %v4923_v25  ;;  %v1198_v16 = vsel %vm402_vm3, %v605_v9, %v4628_v7  ;;  %v4933_v38 = vld [vmem:[%s8123_s5 + $0x28] sm:$0xff]  }
 0x25c   :  { %3731 = vmatpush1.bf16.msra.mxu0 %v4926_v47  ;;  %v1199_v15 = vsel %vm402_vm3, %v606_v4, %v4629_v2  ;;  %v3373_v11 = vrot.slane %v6831_v46, 2  ;;  %v8209_v25 = vunpack.i.h.bf16 %v6935_v53  ;;  %v4643_v47 = vunpack.i.l.bf16 %v6935_v53  ;;  %2512 = vmatprep.subr.bf16.mxu1 %v4929_v52 }
 0x25d   :  { %v1215_v20 = vsel %vm1208_vm12, %v4628_v7, %v8282_v13  ;;  %v1216_v0 = vsel %vm1208_vm12, %v4629_v2, %v8283_v24  ;;  %v8206_v13 = vunpack.i.h.bf16 %v6933_v40  ;;  %3732 = vmatprep.subr.bf16.mxu0 %v8269_v19  ;;  %v4932_v2 = vld [vmem:[%s8121_s3 + $0x354] ss:$8 sps:$4 sm:$0xff]   ;;  %v8284_v46 = vmax.f32 %v6578_v59, %v6614_v22 }
 0x25e   :  { %v1334_v5 = vpack.c.bf16 %v1216_v0, %v1215_v20  ;;  %v8207_v20 = vunpack.i.l.bf16 %v6933_v40  ;;  %2444 = vmatmul.mubr.bf16.gmra.mrb[8].mxu1 %v1329_v49  ;;  %v3293_v24 = vmax.f32 %v6813_v56, %v6913_v44  ;;  %v6962_v0 = vmax.f32 %v3291_v48, %v3368_v31  ;;  %v6984_v48 = vld [vmem:[#allocation3 + $0x100] sm:$0xff]  ;;  %v6988_v31 = vpop.permute.xlu0 %4651 }
 0x25f   :  { %v6958_v7 = vmax.f32 %v8284_v46, %v6796_v29  ;;  %2453 = vmatprep.mubr.bf16.mxu1 %v1338_v12  ;;  %v8285_v52 = vunpack.i.l.bf16 %v6468_v6  ;;  %v8286_v49 = vunpack.i.h.bf16 %v6468_v6  ;;  %v8287_v22 = vunpack.i.l.bf16 %v6435_v33  ;;  %v6986_v12 = vpop.permute.xlu1 %4646  ;;  %8289 = vst [vmem:[#allocation36_spill] sm:$0xff] %v6988_v31  ;;  %2513 = vmatpush1.bf16.msra.mxu1 %v4927_v10 }
 0x260   :  { %2227 = vmatprep.mubr.bf16.mxu0 %v1334_v5  ;;  %v8288_v56 = vunpack.i.h.bf16 %v6435_v33  ;;  %v1333_v6 = vpack.c.bf16 %v1199_v15, %v1198_v16  ;;  %v4930_v5 = vld [vmem:[%s8121_s3 + $0x350] ss:$8 sps:$4 sm:$0xff]   ;;  %3733 = vmatpush1.bf16.msra.mxu0 %v4933_v38  ;;  %v6994_v46 = vmax.f32 %v3525_v36, %v6895_v32  ;;  %v3374_v33 = vsel %vm3314_vm10, %v3372_v35, %v3373_v11  ;;  %v4936_v36 = vld [vmem:[%s8121_s3 + $0x364] ss:$8 sps:$4 sm:$0xff]  }
 0x261   :  { %v1217_v9 = vsel %vm1208_vm12, %v4643_v47, %v8285_v52  ;;  %v1218_v59 = vsel %vm1208_vm12, %v8209_v25, %v8286_v49  ;;  %v6977_v4 = vsel %vm1258_vm11, %v8287_v22, %v4633_v18  ;;  %v6997_v52 = vld [vmem:[#allocation3 + $0x110] sm:$0x3]  ;;  %v4649_v49 = vunpack.i.h.bf16 %v6986_v12  ;;  %2514 = vmatprep.subr.bf16.mxu1 %v4932_v2  ;;  %3734 = vmatprep.subr.bf16.mxu0 %v8269_v19 }
 0x262   :  { %v6982_v44 = vsel %vm1258_vm11, %v8288_v56, %v4634_v23  ;;  %v4648_v22 = vunpack.i.l.bf16 %v6986_v12  ;;  %v1284_v10 = vsel %vm1275_vm13, %v4633_v18, %v8207_v20  ;;  %v1285_v16 = vsel %vm1275_vm13, %v4634_v23, %v8206_v13  ;;  %v4937_v35 = vld [vmem:[%s8123_s5 + $0x30] sm:$0xff]   ;;  %v607_v23 = vld [vmem:[#allocation2 + $0xa0] sm:$0xff]  ;;  %v7035_v18 = vpop.permute.xlu0 %4661 }
 0x263   :  { %v1342_v15 = vpack.c.bf16 %v1218_v59, %v1217_v9  ;;  %v3162_v11 = vrot.slane %v6984_v48, 1  ;;  %2228 = vmatmul.mubr.bf16.gmra.mrb[44].mxu0 %v1333_v6  ;;  %v8290_v2 = vunpack.i.l.bf16 %v6502_v26  ;;  %v7024_v12 = vmax.f32 %v3293_v24, %v3374_v33  ;;  %v7028_v59 = vld [vmem:[#allocation3 + $0x120] sm:$0xff]  ;;  %v7033_v6 = vpop.permute.xlu1 %4656  ;;  %2515 = vmatpush1.bf16.msra.mxu1 %v4930_v5  ;;  %v7045_v38 = vld [vmem:[#allocation3 + $0x130] sm:$0x3] }
 0x264   :  { %v3163_v13 = vrot.slane %v6997_v52, 1  ;;  %v4934_v24 = vld [vmem:[%s8121_s3 + $0x360] ss:$8 sps:$4 sm:$0xff]   ;;  %v8291_v33 = vunpack.i.h.bf16 %v6502_v26  ;;  %v4659_v20 = vunpack.i.h.bf16 %v7033_v6  ;;  %v4658_v8 = vunpack.i.l.bf16 %v7033_v6  ;;  %2516 = vmatprep.subr.bf16.mxu1 %v4936_v36  ;;  %v608_v5 = vld [vmem:[#allocation2 + $0xb0] sm:$0xff]  ;;  %3735 = vmatpush1.bf16.msra.mxu0 %v4937_v35 }
 0x265   :  { %v7022_v56 = vsel %vm1258_vm11, %v8290_v2, %v4648_v22  ;;  %2237 = vmatprep.mubr.bf16.mxu0 %v1342_v15  ;;  %v1346_v2 = vpack.c.bf16 %v1285_v16, %v1284_v10  ;;  %v8212_v10 = vunpack.i.l.bf16 %v7035_v18  ;;  %v4940_v26 = vld [vmem:[%s8121_s3 + $0x374] ss:$8 sps:$4 sm:$0xff]   ;;  %v1200_v15 = vsel %vm402_vm3, %v607_v23, %v4643_v47  ;;  %3736 = vmatprep.subr.bf16.mxu0 %v8269_v19 }
 0x266   :  { %v7043_v9 = vsel %vm1258_vm11, %v8291_v33, %v4649_v49  ;;  %v4941_v16 = vld [vmem:[%s8123_s5 + $0x38] sm:$0xff]   ;;  %2454 = vmatmul.mubr.bf16.gmra.mrb[12].mxu1 %v1337_v63  ;;  %v8292_v36 = vunpack.i.h.bf16 %v6935_v53  ;;  %v3168_v33 = vrot.slane %v7028_v59, 1  ;;  %v8293_v25 = vunpack.i.l.bf16 %v6534_v60 }
 0x267   :  { %2463 = vmatprep.mubr.bf16.mxu1 %v1346_v2  ;;  %v8294_v3 = vunpack.i.h.bf16 %v6534_v60  ;;  %v7077_v53 = vsel %vm3113_vm8, %v3162_v11, %v3163_v13  ;;  %v3169_v47 = vrot.slane %v7045_v38, 1  ;;  %v7080_v23 = vpop.permute.xlu1 %4666  ;;  %2517 = vmatpush1.bf16.msra.mxu1 %v4934_v24  ;;  %v4938_v2 = vld [vmem:[%s8121_s3 + $0x370] ss:$8 sps:$4 sm:$0xff]   ;;  %v8296_v60 = vunpack.i.l.bf16 %v6566_v17 }
 0x268   :  { %v1201_v35 = vsel %vm402_vm3, %v608_v5, %v8292_v36  ;;  %v1219_v42 = vsel %vm1208_vm12, %v4658_v8, %v8293_v25  ;;  %8295 = vst [vmem:[#allocation37_spill] sm:$0xff] %v7080_v23  ;;  %v7082_v5 = vpop.permute.xlu0 %4671  ;;  %v8297_v13 = vunpack.i.h.bf16 %v7035_v18  ;;  %v8298_v11 = vunpack.i.h.bf16 %v6566_v17  ;;  %2518 = vmatprep.subr.bf16.mxu1 %v4940_v26  ;;  %3737 = vmatpush1.bf16.msra.mxu0 %v4941_v16  ;;  %v4944_v17 = vld [vmem:[%s8121_s3 + $0x384] ss:$8 sps:$4 sm:$0xff]  }
 0x269   :  { %v1220_v63 = vsel %vm1208_vm12, %v4659_v20, %v8294_v3  ;;  %v7092_v25 = vsel %vm1258_vm11, %v8296_v60, %v8212_v10  ;;  %v3363_v24 = vrot.slane %v6984_v48, 2  ;;  %v3364_v3 = vrot.slane %v6997_v52, 2  ;;  %3738 = vmatprep.subr.bf16.mxu0 %v8269_v19 }
 0x26a   :  { %v7099_v36 = vsel %vm1258_vm11, %v8298_v11, %v8297_v13  ;;  %v1341_v6 = vpack.c.bf16 %v1201_v35, %v1200_v15  ;;  %v8299_v37 = vunpack.i.l.bf16 %v6988_v31  ;;  %v8300_v60 = vunpack.i.h.bf16 %v6988_v31  ;;  %v4948_v13 = vld [vmem:[%s8123_s5 + $0x40] sm:$0xff]  }
 0x26b   :  { %v4674_v52 = vunpack.i.h.bf16 %v7082_v5  ;;  %v4673_v26 = vunpack.i.l.bf16 %v7082_v5  ;;  %v1350_v15 = vpack.c.bf16 %v1220_v63, %v1219_v42  ;;  %v7123_v16 = vsel %vm3113_vm8, %v3168_v33, %v3169_v47  ;;  %v7127_v11 = vpop.permute.xlu1 %4676  ;;  %2519 = vmatpush1.bf16.msra.mxu1 %v4938_v2  ;;  %v4942_v63 = vld [vmem:[%s8121_s3 + $0x380] ss:$8 sps:$4 sm:$0xff]   ;;  %v4947_v2 = vld [vmem:[%s8121_s3 + $0x394] ss:$8 sps:$4 sm:$0xff]  }
 0x26c   :  { %v1286_v27 = vsel %vm1275_vm13, %v4648_v22, %v8299_v37  ;;  %v1287_v10 = vsel %vm1275_vm13, %v4649_v49, %v8300_v60  ;;  %v8213_v22 = vunpack.i.l.bf16 %v7080_v23  ;;  %2238 = vmatmul.mubr.bf16.gmra.mrb[48].mxu0 %v1341_v6  ;;  %v3290_v35 = vmax.f32 %v6984_v48, %v7077_v53  ;;  %v7129_v60 = vpop.permute.xlu0 %4681  ;;  %v609_v37 = vld [vmem:[#allocation2 + $0xc0] sm:$0xff]  ;;  %v610_v49 = vld [vmem:[#allocation2 + $0xd0] sm:$0xff]  ;;  %2520 = vmatprep.subr.bf16.mxu1 %v4944_v17 }
 0x26d   :  { %8301 = vst [vmem:[#allocation38_spill] sm:$0xff] %v7129_v60  ;;  %2247 = vmatprep.mubr.bf16.mxu0 %v1350_v15  ;;  %v1354_v42 = vpack.c.bf16 %v1287_v10, %v1286_v27  ;;  %v3365_v6 = vsel %vm3314_vm10, %v3363_v24, %v3364_v3  ;;  %v3369_v33 = vrot.slane %v7028_v59, 2  ;;  %v3370_v47 = vrot.slane %v7045_v38, 2  ;;  %3739 = vmatpush1.bf16.msra.mxu0 %v4948_v13  ;;  %v4952_v24 = vld [vmem:[%s8123_s5 + $0x48] sm:$0xff]  }
 0x26e   :  { %v8215_v48 = vunpack.i.h.bf16 %v7127_v11  ;;  %v8214_v53 = vunpack.i.l.bf16 %v7127_v11  ;;  %v1202_v27 = vsel %vm402_vm3, %v609_v37, %v4658_v8  ;;  %v1203_v10 = vsel %vm402_vm3, %v610_v49, %v4659_v20  ;;  %3740 = vmatprep.subr.bf16.mxu0 %v8269_v19  ;;  %v4949_v5 = vld [vmem:[%s8121_s3 + $0x3a0] ss:$8 sps:$4 sm:$0xff]  }
 0x26f   :  { %v8302_v38 = vpack.c.bf16 %v6982_v44, %v6977_v4  ;;  %v8303_v3 = vunpack.i.l.bf16 %v6593_v34  ;;  %v8304_v20 = vunpack.i.h.bf16 %v6593_v34  ;;  %v8305_v13 = vmax.f32 %v6644_v28, %v6670_v30  ;;  %v7165_v4 = vld [vmem:[#allocation3 + $0x148] sm:$0xff]  ;;  %2521 = vmatpush1.bf16.msra.mxu1 %v4942_v63 }
 0x270   :  { %v8306_v44 = vunpack.i.l.bf16 %v7035_v18  ;;  %v8307_v37 = vunpack.i.h.bf16 %v7080_v23  ;;  %v8308_v49 = vunpack.i.h.bf16 %v7035_v18  ;;  %v8309_v28 = vunpack.i.l.bf16 %v6635_v21  ;;  %v4945_v18 = vld [vmem:[%s8121_s3 + $0x390] ss:$8 sps:$4 sm:$0xff]   ;;  %2522 = vmatprep.subr.bf16.mxu1 %v4947_v2 }
 0x271   :  { %2464 = vmatmul.mubr.bf16.gmra.mrb[16].mxu1 %v8302_v38  ;;  %v1221_v8 = vsel %vm1208_vm12, %v4673_v26, %v8303_v3  ;;  %v1222_v17 = vsel %vm1208_vm12, %v4674_v52, %v8304_v20  ;;  %v7163_v15 = vmax.f32 %v8305_v13, %v6962_v0  ;;  %v7186_v20 = vpop.permute.xlu1 %4686  ;;  %v4692_v13 = vpop.permute.xlu0 %4691  ;;  %3741 = vmatpush1.bf16.msra.mxu0 %v4952_v24  ;;  %v8315_v2 = vunpack.i.l.bf16 %v6672_v61  ;;  %v7286_v23 = vld [vmem:[#allocation3 + $0x1b8] sm:$0x3] }
 0x272   :  { %2473 = vmatprep.mubr.bf16.mxu1 %v1354_v42  ;;  %v1288_v34 = vsel %vm1275_vm13, %v8306_v44, %v8213_v22  ;;  %v1289_v38 = vsel %vm1275_vm13, %v8308_v49, %v8307_v37  ;;  %v7182_v3 = vsel %vm1258_vm11, %v8309_v28, %v8214_v53  ;;  %v1349_v44 = vpack.c.bf16 %v1203_v10, %v1202_v27  ;;  %v611_v37 = vld [vmem:[#allocation2 + $0xe0] sm:$0xff] }
 0x273   :  { %v8310_v49 = vunpack.i.h.bf16 %v6635_v21  ;;  %v7199_v22 = vsel %vm3314_vm10, %v3369_v33, %v3370_v47  ;;  %v7201_v42 = vmax.f32 %v3290_v35, %v3365_v6  ;;  %v4694_v53 = vunpack.i.h.bf16 %v4692_v13  ;;  %v4951_v10 = vld [vmem:[%s8121_s3 + $0x3a4] ss:$8 sps:$4 sm:$0xff]   ;;  %v4956_v21 = vld [vmem:[%s8123_s5 + $0x50] sm:$0xff]   ;;  %3742 = vmatprep.subr.bf16.mxu0 %v8269_v19  ;;  %2523 = vmatpush1.bf16.msra.mxu1 %v4945_v18  ;;  %v4963_v18 = vld [vmem:[%s8123_s5 + $0x58] sm:$0xff]  }
 0x274   :  { %v4693_v27 = vunpack.i.l.bf16 %v4692_v13  ;;  %v1358_v63 = vpack.c.bf16 %v1222_v17, %v1221_v8  ;;  %v8216_v35 = vunpack.i.l.bf16 %v7186_v20  ;;  %v1362_v6 = vpack.c.bf16 %v1289_v38, %v1288_v34  ;;  %v612_v47 = vld [vmem:[#allocation2 + $0xf0] sm:$0xff]  ;;  %2248 = vmatmul.mubr.bf16.gmra.mrb[52].mxu0 %v1349_v44  ;;  %v7231_v34 = vld [vmem:[#allocation3 + $0x168] sm:$0xff]  ;;  %v7233_v38 = vld [vmem:[#allocation3 + $0x178] sm:$0x3]  ;;  %2524 = vmatprep.subr.bf16.mxu1 %v4951_v10 }
 0x275   :  { %v7196_v28 = vsel %vm1258_vm11, %v8310_v49, %v8215_v48  ;;  %v7209_v49 = vld [vmem:[#allocation3 + $0x158] sm:$0x3]  ;;  %v1204_v8 = vsel %vm402_vm3, %v611_v37, %v4673_v26  ;;  %v8311_v17 = vunpack.i.h.bf16 %v6713_v45  ;;  %v8312_v33 = vunpack.i.l.bf16 %v6713_v45  ;;  %v4697_v45 = vpop.permute.xlu1 %4696  ;;  %v4955_v37 = vld [vmem:[%s8121_s3 + $0x3b4] ss:$8 sps:$4 sm:$0xff]   ;;  %3743 = vmatpush1.bf16.msra.mxu0 %v4956_v21 }
 0x276   :  { %v1205_v26 = vsel %vm402_vm3, %v612_v47, %v4674_v52  ;;  %2257 = vmatprep.mubr.bf16.mxu0 %v1358_v63  ;;  %v3178_v52 = vrot.slane %v7209_v49, 1  ;;  %v4699_v44 = vunpack.i.h.bf16 %v4697_v45  ;;  %v8314_v63 = vpack.c.bf16 %v7043_v9, %v7022_v56  ;;  %3744 = vmatprep.subr.bf16.mxu0 %v8269_v19  ;;  %v7260_v21 = vld [vmem:[#allocation3 + $0x198] sm:$0x3] }
 0x277   :  { %v7221_v13 = vsel %vm1292_vm14, %v8311_v17, %v4694_v53  ;;  %v7226_v48 = vsel %vm1292_vm14, %v8312_v33, %v4693_v27  ;;  %v4702_v17 = vpop.permute.xlu0 %4701  ;;  %v4698_v27 = vunpack.i.l.bf16 %v4697_v45  ;;  %v1357_v53 = vpack.c.bf16 %v1205_v26, %v1204_v8  ;;  %v7258_v45 = vld [vmem:[#allocation3 + $0x188] sm:$0xff]  ;;  %2525 = vmatpush1.bf16.msra.mxu1 %v4949_v5 }
 0x278   :  { %8313 = vst [vmem:[#allocation39_spill] sm:$0xff] %v7226_v48  ;;  %v4704_v33 = vunpack.i.h.bf16 %v4702_v17  ;;  %v4703_v47 = vunpack.i.l.bf16 %v4702_v17  ;;  %v1223_v10 = vsel %vm1208_vm12, %v8216_v35, %v8315_v2  ;;  %v3183_v17 = vrot.slane %v7231_v34, 1  ;;  %2526 = vmatprep.subr.bf16.mxu1 %v4955_v37 }
 0x279   :  { %2474 = vmatmul.mubr.bf16.gmra.mrb[20].mxu1 %v8314_v63  ;;  %v3184_v24 = vrot.slane %v7233_v38, 1  ;;  %v8316_v56 = vunpack.i.h.bf16 %v6672_v61  ;;  %v8317_v9 = vunpack.i.h.bf16 %v7186_v20  ;;  %v8318_v26 = vunpack.i.l.bf16 %v6742_v54  ;;  %v7284_v61 = vld [vmem:[#allocation3 + $0x1a8] sm:$0xff]  ;;  %3745 = vmatpush1.bf16.msra.mxu0 %v4963_v18 }
 0x27a   :  { %2483 = vmatprep.mubr.bf16.mxu1 %v1362_v6  ;;  %v8319_v19 = vunpack.i.h.bf16 %v6742_v54  ;;  %v8320_v35 = vunpack.i.l.bf16 %v6815_v14  ;;  %v8321_v54 = vunpack.i.l.bf16 %v7129_v60  ;;  %v8325_v5 = vunpack.i.h.bf16 %v6815_v14 }
 0x27b   :  { %v1224_v8 = vsel %vm1208_vm12, %v8317_v9, %v8316_v56  ;;  %v7272_v2 = vsel %vm1292_vm14, %v8318_v26, %v4698_v27  ;;  %v4707_v56 = vpop.permute.xlu1 %4706  ;;  %v4953_v27 = vld [vmem:[%s8121_s3 + $0x3b0] ss:$8 sps:$4 sm:$0xff]   ;;  %v8323_v26 = vunpack.i.h.bf16 %v7129_v60  ;;  %v3195_v14 = vrot.slane %v7284_v61, 1 }
 0x27c   :  { %v7277_v63 = vsel %vm1292_vm14, %v8319_v19, %v4699_v44  ;;  %v7282_v6 = vsel %vm1292_vm14, %v8320_v35, %v4703_v47  ;;  %v8322_v44 = vunpack.i.l.bf16 %v7127_v11  ;;  %v8324_v35 = vunpack.i.h.bf16 %v7127_v11  ;;  %2258 = vmatmul.mubr.bf16.gmra.mrb[56].mxu0 %v1357_v53  ;;  %2527 = vmatpush1.bf16.msra.mxu1 %v4953_v27  ;;  %v4957_v53 = vld [vmem:[%s8121_s3 + $0x3c0] ss:$8 sps:$4 sm:$0xff]   ;;  %v614_v60 = vld [vmem:[#allocation2 + $0x110] sm:$0xff] }
 0x27d   :  { %v7306_v31 = vsel %vm1292_vm14, %v8325_v5, %v4704_v33  ;;  %v4709_v50 = vunpack.i.h.bf16 %v4707_v56  ;;  %v4708_v48 = vunpack.i.l.bf16 %v4707_v56  ;;  %v3189_v11 = vrot.slane %v7258_v45, 1  ;;  %v613_v56 = vld [vmem:[#allocation2 + $0x100] sm:$0xff] }
 0x27e   :  { %v1290_v9 = vsel %vm1275_vm13, %v8322_v44, %v8321_v54  ;;  %v1291_v47 = vsel %vm1275_vm13, %v8324_v35, %v8323_v26  ;;  %v4959_v54 = vld [vmem:[%s8121_s3 + $0x3c4] ss:$8 sps:$4 sm:$0xff]   ;;  %v3190_v44 = vrot.slane %v7260_v21, 1  ;;  %v1366_v26 = vpack.c.bf16 %v1224_v8, %v1223_v10 }
 0x27f   :  { %v3196_v33 = vrot.slane %v7286_v23, 1  ;;  %v8326_v37 = vunpack.i.l.bf16 %v6859_v1  ;;  %v8327_v18 = vunpack.i.h.bf16 %v6859_v1  ;;  %v8328_v10 = vrot.slane %v7165_v4, 1  ;;  %2528 = vmatprep.subr.bf16.mxu1 %v4959_v54 }
 0x280   :  { %v3185_v35 = vsel %vm3113_vm8, %v3183_v17, %v3184_v24  ;;  %2267 = vmatprep.mubr.bf16.mxu0 %v1366_v26  ;;  %v3378_v1 = vrot.slane %v7165_v4, 2  ;;  %v8329_v24 = vunpack.i.l.bf16 %v7186_v20  ;;  %v8330_v17 = vunpack.i.h.bf16 %v7186_v20  ;;  %v4962_v26 = vld [vmem:[%s8121_s3 + $0x3d4] ss:$8 sps:$4 sm:$0xff]   ;;  %2529 = vmatpush1.bf16.msra.mxu1 %v4957_v53  ;;  %v4712_v53 = vpop.permute.xlu0 %4711 }
 0x281   :  { %v7320_v5 = vsel %vm1292_vm14, %v8326_v37, %v4708_v48  ;;  %v7325_v19 = vsel %vm1292_vm14, %v8327_v18, %v4709_v50  ;;  %v3179_v8 = vsel %vm3113_vm8, %v8328_v10, %v3178_v52  ;;  %v3379_v50 = vrot.slane %v7209_v49, 2  ;;  %2530 = vmatprep.subr.bf16.mxu1 %v4962_v26 }
 0x282   :  { %v1339_v48 = vpack.c.bf16 %v7325_v19, %v7320_v5  ;;  %v3384_v37 = vrot.slane %v7231_v34, 2  ;;  %v1370_v18 = vpack.c.bf16 %v1291_v47, %v1290_v9  ;;  %v1206_v52 = vsel %vm402_vm3, %v613_v56, %v8329_v24 }
 0x283   :  { %v1207_v27 = vsel %vm402_vm3, %v614_v60, %v8330_v17  ;;  %v3191_v10 = vsel %vm3113_vm8, %v3189_v11, %v3190_v44  ;;  %v8331_v49 = vpack.c.bf16 %v7099_v36, %v7092_v25  ;;  %v3197_v9 = vsel %vm3113_vm8, %v3195_v14, %v3196_v33  ;;  %v7360_v44 = vld [vmem:[#allocation3 + $0x140] sm:$0xff]  ;;  %v7362_v25 = vld [vmem:[#allocation3 + $0x150] sm:$0x3] }
 0x284   :  { %v3385_v47 = vrot.slane %v7233_v38, 2  ;;  %v3390_v54 = vrot.slane %v7258_v45, 2  ;;  %v3391_v20 = vrot.slane %v7260_v21, 2  ;;  %v3295_v60 = vmax.f32 %v7165_v4, %v3179_v8  ;;  %v4960_v36 = vld [vmem:[%s8121_s3 + $0x3d0] ss:$8 sps:$4 sm:$0xff]  }
 0x285   :  { %2484 = vmatmul.mubr.bf16.gmra.mrb[24].mxu1 %v8331_v49  ;;  %v3297_v56 = vmax.f32 %v7231_v34, %v3185_v35  ;;  %v3396_v24 = vrot.slane %v7284_v61, 2  ;;  %v3397_v11 = vrot.slane %v7286_v23, 2  ;;  %v8332_v38 = vmax.f32 %v6670_v30, %v6962_v0  ;;  %v4966_v14 = vld [vmem:[%s8121_s3 + $0x3e4] ss:$8 sps:$4 sm:$0xff]   ;;  %v7389_v8 = vld [vmem:[#allocation3 + $0x170] sm:$0x3] }
 0x286   :  { %2493 = vmatprep.mubr.bf16.mxu1 %v1370_v18  ;;  %v3527_v34 = vmax.f32 %v6796_v29, %v6895_v32  ;;  %v3380_v23 = vsel %vm3314_vm10, %v3378_v1, %v3379_v50  ;;  %v3386_v21 = vsel %vm3314_vm10, %v3384_v37, %v3385_v47  ;;  %v1365_v35 = vpack.c.bf16 %v1207_v27, %v1206_v52  ;;  %v7393_v37 = vld [vmem:[#allocation3 + $0x180] sm:$0xff]  ;;  %v7395_v18 = vld [vmem:[#allocation3 + $0x190] sm:$0x3] }
 0x287   :  { %v7371_v4 = vmax.f32 %v8332_v38, %v7024_v12  ;;  %v8333_v33 = vmax.f32 %v7028_v59, %v7123_v16  ;;  %v3529_v0 = vmax.f32 %v6895_v32, %v7201_v42  ;;  %v3299_v29 = vmax.f32 %v7258_v45, %v3191_v10  ;;  %v7387_v12 = vld [vmem:[#allocation3 + $0x160] sm:$0xff]  ;;  %2531 = vmatpush1.bf16.msra.mxu1 %v4960_v36 }
 0x288   :  { %v3301_v1 = vmax.f32 %v7284_v61, %v3197_v9  ;;  %v3392_v50 = vsel %vm3314_vm10, %v3390_v54, %v3391_v20  ;;  %v3174_v59 = vrot.slane %v7360_v44, 1  ;;  %2268 = vmatmul.mubr.bf16.gmra.mrb[60].mxu0 %v1365_v35  ;;  %v3583_v32 = vpack.c.bf16 %v6994_v46, %v6958_v7  ;;  %v4964_v61 = vld [vmem:[%s8121_s3 + $0x3e0] ss:$8 sps:$4 sm:$0xff]   ;;  %2532 = vmatprep.subr.bf16.mxu1 %v4966_v14  ;;  %v7424_v20 = vld [vmem:[#allocation3 + $0x1b0] sm:$0x3] }
 0x289   :  { %v3493_v30 = vmax.f32 %v8333_v33, %v7199_v22  ;;  %v3175_v22 = vrot.slane %v7362_v25, 1  ;;  %v3398_v16 = vsel %vm3314_vm10, %v3396_v24, %v3397_v11  ;;  %v7402_v45 = vmax.f32 %v3295_v60, %v3380_v23  ;;  %v7418_v10 = vld [vmem:[#allocation3 + $0x1a0] sm:$0xff]  ;;  %v3012_v14 = vld [vmem:[#allocation3 + $0x1d8] sm:$0x3] }
 0x28a   :  { %v7404_v52 = vmax.f32 %v3297_v56, %v3386_v21  ;;  %v8334_v17 = vpack.c.bf16 %v6450_v43, %v6382_v58  ;;  %v3586_v27 = vpack.c.bf16 %v7371_v4, %v7163_v15  ;;  %v7416_v26 = vmax.f32 %v3527_v34, %v7201_v42 }
 0x28b   :  { %v3180_v49 = vrot.slane %v7387_v12, 1  ;;  %v3181_v9 = vrot.slane %v7389_v8, 1  ;;  %v4713_v47 = vunpack.i.l.bf16 %v4712_v53  ;;  %v7422_v54 = vmax.f32 %v3299_v29, %v3392_v50  ;;  %2533 = vmatpush1.bf16.msra.mxu1 %v4964_v61 }
 0x28c   :  { %4302 = vmatprep.mubr.msk.bf16.mxu0 %vm232_vm0, %v8334_v17  ;;  %v3186_v58 = vrot.slane %v7393_v37, 1  ;;  %v3187_v43 = vrot.slane %v7395_v18, 1  ;;  %v4714_v60 = vunpack.i.h.bf16 %v4712_v53  ;;  %v8335_v42 = vpack.c.bf16 %v7196_v28, %v7182_v3  ;;  %v7445_v28 = vld [vmem:[#allocation3 + $0x1c8] sm:$0xff] }
 0x28d   :  { %v7431_v56 = vmax.f32 %v3529_v0, %v3493_v30  ;;  %v7433_v24 = vmax.f32 %v3301_v1, %v3398_v16  ;;  %v3176_v11 = vsel %vm3113_vm8, %v3174_v59, %v3175_v22  ;;  %v8336_v36 = vpack.c.bf16 %v6203_v62, %v6216_v55  ;;  %v7460_v53 = vld [vmem:[#allocation3 + $0x1e8] sm:$0xff]  ;;  %v3016_v1 = vld [vmem:[#allocation3 + $0x1f8] sm:$0x3] }
 0x28e   :  { %2494 = vmatmul.mubr.bf16.gmra.mrb[28].mxu1 %v8335_v42  ;;  %v3532_v38 = vmax.f32 %v7402_v45, %v7404_v52  ;;  %v3192_v34 = vrot.slane %v7418_v10, 1  ;;  %v3375_v23 = vrot.slane %v7360_v44, 2  ;;  %v3376_v3 = vrot.slane %v7362_v25, 2  ;;  %v8341_v42 = vld [vmem:[#allocation39_spill] sm:$0xff] }
 0x28f   :  { %4281 = vmatprep.mubr.msk.bf16.mxu1 %vm402_vm3, %v8336_v36  ;;  %v3182_v21 = vsel %vm3113_vm8, %v3180_v49, %v3181_v9  ;;  %v3193_v35 = vrot.slane %v7424_v20, 1  ;;  %v3381_v62 = vrot.slane %v7387_v12, 2  ;;  %v3382_v55 = vrot.slane %v7389_v8, 2 }
 0x290   :  { %v3534_v33 = vmax.f32 %v7404_v52, %v7422_v54  ;;  %v3188_v30 = vsel %vm3113_vm8, %v3186_v58, %v3187_v43  ;;  %v3294_v0 = vmax.f32 %v7360_v44, %v3176_v11  ;;  %v8337_v25 = vunpack.i.l.bf16 %v6933_v40  ;;  %v7487_v43 = vld [vmem:[#allocation3 + $0x1c0] sm:$0xff] }
 0x291   :  { %v3387_v50 = vrot.slane %v7393_v37, 2  ;;  %v3388_v8 = vrot.slane %v7395_v18, 2  ;;  %v8338_v59 = vunpack.i.h.bf16 %v6933_v40  ;;  %v3201_v16 = vrot.slane %v7445_v28, 1 }
 0x292   :  { %v7458_v29 = vsel %vm1292_vm14, %v8337_v25, %v4713_v47  ;;  %v8339_v44 = vpack.c.bf16 %v6530_v51, %v6515_v57  ;;  %v3296_v45 = vmax.f32 %v7387_v12, %v3182_v21  ;;  %v3377_v52 = vsel %vm3314_vm10, %v3375_v23, %v3376_v3  ;;  %v8343_v3 = vld [vmem:[#allocation24_spill] sm:$0xff]  ;;  %v8344_v21 = vld [vmem:[#allocation26_spill] sm:$0xff] }
 0x293   :  { %v7467_v22 = vsel %vm1292_vm14, %v8338_v59, %v4714_v60  ;;  %v3202_v17 = vrot.slane %v3012_v14, 1  ;;  %v8340_v40 = vpack.c.bf16 %v6628_v41, %v6612_v39  ;;  %v3194_v18 = vsel %vm3113_vm8, %v3192_v34, %v3193_v35  ;;  %v3011_v60 = vld [vmem:[#allocation3 + $0x1d0] sm:$0x3]  ;;  %v4717_v39 = vpop.permute.xlu1 %4716  ;;  %v7489_v41 = vpop.permute.xlu0 %4721 }
 0x294   :  { %3755 = vmatmul.mubr.bf16.vlgmr.msra.gmra.mrb[64].mxu0 %v8339_v44  ;;  %v1347_v61 = vpack.c.bf16 %v7467_v22, %v7458_v29  ;;  %v3383_v49 = vsel %vm3314_vm10, %v3381_v62, %v3382_v55  ;;  %v3207_v57 = vrot.slane %v7460_v53, 1  ;;  %v3208_v51 = vrot.slane %v3016_v1, 1  ;;  %v7509_v44 = vld [vmem:[#allocation3 + $0x1e0] sm:$0xff] }
 0x295   :  { %4303 = vmatprep.mubr.msk.bf16.mxu0 %vm232_vm0, %v8340_v40  ;;  %v3298_v12 = vmax.f32 %v7393_v37, %v3188_v30  ;;  %v3203_v9 = vsel %vm3113_vm8, %v3201_v16, %v3202_v17  ;;  %v3402_v47 = vrot.slane %v7445_v28, 2  ;;  %v3403_v58 = vrot.slane %v3012_v14, 2  ;;  %v8346_v40 = vld [vmem:[#allocation33_spill] sm:$0xff] }
 0x296   :  { %v8342_v11 = vpack.c.bf16 %v7221_v13, %v8341_v42  ;;  %v3389_v36 = vsel %vm3314_vm10, %v3387_v50, %v3388_v8  ;;  %v3393_v34 = vrot.slane %v7418_v10, 2  ;;  %v3394_v37 = vrot.slane %v7424_v20, 2 }
 0x297   :  { %v3495_v23 = vmax.f32 %v3294_v0, %v3377_v52  ;;  %v8345_v35 = vpack.c.bf16 %v8343_v3, %v8344_v21  ;;  %v3497_v62 = vmax.f32 %v3296_v45, %v3383_v49  ;;  %v3209_v55 = vsel %vm3113_vm8, %v3207_v57, %v3208_v51  ;;  %v3015_v45 = vld [vmem:[#allocation3 + $0x1f0] sm:$0x3]  ;;  %v8347_v49 = vld [vmem:[#allocation32_spill] sm:$0xff] }
 0x298   :  { %2537 = vmatmul.mubr.bf16.vlgmr.msra.gmra.mrb[0].mxu1 %v8342_v11  ;;  %v3303_v14 = vmax.f32 %v7445_v28, %v3203_v9  ;;  %v3408_v13 = vrot.slane %v7460_v53, 2  ;;  %v3404_v30 = vsel %vm3314_vm10, %v3402_v47, %v3403_v58  ;;  %v3409_v25 = vrot.slane %v3016_v1, 2  ;;  %v7534_v11 = vld [vmem:[#allocation3 + $0x208] sm:$0xff] }
 0x299   :  { %4282 = vmatprep.mubr.msk.bf16.mxu1 %vm402_vm3, %v8345_v35  ;;  %v3198_v50 = vrot.slane %v7487_v43, 1  ;;  %v3199_v8 = vrot.slane %v3011_v60, 1  ;;  %v4719_v20 = vunpack.i.h.bf16 %v4717_v39  ;;  %v4718_v0 = vunpack.i.l.bf16 %v4717_v39  ;;  %v8350_v39 = vld [vmem:[#allocation34_spill] sm:$0xff] }
 0x29a   :  { %v4724_v59 = vunpack.i.h.bf16 %v7489_v41  ;;  %v3585_v16 = vpack.c.bf16 %v7431_v56, %v7416_v26  ;;  %v7512_v28 = vmax.f32 %v3532_v38, %v7422_v54  ;;  %v7515_v52 = vmax.f32 %v3534_v33, %v7433_v24  ;;  %v8349_v38 = vld [vmem:[#allocation35_spill] sm:$0xff] }
 0x29b   :  { %v3300_v1 = vmax.f32 %v7418_v10, %v3194_v18  ;;  %v7518_v17 = vmax.f32 %v3298_v12, %v3389_v36  ;;  %v8348_v57 = vpack.c.bf16 %v8346_v40, %v8347_v49  ;;  %v3395_v51 = vsel %vm3314_vm10, %v3393_v34, %v3394_v37  ;;  %v3020_v36 = vld [vmem:[#allocation3 + $0x218] sm:$0x3]  ;;  %v8352_v37 = vld [vmem:[#allocation36_spill] sm:$0xff] }
 0x29c   :  { %v3531_v9 = vmax.f32 %v3495_v23, %v3497_v62  ;;  %v3305_v47 = vmax.f32 %v7460_v53, %v3209_v55  ;;  %v7525_v58 = vmax.f32 %v3303_v14, %v3404_v30  ;;  %v8351_v42 = vpack.c.bf16 %v8349_v38, %v8350_v39 }
 0x29d   :  { %3763 = vmatmul.mubr.bf16.gmra.mrb[68].mxu0 %v8348_v57  ;;  %v3410_v10 = vsel %vm3314_vm10, %v3408_v13, %v3409_v25  ;;  %v3200_v33 = vsel %vm3113_vm8, %v3198_v50, %v3199_v8  ;;  %v3204_v18 = vrot.slane %v7509_v44, 1  ;;  %v3205_v12 = vrot.slane %v3015_v45, 1  ;;  %v7557_v25 = vld [vmem:[#allocation3 + $0x228] sm:$0xff]  ;;  %v3024_v50 = vld [vmem:[#allocation3 + $0x238] sm:$0x3]  ;;  %v8356_v8 = vld [vmem:[#allocation25_spill] sm:$0xff] }
 0x29e   :  { %4304 = vmatprep.mubr.msk.bf16.mxu0 %vm232_vm0, %v8351_v42  ;;  %v3399_v34 = vrot.slane %v7487_v43, 2  ;;  %v3400_v53 = vrot.slane %v3011_v60, 2  ;;  %v8353_v23 = vunpack.i.l.bf16 %v8352_v37  ;;  %v8354_v21 = vunpack.i.h.bf16 %v8352_v37  ;;  %v4727_v42 = vpop.permute.xlu1 %4726 }
 0x29f   :  { %v8355_v55 = vpack.c.bf16 %v7277_v63, %v7272_v2  ;;  %v7550_v14 = vmax.f32 %v3300_v1, %v3395_v51  ;;  %v3533_v13 = vmax.f32 %v3497_v62, %v7518_v17  ;;  %v3536_v60 = vmax.f32 %v7422_v54, %v7433_v24 }
 0x2a0   :  { %v7540_v3 = vsel %vm1292_vm14, %v8353_v23, %v4718_v0  ;;  %v7545_v35 = vsel %vm1292_vm14, %v8354_v21, %v4719_v20  ;;  %v8357_v20 = vld [vmem:[#allocation27_spill] sm:$0xff]  ;;  %v7563_v2 = vmax.f32 %v3305_v47, %v3410_v10  ;;  %v3538_v63 = vmax.f32 %v7433_v24, %v7525_v58 }
 0x2a1   :  { %2547 = vmatmul.mubr.bf16.gmra.mrb[4].mxu1 %v8355_v55  ;;  %v1355_v30 = vpack.c.bf16 %v7545_v35, %v7540_v3  ;;  %v8358_v0 = vpack.c.bf16 %v8356_v8, %v8357_v20  ;;  %v3213_v62 = vrot.slane %v7534_v11, 1  ;;  %v3214_v1 = vrot.slane %v3020_v36, 1  ;;  %v8361_v8 = vld [vmem:[#allocation28_spill] sm:$0xff] }
 0x2a2   :  { %v3206_v54 = vsel %vm3113_vm8, %v3204_v18, %v3205_v12  ;;  %v3302_v40 = vmax.f32 %v7487_v43, %v3200_v33  ;;  %v3405_v49 = vrot.slane %v7509_v44, 2  ;;  %v3406_v57 = vrot.slane %v3015_v45, 2 }
 0x2a3   :  { %4283 = vmatprep.mubr.msk.bf16.mxu1 %vm402_vm3, %v8358_v0  ;;  %v7572_v51 = vmax.f32 %v3531_v9, %v7518_v17  ;;  %v3401_v38 = vsel %vm3314_vm10, %v3399_v34, %v3400_v53  ;;  %v3219_v47 = vrot.slane %v7557_v25, 1  ;;  %v3220_v39 = vrot.slane %v3024_v50, 1  ;;  %v3019_v53 = vld [vmem:[#allocation3 + $0x210] sm:$0x3] }
 0x2a4   :  { %v7577_v24 = vmax.f32 %v3533_v13, %v7550_v14  ;;  %v3215_v10 = vsel %vm3113_vm8, %v3213_v62, %v3214_v1  ;;  %v3414_v18 = vrot.slane %v7534_v11, 2  ;;  %v3415_v43 = vrot.slane %v3020_v36, 2  ;;  %v8363_v62 = vld [vmem:[#allocation37_spill] sm:$0xff] }
 0x2a5   :  { %v4723_v33 = vunpack.i.l.bf16 %v7489_v41  ;;  %3771 = vmatmul.mubr.bf16.gmra.mrb[72].mxu0 %v3583_v32  ;;  %v7586_v45 = vmax.f32 %v3536_v60, %v7525_v58  ;;  %v7589_v9 = vmax.f32 %v3538_v63, %v7563_v2  ;;  %v3304_v12 = vmax.f32 %v7509_v44, %v3206_v54  ;;  %v7600_v32 = vld [vmem:[#allocation3 + $0x200] sm:$0xff] }
 0x2a6   :  { %4305 = vmatprep.mubr.msk.bf16.mxu0 %vm232_vm0, %v3586_v27  ;;  %v3407_v36 = vsel %vm3314_vm10, %v3405_v49, %v3406_v57  ;;  %v7597_v34 = vmax.f32 %v3302_v40, %v3401_v38  ;;  %v3420_v7 = vrot.slane %v7557_v25, 2  ;;  %v3421_v46 = vrot.slane %v3024_v50, 2  ;;  %v7614_v60 = vld [vmem:[#allocation3 + $0x220] sm:$0xff]  ;;  %v8360_v50 = vld [vmem:[#allocation29_spill] sm:$0xff]  ;;  %v3026_v40 = vld [vmem:[#allocation3 + $0x248] sm:$0xff] }
 0x2a7   :  { %v4729_v37 = vunpack.i.h.bf16 %v4727_v42  ;;  %v4728_v23 = vunpack.i.l.bf16 %v4727_v42  ;;  %v3221_v21 = vsel %vm3113_vm8, %v3219_v47, %v3220_v39  ;;  %v3307_v44 = vmax.f32 %v7534_v11, %v3215_v10  ;;  %v3028_v42 = vld [vmem:[#allocation3 + $0x258] sm:$0x3]  ;;  %v7649_v10 = vld [vmem:[#allocation3 + $0x268] sm:$0xff] }
 0x2a8   :  { %v8359_v15 = vpack.c.bf16 %v7306_v31, %v7282_v6  ;;  %v3588_v4 = vpack.c.bf16 %v7515_v52, %v7512_v28  ;;  %v3587_v27 = vpack.c.bf16 %v7577_v24, %v7572_v51  ;;  %v3535_v55 = vmax.f32 %v7518_v17, %v7550_v14  ;;  %v3023_v28 = vld [vmem:[#allocation3 + $0x230] sm:$0x3] }
 0x2a9   :  { %v3416_v13 = vsel %vm3314_vm10, %v3414_v18, %v3415_v43  ;;  %v8362_v11 = vpack.c.bf16 %v8360_v50, %v8361_v8  ;;  %v3590_v31 = vpack.c.bf16 %v7589_v9, %v7586_v45  ;;  %v7622_v6 = vmax.f32 %v3304_v12, %v3407_v36  ;;  %v3032_v18 = vld [vmem:[#allocation3 + $0x278] sm:$0x3]  ;;  %v3027_v50 = vld [vmem:[#allocation3 + $0x250] sm:$0x3] }
 0x2aa   :  { %2557 = vmatmul.mubr.bf16.gmra.mrb[8].mxu1 %v8359_v15  ;;  %v3210_v52 = vrot.slane %v7600_v32, 1  ;;  %v3211_v20 = vrot.slane %v3019_v53, 1  ;;  %v3537_v17 = vmax.f32 %v7550_v14, %v7597_v34  ;;  %v3309_v0 = vmax.f32 %v7557_v25, %v3221_v21  ;;  %v8366_v25 = vld [vmem:[#allocation38_spill] sm:$0xff] }
 0x2ab   :  { %4284 = vmatprep.mubr.msk.bf16.mxu1 %vm402_vm3, %v8362_v11  ;;  %v3422_v63 = vsel %vm3314_vm10, %v3420_v7, %v3421_v46  ;;  %v8364_v1 = vunpack.i.l.bf16 %v8363_v62  ;;  %v7634_v49 = vmax.f32 %v3307_v44, %v3416_v13  ;;  %v3216_v57 = vrot.slane %v7614_v60, 1 }
 0x2ac   :  { %v8365_v38 = vunpack.i.h.bf16 %v8363_v62  ;;  %v8367_v47 = vunpack.i.l.bf16 %v8366_v25  ;;  %v3217_v43 = vrot.slane %v3023_v28, 1  ;;  %v8368_v12 = vunpack.i.h.bf16 %v8366_v25 }
 0x2ad   :  { %v7632_v54 = vsel %vm1292_vm14, %v8364_v1, %v4723_v33  ;;  %v3411_v33 = vrot.slane %v7600_v32, 2  ;;  %3779 = vmatmul.mubr.bf16.gmra.mrb[76].mxu0 %v3585_v16  ;;  %v3212_v36 = vsel %vm3113_vm8, %v3210_v52, %v3211_v20  ;;  %v3412_v7 = vrot.slane %v3019_v53, 2  ;;  %v3025_v53 = vld [vmem:[#allocation3 + $0x240] sm:$0xff]  ;;  %v8369_v52 = vld [vmem:[#allocation30_spill] sm:$0xff]  ;;  %v3031_v1 = vld [vmem:[#allocation3 + $0x270] sm:$0x3] }
 0x2ae   :  { %v7642_v14 = vsel %vm1292_vm14, %v8365_v38, %v4724_v59  ;;  %v7647_v39 = vsel %vm1292_vm14, %v8367_v47, %v4728_v23  ;;  %v7657_v59 = vsel %vm1292_vm14, %v8368_v12, %v4729_v37  ;;  %v3225_v23 = vrot.slane %v3026_v40, 1  ;;  %4306 = vmatprep.mubr.msk.bf16.mxu0 %vm232_vm0, %v3588_v4  ;;  %v8370_v20 = vld [vmem:[#allocation31_spill] sm:$0xff] }
 0x2af   :  { %v1363_v41 = vpack.c.bf16 %v7642_v14, %v7632_v54  ;;  %v1371_v46 = vpack.c.bf16 %v7657_v59, %v7647_v39  ;;  %v3540_v21 = vmax.f32 %v7525_v58, %v7563_v2  ;;  %v3226_v44 = vrot.slane %v3028_v42, 1 }
 0x2b0   :  { %v3231_v37 = vrot.slane %v7649_v10, 1  ;;  %v3232_v15 = vrot.slane %v3032_v18, 1  ;;  %v7669_v13 = vmax.f32 %v3309_v0, %v3422_v63  ;;  %v3542_v26 = vmax.f32 %v7563_v2, %v7634_v49 }
 0x2b1   :  { %v3426_v56 = vrot.slane %v3026_v40, 2  ;;  %v3427_v16 = vrot.slane %v3028_v42, 2  ;;  %v3306_v4 = vmax.f32 %v7600_v32, %v3212_v36  ;;  %v3417_v58 = vrot.slane %v7614_v60, 2  ;;  %v3029_v32 = vld [vmem:[#allocation3 + $0x260] sm:$0xff] }
 0x2b2   :  { %2567 = vmatmul.mubr.bf16.gmra.mrb[12].mxu1 %v1339_v48  ;;  %v3418_v8 = vrot.slane %v3023_v28, 2  ;;  %v3227_v11 = vsel %vm3113_vm8, %v3225_v23, %v3226_v44  ;;  %v8371_v0 = vpack.c.bf16 %v8369_v52, %v8370_v20  ;;  %v3218_v2 = vsel %vm3113_vm8, %v3216_v57, %v3217_v43  ;;  %v739_v43 = vld [vmem:[#allocation2 + $0xf2] sm:$0xff]  ;;  %v738_v23 = vld [vmem:[#allocation2 + $0xe2] sm:$0xff] }
 0x2b3   :  { %v3413_v63 = vsel %vm3314_vm10, %v3411_v33, %v3412_v7  ;;  %v3432_v62 = vrot.slane %v7649_v10, 2  ;;  %v3433_v19 = vrot.slane %v3032_v18, 2  ;;  %v3233_v5 = vsel %vm3113_vm8, %v3231_v37, %v3232_v15 }
 0x2b4   :  { %4285 = vmatprep.mubr.msk.bf16.mxu1 %vm402_vm3, %v8371_v0  ;;  %v3311_v48 = vmax.f32 %v3026_v40, %v3227_v11  ;;  %v3222_v28 = vrot.slane %v3025_v53, 1  ;;  %v3223_v38 = vrot.slane %v3027_v50, 1  ;;  %v3567_v25 = vmax.f32 %v3535_v55, %v7597_v34 }
 0x2b5   :  { %v3569_v47 = vmax.f32 %v3537_v17, %v7622_v6  ;;  %v3572_v42 = vmax.f32 %v3540_v21, %v7634_v49  ;;  %v3428_v57 = vsel %vm3314_vm10, %v3426_v56, %v3427_v16  ;;  %v3574_v33 = vmax.f32 %v3542_v26, %v7669_v13  ;;  %3787 = vmatmul.mubr.bf16.gmra.mrb[80].mxu0 %v3587_v27 }
 0x2b6   :  { %v3308_v18 = vmax.f32 %v7614_v60, %v3218_v2  ;;  %v3419_v12 = vsel %vm3314_vm10, %v3417_v58, %v3418_v8  ;;  %v3507_v40 = vmax.f32 %v3306_v4, %v3413_v63  ;;  %v3313_v55 = vmax.f32 %v7649_v10, %v3233_v5  ;;  %4307 = vmatprep.mubr.msk.bf16.mxu0 %vm232_vm0, %v3590_v31  ;;  %v740_v8 = vld [vmem:[#allocation2 + $0x102] sm:$0xff] }
 0x2b7   :  { %v3434_v17 = vsel %vm3314_vm10, %v3432_v62, %v3433_v19  ;;  %v3228_v36 = vrot.slane %v3029_v32, 1  ;;  %v3229_v7 = vrot.slane %v3031_v1, 1  ;;  %v3512_v60 = vmax.f32 %v3311_v48, %v3428_v57  ;;  %v742_v62 = vld [vmem:[#allocation2 + $0x122] sm:$0xff]  ;;  %v743_v19 = vld [vmem:[#allocation2 + $0x132] sm:$0xff] }
 0x2b8   :  { %v3224_v21 = vsel %vm3113_vm8, %v3222_v28, %v3223_v38  ;;  %v3423_v44 = vrot.slane %v3025_v53, 2  ;;  %v3424_v37 = vrot.slane %v3027_v50, 2  ;;  %v1356_v15 = vpack.c.bf16 %v739_v43, %v738_v23  ;;  %v741_v50 = vld [vmem:[#allocation2 + $0x112] sm:$0xff] }
 0x2b9   :  { %v3589_v51 = vpack.c.bf16 %v3569_v47, %v3567_v25  ;;  %v3592_v24 = vpack.c.bf16 %v3574_v33, %v3572_v42  ;;  %v3509_v27 = vmax.f32 %v3308_v18, %v3419_v12  ;;  %v3539_v10 = vmax.f32 %v7597_v34, %v7622_v6 }
 0x2ba   :  { %2577 = vmatmul.mubr.bf16.gmra.mrb[16].mxu1 %v1347_v61  ;;  %v3541_v45 = vmax.f32 %v7622_v6, %v3507_v40  ;;  %v3514_v9 = vmax.f32 %v3313_v55, %v3434_v17  ;;  %v3544_v31 = vmax.f32 %v7634_v49, %v7669_v13  ;;  %v3230_v26 = vsel %vm3113_vm8, %v3228_v36, %v3229_v7 }
 0x2bb   :  { %4286 = vmatprep.mubr.msk.bf16.mxu1 %vm402_vm3, %v1356_v15  ;;  %v3310_v56 = vmax.f32 %v3025_v53, %v3224_v21  ;;  %v3546_v16 = vmax.f32 %v7669_v13, %v3512_v60  ;;  %v3425_v29 = vsel %vm3314_vm10, %v3423_v44, %v3424_v37  ;;  %v3429_v22 = vrot.slane %v3029_v32, 2 }
 0x2bc   :  { %v3430_v61 = vrot.slane %v3031_v1, 2  ;;  %v3571_v34 = vmax.f32 %v3539_v10, %v3507_v40  ;;  %v3573_v4 = vmax.f32 %v3541_v45, %v3509_v27  ;;  %v3312_v6 = vmax.f32 %v3029_v32, %v3230_v26  ;;  %v8372_v10 = vld [vmem:[#allocation7_spill] sm:$0xff] }
 0x2bd   :  { %3795 = vmatmul.mubr.bf16.gmra.mrb[84].mxu0 %v3589_v51  ;;  %v3511_v58 = vmax.f32 %v3310_v56, %v3425_v29  ;;  %v3576_v11 = vmax.f32 %v3544_v31, %v3512_v60  ;;  %v3578_v49 = vmax.f32 %v3546_v16, %v3514_v9  ;;  %v1364_v53 = vpack.c.bf16 %v741_v50, %v740_v8  ;;  %v7790_v31 = vld [vmem:[%s8124_s6] ss:$0 sm:$0xff] }
 0x2be   :  { %4308 = vmatprep.mubr.msk.bf16.mxu0 %vm232_vm0, %v3592_v24  ;;  %v3431_v52 = vsel %vm3314_vm10, %v3429_v22, %v3430_v61  ;;  %v3591_v13 = vpack.c.bf16 %v3573_v4, %v3571_v34  ;;  %v3543_v0 = vmax.f32 %v3507_v40, %v3509_v27  ;;  %v1372_v32 = vpack.c.bf16 %v743_v19, %v742_v62  ;;  %v1499_v24 = vld [vmem:[%s8122_s4] sm:$0x3]  ;;  %s5001_s4 = smov [#allocation4]  }
 0x2bf   :  { %v3513_v20 = vmax.f32 %v3312_v6, %v3431_v52  ;;  %v3545_v2 = vmax.f32 %v3509_v27, %v3511_v58  ;;  %v3594_v63 = vpack.c.bf16 %v3578_v49, %v3576_v11  ;;  %v8373_v45 = vsub.s32 0, %v8372_v10  ;;  %s4112_s6 = sshll.u32 %s5001_s4, 4  ;;  %s4113_s6 = int_to_ptr.vmem [resolvable:$true] %s4112_s6 }
 0x2c0   :  { %v3575_v5 = vmax.f32 %v3543_v0, %v3511_v58  ;;  %v8374_v26 = vsub.s32 1, %v8372_v10  ;;  %p4972_p1 = scmp.lt.s32.totalorder %s4113_s6, %s4113_s6 }
 0x2c1   :  { %v3577_v48 = vmax.f32 %v3545_v2, %v3513_v20  ;;  %v7785_v9 = vrot.slane %v1499_v24, %v8373_v45 }
 0x2c2   :  { %2587 = vmatmul.mubr.bf16.gmra.mrb[20].mxu1 %v1355_v30  ;;  %v7794_v56 = vrot.slane %v1499_v24, %v8374_v26 }
 0x2c3   :  { %4287 = vmatprep.mubr.msk.bf16.mxu1 %vm402_vm3, %v1364_v53  ;;  %v3593_v3 = vpack.c.bf16 %v3577_v48, %v3575_v5 }
 0x2c5   :  { %3803 = vmatmul.mubr.bf16.gmra.mrb[88].mxu0 %v3591_v13 }
 0x2c6   :  { %4309 = vmatprep.mubr.msk.bf16.mxu0 %vm232_vm0, %v3594_v63 }
 0x2ca   :  { %2597 = vmatmul.mubr.bf16.gmra.mrb[24].mxu1 %v1363_v41 }
 0x2cb   :  { %4288 = vmatprep.mubr.msk.bf16.mxu1 %vm402_vm3, %v1372_v32 }
 0x2cd   :  { %3811 = vmatmul.mubr.bf16.gmra.mrb[92].mxu0 %v3593_v3 }
 0x2d2   :  { %2607 = vmatmul.mubr.bf16.gmra.mrb[28].mxu1 %v1371_v46 }
 0x31c   :  { %v2199_v35 = vpop.f32.mrb[32].mxu0 }
 0x31d   :  { %v2201_v30 = vpop.f32.mrb[33].mxu0  ;;  %v2200_v61 = vadd.f32 %v2199_v35, %v7785_v9 }
 0x31e   :  { %v2203_v1 = vpop.f32.mrb[34].mxu0  ;;  %v2202_v34 = vadd.f32 %v2201_v30, %v7794_v56 }
 0x31f   :  { %v2205_v28 = vpop.f32.mrb[35].mxu0  ;;  %v2204_v11 = vadd.f32 %v2203_v1, %v7785_v9 }
 0x320   :  { %v2206_v53 = vadd.f32 %v2205_v28, %v7794_v56 }
 0x326   :  { %v2209_v38 = vpop.f32.mrb[36].mxu0 }
 0x327   :  { %v2211_v25 = vpop.f32.mrb[37].mxu0  ;;  %v2210_v32 = vadd.f32 %v2209_v38, %v7785_v9 }
 0x328   :  { %v2213_v47 = vpop.f32.mrb[38].mxu0  ;;  %v2212_v35 = vadd.f32 %v2211_v25, %v7794_v56 }
 0x329   :  { %v7730_v42 = vpop.f32.mrb[39].mxu0  ;;  %v2214_v10 = vadd.f32 %v2213_v47, %v7785_v9 }
 0x32e   :  { %v7732_v57 = vpop.f32.mrb[40].mxu0 }
 0x32f   :  { %v7734_v54 = vpop.f32.mrb[41].mxu0 }
 0x330   :  { %v7736_v14 = vpop.f32.mrb[42].mxu0 }
 0x331   :  { %v7738_v41 = vpop.f32.mrb[43].mxu0 }
 0x336   :  { %v7740_v43 = vpop.f32.mrb[44].mxu0 }
 0x337   :  { %v7742_v39 = vpop.f32.mrb[45].mxu0 }
 0x338   :  { %v7744_v59 = vpop.f32.mrb[46].mxu0 }
 0x339   :  { %v7746_v46 = vpop.f32.mrb[47].mxu0 }
 0x33f   :  { %v7748_v33 = vpop.f32.mrb[48].mxu0 }
 0x340   :  { %v7750_v18 = vpop.f32.mrb[49].mxu0 }
 0x341   :  { %v7752_v12 = vpop.f32.mrb[50].mxu0 }
 0x342   :  { %v7754_v40 = vpop.f32.mrb[51].mxu0 }
 0x347   :  { %v7756_v55 = vpop.f32.mrb[52].mxu0 }
 0x348   :  { %v7758_v17 = vpop.f32.mrb[53].mxu0 }
 0x349   :  { %v7760_v36 = vpop.f32.mrb[54].mxu0 }
 0x34a   :  { %v7762_v7 = vpop.f32.mrb[55].mxu0 }
 0x34f   :  { %v7764_v23 = vpop.f32.mrb[56].mxu0 }
 0x350   :  { %v7766_v60 = vpop.f32.mrb[57].mxu0 }
 0x351   :  { %v7768_v21 = vpop.f32.mrb[58].mxu0 }
 0x352   :  { %v7770_v44 = vpop.f32.mrb[59].mxu0 }
 0x35b   :  { %v7772_v37 = vpop.f32.mrb[60].mxu0 }
 0x35c   :  { %v7774_v15 = vpop.f32.mrb[61].mxu0 }
 0x35d   :  { %v7776_v51 = vpop.f32.mrb[62].mxu0 }
 0x35e   :  { %v7781_v27 = vpop.f32.mrb[63].mxu0 }
 0x367   :  { %v3756_v16 = vpop.f32.mrb[64].mxu0 }
 0x368   :  { %v3757_v29 = vadd.f32 %v7790_v31, %v3756_v16  ;;  %v3758_v22 = vpop.f32.mrb[65].mxu0  ;;  %v2216_v16 = vadd.f32 %v7730_v42, %v7794_v56  ;;  %v2220_v42 = vadd.f32 %v7732_v57, %v7785_v9 }
 0x369   :  { %v3759_v50 = vpop.f32.mrb[66].mxu0 }
 0x36a   :  { %v3819_v4 = vmax.f32 %v3757_v29, 0.0  ;;  %v3760_v6 = vadd.f32 %v7790_v31, %v3759_v50  ;;  %v3761_v8 = vpop.f32.mrb[67].mxu0 }
 0x36b   :  { %v2538_v58 = vpop.f32.mrb[0].mxu1 }
 0x36c   :  { %v7801_v49 = vadd.f32 %v2538_v58, %v2200_v61  ;;  %v2540_v52 = vpop.f32.mrb[1].mxu1  ;;  %v3820_v13 = vmax.f32 %v3760_v6, 0.0  ;;  %3979 = vrot.lane.b32.xlu0 %v3819_v4, %s4994_s29  ;;  %v2222_v58 = vadd.f32 %v7734_v54, %v7794_v56 }
 0x36d   :  { %v7804_v20 = vadd.f32 %v2540_v52, %v2202_v34  ;;  %v2542_v0 = vpop.f32.mrb[2].mxu1 }
 0x36e   :  { %v7807_v2 = vadd.f32 %v2542_v0, %v2204_v11  ;;  %v2544_v63 = vpop.f32.mrb[3].mxu1  ;;  %3981 = vrot.lane.b32.xlu1 %v3820_v13, %s4994_s29  ;;  %v2224_v13 = vadd.f32 %v7736_v14, %v7785_v9 }
 0x36f   :  { %v7809_v62 = vadd.f32 %v2544_v63, %v2206_v53 }
 0x370   :  { %v3764_v19 = vpop.f32.mrb[68].mxu0 }
 0x371   :  { %v3765_v5 = vadd.f32 %v7790_v31, %v3764_v19  ;;  %v3766_v48 = vpop.f32.mrb[69].mxu0  ;;  %v2226_v19 = vadd.f32 %v7738_v41, %v7794_v56  ;;  %v2230_v41 = vadd.f32 %v7740_v43, %v7785_v9 }
 0x372   :  { %v3767_v3 = vpop.f32.mrb[70].mxu0 }
 0x373   :  { %v3821_v30 = vmax.f32 %v3765_v5, 0.0  ;;  %v3768_v1 = vadd.f32 %v7790_v31, %v3767_v3  ;;  %v3769_v24 = vpop.f32.mrb[71].mxu0 }
 0x374   :  { %v2548_v28 = vpop.f32.mrb[4].mxu1 }
 0x375   :  { %v7817_v45 = vadd.f32 %v2548_v28, %v2210_v32  ;;  %v2550_v26 = vpop.f32.mrb[5].mxu1  ;;  %v3822_v29 = vmax.f32 %v3768_v1, 0.0  ;;  %3983 = vrot.lane.b32.xlu0 %v3821_v30, %s4994_s29  ;;  %v2232_v28 = vadd.f32 %v7742_v39, %v7794_v56 }
 0x376   :  { %v7821_v22 = vadd.f32 %v2550_v26, %v2212_v35  ;;  %v2552_v38 = vpop.f32.mrb[6].mxu1 }
 0x377   :  { %v7824_v25 = vadd.f32 %v2552_v38, %v2214_v10  ;;  %v2554_v61 = vpop.f32.mrb[7].mxu1  ;;  %3985 = vrot.lane.b32.xlu1 %v3822_v29, %s4994_s29  ;;  %v2234_v29 = vadd.f32 %v7744_v59, %v7785_v9 }
 0x378   :  { %v7826_v50 = vadd.f32 %v2554_v61, %v2216_v16  ;;  %v3772_v47 = vpop.f32.mrb[72].mxu0 }
 0x379   :  { %v3773_v34 = vadd.f32 %v7790_v31, %v3772_v47  ;;  %v3774_v4 = vpop.f32.mrb[73].mxu0  ;;  %v2236_v47 = vadd.f32 %v7746_v46, %v7794_v56  ;;  %v2240_v46 = vadd.f32 %v7748_v33, %v7785_v9 }
 0x37a   :  { %v3775_v6 = vpop.f32.mrb[74].mxu0 }
 0x37b   :  { %v3823_v8 = vmax.f32 %v3773_v34, 0.0  ;;  %v3776_v11 = vadd.f32 %v7790_v31, %v3775_v6  ;;  %v3777_v53 = vpop.f32.mrb[75].mxu0 }
 0x37d   :  { %v2558_v52 = vpop.f32.mrb[8].mxu1  ;;  %v3824_v5 = vmax.f32 %v3776_v11, 0.0  ;;  %3987 = vrot.lane.b32.xlu0 %v3823_v8, %s4994_s29 }
 0x37e   :  { %v7837_v0 = vadd.f32 %v2558_v52, %v2220_v42  ;;  %v2560_v63 = vpop.f32.mrb[9].mxu1  ;;  %v2242_v52 = vadd.f32 %v7750_v18, %v7794_v56 }
 0x37f   :  { %v7841_v57 = vadd.f32 %v2560_v63, %v2222_v58  ;;  %v2562_v54 = vpop.f32.mrb[10].mxu1  ;;  %3989 = vrot.lane.b32.xlu1 %v3824_v5, %s4994_s29  ;;  %v2244_v5 = vadd.f32 %v7752_v12, %v7785_v9 }
 0x380   :  { %v7844_v48 = vadd.f32 %v2562_v54, %v2224_v13  ;;  %v2564_v32 = vpop.f32.mrb[11].mxu1  ;;  %v3780_v14 = vpop.f32.mrb[76].mxu0 }
 0x381   :  { %v7846_v3 = vadd.f32 %v2564_v32, %v2226_v19  ;;  %v3781_v35 = vadd.f32 %v7790_v31, %v3780_v14  ;;  %v3782_v30 = vpop.f32.mrb[77].mxu0  ;;  %v2246_v14 = vadd.f32 %v7754_v40, %v7794_v56  ;;  %v2250_v40 = vadd.f32 %v7756_v55, %v7785_v9 }
 0x382   :  { %v3783_v1 = vpop.f32.mrb[78].mxu0 }
 0x383   :  { %v3825_v24 = vmax.f32 %v3781_v35, 0.0  ;;  %v3784_v10 = vadd.f32 %v7790_v31, %v3783_v1  ;;  %v3785_v16 = vpop.f32.mrb[79].mxu0 }
 0x385   :  { %v2568_v26 = vpop.f32.mrb[12].mxu1  ;;  %v3826_v34 = vmax.f32 %v3784_v10, 0.0  ;;  %3991 = vrot.lane.b32.xlu0 %v3825_v24, %s4994_s29 }
 0x386   :  { %v7857_v38 = vadd.f32 %v2568_v26, %v2230_v41  ;;  %v2570_v61 = vpop.f32.mrb[13].mxu1  ;;  %v2252_v26 = vadd.f32 %v7758_v17, %v7794_v56 }
 0x387   :  { %v7861_v43 = vadd.f32 %v2570_v61, %v2232_v28  ;;  %v2572_v39 = vpop.f32.mrb[14].mxu1  ;;  %3993 = vrot.lane.b32.xlu1 %v3826_v34, %s4994_s29  ;;  %v2254_v34 = vadd.f32 %v7760_v36, %v7785_v9 }
 0x388   :  { %v7864_v4 = vadd.f32 %v2572_v39, %v2234_v29  ;;  %v2574_v42 = vpop.f32.mrb[15].mxu1  ;;  %v3788_v59 = vpop.f32.mrb[80].mxu0 }
 0x389   :  { %v7866_v6 = vadd.f32 %v2574_v42, %v2236_v47  ;;  %v3789_v58 = vadd.f32 %v7790_v31, %v3788_v59  ;;  %v3790_v8 = vpop.f32.mrb[81].mxu0  ;;  %v2256_v59 = vadd.f32 %v7762_v7, %v7794_v56  ;;  %v2260_v7 = vadd.f32 %v7764_v23, %v7785_v9 }
 0x38a   :  { %v3791_v11 = vpop.f32.mrb[82].mxu0 }
 0x38b   :  { %v3827_v53 = vmax.f32 %v3789_v58, 0.0  ;;  %v3792_v13 = vadd.f32 %v7790_v31, %v3791_v11  ;;  %v3793_v19 = vpop.f32.mrb[83].mxu0 }
 0x38d   :  { %v2578_v63 = vpop.f32.mrb[16].mxu1  ;;  %v3828_v35 = vmax.f32 %v3792_v13, 0.0  ;;  %3995 = vrot.lane.b32.xlu0 %v3827_v53, %s4994_s29 }
 0x38e   :  { %v7877_v54 = vadd.f32 %v2578_v63, %v2240_v46  ;;  %v2580_v32 = vpop.f32.mrb[17].mxu1  ;;  %v2262_v63 = vadd.f32 %v7766_v60, %v7794_v56 }
 0x38f   :  { %v7881_v33 = vadd.f32 %v2580_v32, %v2242_v52  ;;  %v2582_v18 = vpop.f32.mrb[18].mxu1  ;;  %3997 = vrot.lane.b32.xlu1 %v3828_v35, %s4994_s29  ;;  %v2264_v35 = vadd.f32 %v7768_v21, %v7785_v9 }
 0x390   :  { %v7884_v30 = vadd.f32 %v2582_v18, %v2244_v5  ;;  %v2584_v41 = vpop.f32.mrb[19].mxu1  ;;  %v3796_v12 = vpop.f32.mrb[84].mxu0 }
 0x391   :  { %v7886_v1 = vadd.f32 %v2584_v41, %v2246_v14  ;;  %v3797_v28 = vadd.f32 %v7790_v31, %v3796_v12  ;;  %v3798_v24 = vpop.f32.mrb[85].mxu0  ;;  %v2266_v12 = vadd.f32 %v7770_v44, %v7794_v56 }
 0x392   :  { %v3799_v10 = vpop.f32.mrb[86].mxu0 }
 0x393   :  { %v3829_v16 = vmax.f32 %v3797_v28, 0.0  ;;  %v3800_v29 = vadd.f32 %v7790_v31, %v3799_v10  ;;  %v3801_v47 = vpop.f32.mrb[87].mxu0  ;;  %v2617_v10 = vmax.f32 %v7801_v49, 0.0  ;;  %v2272_v49 = vadd.f32 %v7774_v15, %v7794_v56 }
 0x395   :  { %v2588_v61 = vpop.f32.mrb[20].mxu1  ;;  %v3830_v58 = vmax.f32 %v3800_v29, 0.0  ;;  %3999 = vrot.lane.b32.xlu0 %v3829_v16, %s4994_s29  ;;  %v2619_v16 = vmax.f32 %v7807_v2, 0.0 }
 0x396   :  { %v7897_v39 = vadd.f32 %v2588_v61, %v2250_v40  ;;  %v2590_v42 = vpop.f32.mrb[21].mxu1  ;;  %v2270_v61 = vadd.f32 %v7772_v37, %v7785_v9  ;;  %v2276_v37 = vadd.f32 %v7781_v27, %v7794_v56  ;;  %v2624_v27 = vmax.f32 %v7826_v50, 0.0 }
 0x397   :  { %v7901_v55 = vadd.f32 %v2590_v42, %v2252_v26  ;;  %v2592_v17 = vpop.f32.mrb[22].mxu1  ;;  %4001 = vrot.lane.b32.xlu1 %v3830_v58, %s4994_s29  ;;  %v2274_v58 = vadd.f32 %v7776_v51, %v7785_v9  ;;  %v2623_v51 = vmax.f32 %v7824_v25, 0.0  ;;  %v2622_v9 = vmax.f32 %v7821_v22, 0.0 }
 0x398   :  { %v7904_v8 = vadd.f32 %v2592_v17, %v2254_v34  ;;  %v2594_v46 = vpop.f32.mrb[23].mxu1  ;;  %v3804_v36 = vpop.f32.mrb[88].mxu0  ;;  %v2618_v34 = vmax.f32 %v7804_v20, 0.0  ;;  %v2625_v56 = vmax.f32 %v7837_v0, 0.0  ;;  %v2628_v22 = vmax.f32 %v7846_v3, 0.0 }
 0x399   :  { %v7906_v11 = vadd.f32 %v2594_v46, %v2256_v59  ;;  %v3805_v52 = vadd.f32 %v7790_v31, %v3804_v36  ;;  %v3806_v53 = vpop.f32.mrb[89].mxu0  ;;  %v2620_v36 = vmax.f32 %v7809_v62, 0.0  ;;  %v2627_v62 = vmax.f32 %v7844_v48, 0.0 }
 0x39a   :  { %v3807_v13 = vpop.f32.mrb[90].mxu0  ;;  %v2629_v25 = vmax.f32 %v7857_v38, 0.0  ;;  %v2631_v50 = vmax.f32 %v7864_v4, 0.0  ;;  %v2630_v0 = vmax.f32 %v7861_v43, 0.0  ;;  %v2633_v48 = vmax.f32 %v7877_v54, 0.0 }
 0x39b   :  { %v3831_v19 = vmax.f32 %v3805_v52, 0.0  ;;  %v3808_v5 = vadd.f32 %v7790_v31, %v3807_v13  ;;  %v3809_v14 = vpop.f32.mrb[91].mxu0  ;;  %v2635_v3 = vmax.f32 %v7884_v30, 0.0  ;;  %v2634_v38 = vmax.f32 %v7881_v33, 0.0 }
 0x39c   :  { %v2636_v43 = vmax.f32 %v7886_v1, 0.0  ;;  %v2637_v4 = vmax.f32 %v7897_v39, 0.0  ;;  %v2638_v54 = vmax.f32 %v7901_v55, 0.0  ;;  %v2640_v33 = vmax.f32 %v7906_v11, 0.0 }
 0x39d   :  { %v2598_v32 = vpop.f32.mrb[24].mxu1  ;;  %v3832_v28 = vmax.f32 %v3808_v5, 0.0  ;;  %4003 = vrot.lane.b32.xlu0 %v3831_v19, %s4994_s29 }
 0x39e   :  { %v7917_v18 = vadd.f32 %v2598_v32, %v2260_v7  ;;  %v2600_v41 = vpop.f32.mrb[25].mxu1 }
 0x39f   :  { %v7921_v23 = vadd.f32 %v2600_v41, %v2262_v63  ;;  %v2602_v60 = vpop.f32.mrb[26].mxu1  ;;  %4005 = vrot.lane.b32.xlu1 %v3832_v28, %s4994_s29 }
 0x3a0   :  { %v7924_v24 = vadd.f32 %v2602_v60, %v2264_v35  ;;  %v2604_v40 = vpop.f32.mrb[27].mxu1  ;;  %v3812_v21 = vpop.f32.mrb[92].mxu0  ;;  %v2641_v30 = vmax.f32 %v7917_v18, 0.0 }
 0x3a1   :  { %v7927_v26 = vadd.f32 %v2604_v40, %v2266_v12  ;;  %3851 = vrot.lane.b32.xlu0 %v2617_v10, %s4992_s2  ;;  %v7933_v44 = vadd.f32 %v7790_v31, %v3812_v21  ;;  %v3814_v29 = vpop.f32.mrb[93].mxu0  ;;  %v2642_v39 = vmax.f32 %v7921_v23, 0.0 }
 0x3a2   :  { %v3815_v47 = vpop.f32.mrb[94].mxu0  ;;  %v2643_v1 = vmax.f32 %v7924_v24, 0.0 }
 0x3a3   :  { %3853 = vrot.lane.b32.xlu1 %v2619_v16, %s4992_s2  ;;  %v7942_v2 = vadd.f32 %v7790_v31, %v3815_v47  ;;  %v3817_v59 = vpop.f32.mrb[95].mxu0  ;;  %v2621_v31 = vmax.f32 %v7817_v45, 0.0  ;;  %v2626_v45 = vmax.f32 %v7841_v57, 0.0  ;;  %v2632_v57 = vmax.f32 %v7866_v6, 0.0 }
 0x3a4   :  { %v2639_v6 = vmax.f32 %v7904_v8, 0.0  ;;  %v2644_v55 = vmax.f32 %v7927_v26, 0.0  ;;  %v3833_v19 = vmax.f32 %v7933_v44, 0.0  ;;  %v8375_v44 = vld [vmem:[#allocation8_spill] sm:$0xff] }
 0x3a5   :  { %v2608_v42 = vpop.f32.mrb[28].mxu1  ;;  %3915 = vrot.lane.b32.xlu0 %v2618_v34, %s4992_s2  ;;  %v3834_v5 = vmax.f32 %v7942_v2, 0.0  ;;  %v8376_v29 = vmax.f32 %v8375_v44, 0.0  ;;  %v8391_v44 = vld [vmem:[#allocation16_spill] sm:$0xff] }
 0x3a6   :  { %v4367_v17 = vadd.f32 %v2608_v42, %v2270_v61  ;;  %v2610_v46 = vpop.f32.mrb[29].mxu1 }
 0x3a7   :  { %v4369_v15 = vadd.f32 %v2610_v46, %v2272_v49  ;;  %v2612_v52 = vpop.f32.mrb[30].mxu1  ;;  %3917 = vrot.lane.b32.xlu1 %v2620_v36, %s4992_s2  ;;  %v8377_v49 = vld [vmem:[#allocation9_spill] sm:$0xff] }
 0x3a8   :  { %v4371_v20 = vadd.f32 %v2612_v52, %v2274_v58  ;;  %v2614_v53 = vpop.f32.mrb[31].mxu1  ;;  %v2645_v8 = vmax.f32 %v4367_v17, 0.0  ;;  %v8378_v34 = vmax.f32 %v8377_v49, 0.0  ;;  %v8393_v49 = vld [vmem:[#allocation17_spill] sm:$0xff] }
 0x3a9   :  { %v4373_v7 = vadd.f32 %v2614_v53, %v2276_v37  ;;  %3855 = vrot.lane.b32.xlu0 %v2621_v31, %s4992_s2  ;;  %v2646_v13 = vmax.f32 %v4369_v15, 0.0  ;;  %v8379_v15 = vld [vmem:[#allocation10_spill] sm:$0xff]  ;;  %v8381_v31 = vld [vmem:[#allocation11_spill] sm:$0xff] }
 0x3aa   :  { %v2647_v11 = vmax.f32 %v4371_v20, 0.0  ;;  %v8380_v52 = vmax.f32 %v8379_v15, 0.0 }
 0x3ab   :  { %3857 = vrot.lane.b32.xlu1 %v2623_v51, %s4992_s2  ;;  %v2648_v63 = vmax.f32 %v4373_v7, 0.0  ;;  %v8382_v7 = vmax.f32 %v8381_v31, 0.0 }
 0x3ad   :  { %3919 = vrot.lane.b32.xlu0 %v2622_v9, %s4992_s2 }
 0x3af   :  { %3921 = vrot.lane.b32.xlu1 %v2624_v27, %s4992_s2 }
 0x3b1   :  { %3859 = vrot.lane.b32.xlu0 %v2625_v56, %s4992_s2 }
 0x3b3   :  { %3861 = vrot.lane.b32.xlu1 %v2627_v62, %s4992_s2 }
 0x3b5   :  { %3923 = vrot.lane.b32.xlu0 %v2626_v45, %s4992_s2 }
 0x3b7   :  { %3925 = vrot.lane.b32.xlu1 %v2628_v22, %s4992_s2 }
 0x3b9   :  { %3863 = vrot.lane.b32.xlu0 %v2629_v25, %s4992_s2 }
 0x3bb   :  { %3865 = vrot.lane.b32.xlu1 %v2631_v50, %s4992_s2  ;;  %v8383_v50 = vld [vmem:[#allocation12_spill] sm:$0xff] }
 0x3bd   :  { %3927 = vrot.lane.b32.xlu0 %v2630_v0, %s4992_s2  ;;  %v8384_v0 = vmax.f32 %v8383_v50, 0.0  ;;  %v8401_v50 = vld [vmem:[#allocation21_spill] sm:$0xff] }
 0x3bf   :  { %3929 = vrot.lane.b32.xlu1 %v2632_v57, %s4992_s2 }
 0x3c1   :  { %3867 = vrot.lane.b32.xlu0 %v2633_v48, %s4992_s2 }
 0x3c3   :  { %3869 = vrot.lane.b32.xlu1 %v2635_v3, %s4992_s2  ;;  %v8385_v3 = vld [vmem:[#allocation13_spill] sm:$0xff] }
 0x3c5   :  { %3931 = vrot.lane.b32.xlu0 %v2634_v38, %s4992_s2  ;;  %v8386_v38 = vmax.f32 %v8385_v3, 0.0 }
 0x3c7   :  { %3933 = vrot.lane.b32.xlu1 %v2636_v43, %s4992_s2 }
 0x3c9   :  { %3871 = vrot.lane.b32.xlu0 %v2637_v4, %s4992_s2 }
 0x3cb   :  { %3873 = vrot.lane.b32.xlu1 %v2639_v6, %s4992_s2 }
 0x3cd   :  { %3935 = vrot.lane.b32.xlu0 %v2638_v54, %s4992_s2 }
 0x3cf   :  { %3937 = vrot.lane.b32.xlu1 %v2640_v33, %s4992_s2 }
 0x3d1   :  { %3875 = vrot.lane.b32.xlu0 %v2641_v30, %s4992_s2 }
 0x3d3   :  { %3877 = vrot.lane.b32.xlu1 %v2643_v1, %s4992_s2 }
 0x3d5   :  { %3939 = vrot.lane.b32.xlu0 %v2642_v39, %s4992_s2 }
 0x3d7   :  { %3941 = vrot.lane.b32.xlu1 %v2644_v55, %s4992_s2  ;;  %v8387_v55 = vld [vmem:[#allocation14_spill] sm:$0xff] }
 0x3d9   :  { %3879 = vrot.lane.b32.xlu0 %v2645_v8, %s4992_s2  ;;  %v8388_v8 = vmax.f32 %v8387_v55, 0.0 }
 0x3db   :  { %3881 = vrot.lane.b32.xlu1 %v2647_v11, %s4992_s2 }
 0x3dd   :  { %3943 = vrot.lane.b32.xlu0 %v2646_v13, %s4992_s2 }
 0x3de   :  { %v3980_v32 = vpop.permute.xlu0 %3979 }
 0x3df   :  { %3945 = vrot.lane.b32.xlu1 %v2648_v63, %s4992_s2  ;;  %v8389_v63 = vld [vmem:[#allocation15_spill] sm:$0xff]  ;;  %s4967_s2 = scalar_lea.vmem %s4113_s6, 4096 }
 0x3e0   :  { %v3982_v14 = vpop.permute.xlu1 %3981  ;;  %p4968_p0 = scmp.ne.s32.totalorder %s4113_s6, %s4967_s2  ;;  %p4973_p2 = scmp.lt.s32.totalorder %s4967_s2, %s4967_s2 }
 0x3e1   :  { %4007 = vrot.lane.b32.xlu0 %v3833_v19, %s4994_s29  ;;  %v8390_v19 = vmax.f32 %v8389_v63, 0.0 }
 0x3e2   :  { %p4974_p3 = por %p4973_p2, %p4972_p1 }
 0x3e3   :  { %4009 = vrot.lane.b32.xlu1 %v3834_v5, %s4994_s29 }
 0x3e4   :  { %p4975_p4 = pnand %p4974_p3, %p4968_p0 }
 0x3e7   :  { %v3984_v35 = vpop.permute.xlu0 %3983 }
 0x3e9   :  { %v3986_v18 = vpop.permute.xlu1 %3985 }
 0x3ef   :  { %v3988_v41 = vpop.permute.xlu0 %3987 }
 0x3f1   :  { %v3990_v12 = vpop.permute.xlu1 %3989 }
 0x3f7   :  { %v3992_v28 = vpop.permute.xlu0 %3991 }
 0x3f9   :  { %v3994_v23 = vpop.permute.xlu1 %3993 }
 0x3ff   :  { %v8007_v60 = vpop.permute.xlu0 %3995 }
 0x401   :  { %v8009_v24 = vpop.permute.xlu1 %3997 }
 0x407   :  { %v8011_v40 = vpop.permute.xlu0 %3999 }
 0x409   :  { %v8013_v10 = vpop.permute.xlu1 %4001 }
 0x40f   :  { %v8015_v26 = vpop.permute.xlu0 %4003 }
 0x411   :  { %v8017_v21 = vpop.permute.xlu1 %4005 }
 0x413   :  { %v3852_v16 = vpop.permute.xlu0 %3851 }
 0x414   :  { %v4027_v61 = vsel %vm232_vm0, %v8376_v29, %v3852_v16  ;;  %v8392_v29 = vmax.f32 %v8391_v44, 0.0 }
 0x415   :  { %4075 = vst [vmem:[#allocation4] sm:$0xff] %v4027_v61  ;;  %v3854_v47 = vpop.permute.xlu1 %3853 }
 0x416   :  { %v4028_v42 = vsel %vm232_vm0, %v8378_v34, %v3854_v47  ;;  %v8394_v34 = vmax.f32 %v8393_v49, 0.0 }
 0x417   :  { %4077 = vst [vmem:[#allocation4 + $0x10] sm:$0xff] %v4028_v42  ;;  %v3916_v2 = vpop.permute.xlu0 %3915 }
 0x418   :  { %v4043_v59 = vsel %vm232_vm0, %v3852_v16, %v3916_v2 }
 0x419   :  { %v4059_v58 = vsel %vm1208_vm12, %v4043_v59, %v3980_v32  ;;  %v3918_v17 = vpop.permute.xlu1 %3917 }
 0x41a   :  { %4076 = vst [vmem:[#allocation4 + $0x8] sm:$0xff] %v4059_v58  ;;  %v4044_v46 = vsel %vm232_vm0, %v3854_v47, %v3918_v17 }
 0x41b   :  { %v4060_v37 = vsel %vm1208_vm12, %v4044_v46, %v3982_v14  ;;  %v3856_v36 = vpop.permute.xlu0 %3855 }
 0x41c   :  { %4078 = vst [vmem:[#allocation4 + $0x18] sm:$0xff] %v4060_v37  ;;  %v4029_v20 = vsel %vm232_vm0, %v8380_v52, %v3856_v36  ;;  %v8395_v37 = vld [vmem:[#allocation18_spill] sm:$0xff] }
 0x41d   :  { %4079 = vst [vmem:[#allocation4 + $0x20] sm:$0xff] %v4029_v20  ;;  %v3858_v53 = vpop.permute.xlu1 %3857  ;;  %v8397_v20 = vld [vmem:[#allocation19_spill] sm:$0xff] }
 0x41e   :  { %v4030_v51 = vsel %vm232_vm0, %v8382_v7, %v3858_v53 }
 0x41f   :  { %4081 = vst [vmem:[#allocation4 + $0x30] sm:$0xff] %v4030_v51  ;;  %v3920_v9 = vpop.permute.xlu0 %3919 }
 0x420   :  { %v4045_v27 = vsel %vm232_vm0, %v3856_v36, %v3920_v9  ;;  %v8396_v36 = vmax.f32 %v8395_v37, 0.0 }
 0x421   :  { %v4061_v56 = vsel %vm1208_vm12, %v4045_v27, %v3984_v35  ;;  %v3922_v62 = vpop.permute.xlu1 %3921 }
 0x422   :  { %4080 = vst [vmem:[#allocation4 + $0x28] sm:$0xff] %v4061_v56  ;;  %v4046_v45 = vsel %vm232_vm0, %v3858_v53, %v3922_v62  ;;  %v8398_v53 = vmax.f32 %v8397_v20, 0.0  ;;  %v8399_v62 = vld [vmem:[#allocation20_spill] sm:$0xff] }
 0x423   :  { %v4062_v22 = vsel %vm1208_vm12, %v4046_v45, %v3986_v18  ;;  %v3860_v25 = vpop.permute.xlu0 %3859  ;;  %v8400_v45 = vmax.f32 %v8399_v62, 0.0 }
 0x424   :  { %4082 = vst [vmem:[#allocation4 + $0x38] sm:$0xff] %v4062_v22  ;;  %v4031_v57 = vsel %vm232_vm0, %v8384_v0, %v3860_v25  ;;  %v8402_v0 = vmax.f32 %v8401_v50, 0.0 }
 0x425   :  { %4083 = vst [vmem:[#allocation4 + $0x40] sm:$0xff] %v4031_v57  ;;  %v3862_v48 = vpop.permute.xlu1 %3861 }
 0x426   :  { %v4032_v43 = vsel %vm232_vm0, %v8386_v38, %v3862_v48 }
 0x427   :  { %4085 = vst [vmem:[#allocation4 + $0x50] sm:$0xff] %v4032_v43  ;;  %v3924_v4 = vpop.permute.xlu0 %3923 }
 0x428   :  { %v4047_v6 = vsel %vm232_vm0, %v3860_v25, %v3924_v4 }
 0x429   :  { %v4063_v54 = vsel %vm1208_vm12, %v4047_v6, %v3988_v41  ;;  %v3926_v33 = vpop.permute.xlu1 %3925  ;;  %v8403_v6 = vld [vmem:[#allocation22_spill] sm:$0xff] }
 0x42a   :  { %4084 = vst [vmem:[#allocation4 + $0x48] sm:$0xff] %v4063_v54  ;;  %v4048_v30 = vsel %vm232_vm0, %v3862_v48, %v3926_v33  ;;  %v8404_v54 = vmax.f32 %v8403_v6, 0.0 }
 0x42b   :  { %v4064_v1 = vsel %vm1208_vm12, %v4048_v30, %v3990_v12  ;;  %v3864_v39 = vpop.permute.xlu0 %3863 }
 0x42c   :  { %4086 = vst [vmem:[#allocation4 + $0x58] sm:$0xff] %v4064_v1  ;;  %v4033_v11 = vsel %vm232_vm0, %v8388_v8, %v3864_v39  ;;  %v8405_v1 = vld [vmem:[#allocation23_spill] sm:$0xff] }
 0x42d   :  { %4087 = vst [vmem:[#allocation4 + $0x60] sm:$0xff] %v4033_v11  ;;  %v3866_v13 = vpop.permute.xlu1 %3865 }
 0x42e   :  { %v4034_v5 = vsel %vm232_vm0, %v8390_v19, %v3866_v13 }
 0x42f   :  { %4089 = vst [vmem:[#allocation4 + $0x70] sm:$0xff] %v4034_v5  ;;  %v3928_v32 = vpop.permute.xlu0 %3927 }
 0x430   :  { %v4049_v14 = vsel %vm232_vm0, %v3864_v39, %v3928_v32  ;;  %v8406_v39 = vmax.f32 %v8405_v1, 0.0 }
 0x431   :  { %v4065_v35 = vsel %vm1208_vm12, %v4049_v14, %v3992_v28  ;;  %v3930_v18 = vpop.permute.xlu1 %3929 }
 0x432   :  { %4088 = vst [vmem:[#allocation4 + $0x68] sm:$0xff] %v4065_v35  ;;  %v4050_v41 = vsel %vm232_vm0, %v3866_v13, %v3930_v18 }
 0x433   :  { %v4066_v12 = vsel %vm1208_vm12, %v4050_v41, %v3994_v23  ;;  %v3868_v16 = vpop.permute.xlu0 %3867 }
 0x434   :  { %4090 = vst [vmem:[#allocation4 + $0x78] sm:$0xff] %v4066_v12  ;;  %v4035_v61 = vsel %vm232_vm0, %v8392_v29, %v3868_v16 }
 0x435   :  { %4091 = vst [vmem:[#allocation4 + $0x80] sm:$0xff] %v4035_v61  ;;  %v3870_v47 = vpop.permute.xlu1 %3869 }
 0x436   :  { %v4036_v42 = vsel %vm232_vm0, %v8394_v34, %v3870_v47 }
 0x437   :  { %4093 = vst [vmem:[#allocation4 + $0x90] sm:$0xff] %v4036_v42  ;;  %v3932_v28 = vpop.permute.xlu0 %3931 }
 0x438   :  { %v4051_v2 = vsel %vm232_vm0, %v3868_v16, %v3932_v28 }
 0x439   :  { %v4067_v59 = vsel %vm1208_vm12, %v4051_v2, %v8007_v60  ;;  %v3934_v23 = vpop.permute.xlu1 %3933 }
 0x43a   :  { %4092 = vst [vmem:[#allocation4 + $0x88] sm:$0xff] %v4067_v59  ;;  %v4052_v58 = vsel %vm232_vm0, %v3870_v47, %v3934_v23 }
 0x43b   :  { %v4068_v17 = vsel %vm1208_vm12, %v4052_v58, %v8009_v24  ;;  %v3872_v46 = vpop.permute.xlu0 %3871 }
 0x43c   :  { %4094 = vst [vmem:[#allocation4 + $0x98] sm:$0xff] %v4068_v17  ;;  %v4037_v15 = vsel %vm232_vm0, %v8396_v36, %v3872_v46 }
 0x43d   :  { %4095 = vst [vmem:[#allocation4 + $0xa0] sm:$0xff] %v4037_v15  ;;  %v3874_v52 = vpop.permute.xlu1 %3873 }
 0x43e   :  { %v4038_v31 = vsel %vm232_vm0, %v8398_v53, %v3874_v52 }
 0x43f   :  { %4097 = vst [vmem:[#allocation4 + $0xb0] sm:$0xff] %v4038_v31  ;;  %v3936_v60 = vpop.permute.xlu0 %3935 }
 0x440   :  { %v4053_v7 = vsel %vm232_vm0, %v3872_v46, %v3936_v60 }
 0x441   :  { %v4069_v51 = vsel %vm1208_vm12, %v4053_v7, %v8011_v40  ;;  %v3938_v24 = vpop.permute.xlu1 %3937 }
 0x442   :  { %4096 = vst [vmem:[#allocation4 + $0xa8] sm:$0xff] %v4069_v51  ;;  %v4054_v9 = vsel %vm232_vm0, %v3874_v52, %v3938_v24 }
 0x443   :  { %v4070_v27 = vsel %vm1208_vm12, %v4054_v9, %v8013_v10  ;;  %v3876_v56 = vpop.permute.xlu0 %3875 }
 0x444   :  { %4098 = vst [vmem:[#allocation4 + $0xb8] sm:$0xff] %v4070_v27  ;;  %v4039_v22 = vsel %vm232_vm0, %v8400_v45, %v3876_v56 }
 0x445   :  { %4099 = vst [vmem:[#allocation4 + $0xc0] sm:$0xff] %v4039_v22  ;;  %v3878_v25 = vpop.permute.xlu1 %3877 }
 0x446   :  { %v4040_v57 = vsel %vm232_vm0, %v8402_v0, %v3878_v25 }
 0x447   :  { %4101 = vst [vmem:[#allocation4 + $0xd0] sm:$0xff] %v4040_v57  ;;  %v3940_v40 = vpop.permute.xlu0 %3939 }
 0x448   :  { %v4055_v48 = vsel %vm232_vm0, %v3876_v56, %v3940_v40 }
 0x449   :  { %v4071_v3 = vsel %vm1208_vm12, %v4055_v48, %v8015_v26  ;;  %v3942_v10 = vpop.permute.xlu1 %3941 }
 0x44a   :  { %4100 = vst [vmem:[#allocation4 + $0xc8] sm:$0xff] %v4071_v3  ;;  %v4056_v38 = vsel %vm232_vm0, %v3878_v25, %v3942_v10 }
 0x44b   :  { %v4072_v43 = vsel %vm1208_vm12, %v4056_v38, %v8017_v21  ;;  %v3880_v4 = vpop.permute.xlu0 %3879 }
 0x44c   :  { %4102 = vst [vmem:[#allocation4 + $0xd8] sm:$0xff] %v4072_v43  ;;  %v4041_v33 = vsel %vm232_vm0, %v8404_v54, %v3880_v4 }
 0x44d   :  { %4103 = vst [vmem:[#allocation4 + $0xe0] sm:$0xff] %v4041_v33  ;;  %v3882_v30 = vpop.permute.xlu1 %3881 }
 0x44e   :  { %v4042_v55 = vsel %vm232_vm0, %v8406_v39, %v3882_v30 }
 0x44f   :  { %4105 = vst [vmem:[#allocation4 + $0xf0] sm:$0xff] %v4042_v55  ;;  %v3944_v26 = vpop.permute.xlu0 %3943 }
 0x450   :  { %v4057_v11 = vsel %vm232_vm0, %v3880_v4, %v3944_v26 }
 0x451   :  { %v3946_v8 = vpop.permute.xlu1 %3945 }
 0x452   :  { %v4058_v63 = vsel %vm232_vm0, %v3882_v30, %v3946_v8 }
 0x453   :  { %v4008_v21 = vpop.permute.xlu0 %4007 }
 0x454   :  { %v4073_v13 = vsel %vm1208_vm12, %v4057_v11, %v4008_v21 }
 0x455   :  { %4104 = vst [vmem:[#allocation4 + $0xe8] sm:$0xff] %v4073_v13  ;;  %v4010_v19 = vpop.permute.xlu1 %4009 }
 0x456   :  { %v4074_v5 = vsel %vm1208_vm12, %v4058_v63, %v4010_v19 }
 0x457   :  { %4106 = vst [vmem:[#allocation4 + $0xf8] sm:$0xff] %v4074_v5 }
 0x458   :  { %4978 = shalt.err (!%p4975_p4)
}
 0x459   :  { %s4979_s21 = scalar_lea.hbm %s8125_s7, 4096 }
 0x45a   :  { %p4980_p5 = scmp.ne.s32.totalorder %s8125_s7, %s4979_s21  ;;  %p4983_p6 = scmp.lt.u32.totalorder %s4979_s21, %s8125_s7 }
 0x45c   :  { %p4985_p7 = pnand %p4983_p6, %p4980_p5 }
 0x45e   :  { %4988 = shalt.err (!%p4985_p7)
}
 0x45f   :  { %s5002_s27 = smov 256  }
 0x460   :  { %4118 = dma.vmem_to_hbm [thread:$0]  %s4113_s6, 4096, %s8125_s7, [#allocation5], %s5002_s27, %s5002_s27, %s5000_s10  }
 0x461   :  { %4989 = dma.done.wait [#allocation5], 4096  }
 0x462   :  { %4990 = vsyncadd [#allocation5], 4294963200 }
 0x463   :  { %4122 = vsyncpa [#allocation5], 1 }

</bundles_post_ra>
